<compile_context>
chip_gen: v5e
topology: v5e:2x2
jax: 0.10.0
libtpu: 0.0.40
codegen_flags: <defaults>
</compile_context>

<pallas_src>
import math

import jax
import jax.numpy as jnp
from jax.experimental import pallas as pl
from jax.experimental.pallas import tpu as pltpu


# --------------------------------------------------------------------------
# One-time parameter packing (pure JAX, outside the kernel)
# --------------------------------------------------------------------------
def _block_diag(w, c):
    """(a, b) -> (c*a, c*b) block-diagonal with c copies of w."""
    a, b = w.shape
    eye = jnp.eye(c, dtype=w.dtype)
    return jnp.einsum("ij,ab->iajb", eye, w).reshape(c * a, c * b)


def _banded_time_weight(wt_half, c, pad):
    """(ks, chh, T) -> (c*chh, c*T) block-banded weight for the (1, ks) conv.

    band[src, dst] = wt_half[src - dst + pad] when that tap exists, else 0,
    so  H2[:, dst*T:(dst+1)*T] = sum_src H[:, src*chh:(src+1)*chh] @ band[src, dst]
    reproduces the zero-padded temporal convolution over the time-step axis.
    """
    ks, chh, T = wt_half.shape
    rows = []
    for src in range(c):
        cols = []
        for dst in range(c):
            k = src - dst + pad
            if 0 <= k < ks:
                cols.append(wt_half[k])
            else:
                cols.append(jnp.zeros((chh, T), wt_half.dtype))
        rows.append(jnp.concatenate(cols, axis=1))
    return jnp.concatenate(rows, axis=0)


def pack_params(params, *, c):
    """Convert natural per-block params into kernel-ready packed weights."""
    packed_blocks = []
    for p in params["blocks"]:
        f = p["w2t"].shape[0]
        ch2 = p["wcp"].shape[1]
        ks, _, T = p["wt"].shape
        pad = (ks - 1) // 2
        wt_p = p["wt"][:, :ch2, :]   # taps acting on the hp half
        wt_n = p["wt"][:, ch2:, :]   # taps acting on the hn half
        packed_blocks.append((
            p["w1"].T,                                   # (1, n)
            p["w2t"],                                    # (f, n)
            _block_diag(p["w3"].T, c),                   # (c*f, c)
            p["be"],                                     # (c, c)
            p["ve"],                                     # (c, c)
            _block_diag(p["wcp"][0 * f:1 * f], c),       # (c*f, c*ch2)
            _block_diag(p["wcp"][1 * f:2 * f], c),
            _block_diag(p["wcp"][2 * f:3 * f], c),
            _block_diag(p["wcn"][0 * f:1 * f], c),
            _block_diag(p["wcn"][1 * f:2 * f], c),
            _block_diag(p["wcn"][2 * f:3 * f], c),
            _banded_time_weight(wt_p, c, pad),           # (c*ch2, c*T)
            _banded_time_weight(wt_n, c, pad),           # (c*ch2, c*T)
            jnp.tile(p["bt"], (1, c)),                   # (1, c*T)
            _block_diag(p["wres"], c),                   # (c*f, c*T)
            jnp.tile(p["bres"], (1, c)),                 # (1, c*T)
            jnp.tile(p["gamma"], (1, c)),                # (1, c*T)
            jnp.tile(p["beta"], (1, c)),                 # (1, c*T)
        ))
    T = params["wf"].shape[1]
    c_out = params["wf"].shape[2]
    # pooling matrix: per-time-step mean over the T lanes of each group
    pool = _block_diag(jnp.full((T, T), 1.0 / T, jnp.float32), c)   # (c*T, c*T)
    wf_flat = params["wf"].reshape(c * T, c_out)                    # (c*T, c_out)
    return dict(blocks=packed_blocks, pool=pool, wf=wf_flat, bf=params["bf"])


# --------------------------------------------------------------------------
# The single fused kernel
# --------------------------------------------------------------------------
_N_BLOCK_ARGS = 18


def _build_fused_kernel(num_block, c, T):
    def kernel(*refs):
        x_ref, adj_ref, adjt_ref = refs[0], refs[1], refs[2]
        w_refs = refs[3:3 + _N_BLOCK_ARGS * num_block]
        base = 3 + _N_BLOCK_ARGS * num_block
        pool_ref, wf_ref, bf_ref = refs[base], refs[base + 1], refs[base + 2]
        out_ref = refs[base + 3]

        adj = adj_ref[...]           # (n, n)
        adjt = adjt_ref[...]         # (n, n)
        pool = pool_ref[...]         # (c*T, c*T)

        # Block input: per-time-step slabs (n, f) and node-major packed (n, c*f)
        xs = [x_ref[0, j] for j in range(c)]
        xp = jnp.concatenate(xs, axis=-1)

        out = None
        for bi in range(num_block):
            (w1r, w2t, w3b, be, ve,
             wcp0, wcp1, wcp2, wcn0, wcn1, wcn2,
             wtp, wtn, bt, wresb, bres, gamma, beta) = [
                r[...] for r in w_refs[bi * _N_BLOCK_ARGS:(bi + 1) * _N_BLOCK_ARGS]]

            # ---- temporal attention: E (c, c) ----
            y2t = jnp.dot(xp, w3b, preferred_element_type=jnp.float32)       # (n, c)
            a_rows = [jnp.dot(w1r, xs[i], preferred_element_type=jnp.float32)
                      for i in range(c)]                                     # c x (1, f)
            y1 = jnp.dot(jnp.concatenate(a_rows, axis=0), w2t,
                         preferred_element_type=jnp.float32)                 # (c, n)
            prod = jnp.dot(y1, y2t, preferred_element_type=jnp.float32)      # (c, c)
            e1 = jnp.dot(ve, jax.nn.sigmoid(prod + be),
                         preferred_element_type=jnp.float32)                 # (c, c)
            e1 = e1 - jnp.max(e1, axis=-1, keepdims=True)
            ex = jnp.exp(e1)
            att = ex / jnp.sum(ex, axis=-1, keepdims=True)                   # (c, c)

            # ---- apply attention: x_tat, node-major packed (n, c*f) ----
            xtat = []
            for i in range(c):
                acc = xs[0] * att[i:i + 1, 0:1]
                for j in range(1, c):
                    acc = acc + xs[j] * att[i:i + 1, j:j + 1]
                xtat.append(acc)
            t0 = jnp.concatenate(xtat, axis=-1)                              # (n, c*f)

            # ---- Chebyshev (K=3) graph conv, batched over all time steps ----
            t1 = jnp.dot(adj, t0, preferred_element_type=jnp.float32)
            t2 = 2.0 * jnp.dot(adj, t1, preferred_element_type=jnp.float32) - t0
            s1 = jnp.dot(adjt, t0, preferred_element_type=jnp.float32)
            s2 = 2.0 * jnp.dot(adjt, s1, preferred_element_type=jnp.float32) - t0
            hp = jnp.maximum(
                jnp.dot(t0, wcp0, preferred_element_type=jnp.float32)
                + jnp.dot(t1, wcp1, preferred_element_type=jnp.float32)
                + jnp.dot(t2, wcp2, preferred_element_type=jnp.float32), 0.0)  # (n, c*ch2)
            hn = jnp.maximum(
                jnp.dot(t0, wcn0, preferred_element_type=jnp.float32)
                + jnp.dot(s1, wcn1, preferred_element_type=jnp.float32)
                + jnp.dot(s2, wcn2, preferred_element_type=jnp.float32), 0.0)  # (n, c*ch2)

            # ---- temporal conv (block-banded) + residual + ReLU + LayerNorm ----
            h2 = (bt
                  + jnp.dot(hp, wtp, preferred_element_type=jnp.float32)
                  + jnp.dot(hn, wtn, preferred_element_type=jnp.float32))      # (n, c*T)
            res = jnp.dot(xp, wresb, preferred_element_type=jnp.float32) + bres
            hh = jnp.maximum(h2 + res, 0.0)                                    # (n, c*T)
            mu = jnp.dot(hh, pool, preferred_element_type=jnp.float32)
            var = jnp.dot((hh - mu) ** 2, pool, preferred_element_type=jnp.float32)
            out = (hh - mu) * jax.lax.rsqrt(var + 1e-5) * gamma + beta         # (n, c*T)

            if bi + 1 < num_block:
                xp = out
                xs = [out[:, i * T:(i + 1) * T] for i in range(c)]

        # ---- final Conv2d(c_in -> c_out, kernel (1, T)) fused in ----
        y = jnp.dot(out, wf_ref[...], preferred_element_type=jnp.float32) + bf_ref[...]
        out_ref[0] = y                                                         # (n, c_out)

    return kernel


def adapgla_forward(x, adj, packed):
    b, c, n, f_in = x.shape
    num_block = len(packed["blocks"])
    T = packed["pool"].shape[0] // c
    c_out = packed["wf"].shape[1]

    flat_w = [w for blk in packed["blocks"] for w in blk]
    inputs = [x, adj, adj.T, *flat_w, packed["pool"], packed["wf"], packed["bf"]]

    def full_spec(a):
        return pl.BlockSpec(a.shape, lambda i: (0,) * a.ndim)

    in_specs = [pl.BlockSpec((1, c, n, f_in), lambda i: (i, 0, 0, 0)),
                full_spec(adj), full_spec(adj)]
    in_specs += [full_spec(w) for w in flat_w]
    in_specs += [full_spec(packed["pool"]), full_spec(packed["wf"]),
                 full_spec(packed["bf"])]

    kernel = _build_fused_kernel(num_block, c, T)
    out = pl.pallas_call(
        kernel,
        out_shape=jax.ShapeDtypeStruct((b, n, c_out), jnp.float32),
        grid=(b,),
        in_specs=in_specs,
        out_specs=pl.BlockSpec((1, n, c_out), lambda i: (i, 0, 0)),
        compiler_params=pltpu.CompilerParams(dimension_semantics=("parallel",)),
    )(*inputs)
    # layout plumbing only: (b, n, c_out) -> (b, c_out, n) to match torch output
    return jnp.transpose(out, (0, 2, 1))


# --------------------------------------------------------------------------
# Deterministic parameter init (natural shapes, following torch __init__)
# --------------------------------------------------------------------------
def init_params(key, *, num_block, c_in, c_out, f_in, num_nodes, ch, T, ks):
    blocks = []
    for i in range(num_block):
        f = f_in if i == 0 else T
        key, sub = jax.random.split(key)
        kk = jax.random.split(sub, 11)
        ch2 = ch // 2
        blocks.append(dict(
            w1=jax.random.uniform(kk[0], (num_nodes, 1), jnp.float32),
            w2t=jax.random.normal(kk[1], (f, num_nodes), jnp.float32) / math.sqrt(f),
            w3=jax.random.uniform(kk[2], (1, f), jnp.float32),
            be=0.5 * jax.random.normal(kk[3], (c_in, c_in), jnp.float32),
            ve=0.5 * jax.random.normal(kk[4], (c_in, c_in), jnp.float32),
            wcp=jax.random.normal(kk[5], (3 * f, ch2), jnp.float32) / math.sqrt(3 * f),
            wcn=jax.random.normal(kk[6], (3 * f, ch2), jnp.float32) / math.sqrt(3 * f),
            wt=jax.random.normal(kk[7], (ks, ch, T), jnp.float32) / math.sqrt(ch * ks),
            bt=0.1 * jax.random.normal(kk[8], (1, T), jnp.float32),
            wres=jax.random.normal(kk[9], (f, T), jnp.float32) / math.sqrt(f),
            bres=0.1 * jax.random.normal(kk[10], (1, T), jnp.float32),
            gamma=jnp.ones((1, T), jnp.float32),
            beta=jnp.zeros((1, T), jnp.float32),
        ))
    key, k1, k2 = jax.random.split(key, 3)
    wf = jax.random.normal(k1, (c_in, T, c_out), jnp.float32) / math.sqrt(c_in * T)
    bf = 0.1 * jax.random.normal(k2, (1, c_out), jnp.float32)
    return dict(blocks=blocks, wf=wf, bf=bf)


# --------------------------------------------------------------------------
# Pure-JAX reference (same math, natural params) for a sanity check.
# --------------------------------------------------------------------------
def _ref_block(x, adj, p):
    b, c, n, f = x.shape
    y1a = jnp.einsum("bcnf,n->bcf", x, p["w1"][:, 0])
    y1 = jnp.einsum("bcf,fm->bcm", y1a, p["w2t"])
    y2 = jnp.einsum("bcnf,f->bcn", x, p["w3"][0])
    prod = jnp.einsum("bin,bdn->bid", y1, y2)
    e = jnp.einsum("ij,bjk->bik", p["ve"], jax.nn.sigmoid(prod + p["be"][None]))
    e = jax.nn.softmax(e, axis=-1)
    x_tat = jnp.einsum("bij,bjnf->binf", e, x)

    def cheb(a, xt):
        t0 = xt
        t1 = jnp.einsum("mn,bcnf->bcmf", a, t0)
        t2 = 2.0 * jnp.einsum("mn,bcnf->bcmf", a, t1) - t0
        return jnp.concatenate([t0, t1, t2], axis=-1)

    hp = jnp.einsum("bcnk,ko->bcno", cheb(adj, x_tat), p["wcp"])
    hn = jnp.einsum("bcnk,ko->bcno", cheb(adj.T, x_tat), p["wcn"])
    h = jax.nn.relu(jnp.concatenate([hp, hn], axis=-1))
    ks, _, T = p["wt"].shape
    pad = (ks - 1) // 2
    hpad = jnp.pad(h, ((0, 0), (pad, pad), (0, 0), (0, 0)))
    h2 = jnp.broadcast_to(p["bt"][None, None], (b, c, n, T)).astype(jnp.float32)
    for k in range(ks):
        h2 = h2 + jnp.einsum("bcnh,ht->bcnt", hpad[:, k:k + c], p["wt"][k])
    res = jnp.einsum("bcnf,ft->bcnt", x, p["wres"]) + p["bres"][None, None]
    hh = jax.nn.relu(h2 + res)
    mu = hh.mean(-1, keepdims=True)
    var = ((hh - mu) ** 2).mean(-1, keepdims=True)
    return (hh - mu) / jnp.sqrt(var + 1e-5) * p["gamma"][None, None] + p["beta"][None, None]


def _ref_forward(x, adj, params):
    h = x
    for p in params["blocks"]:
        h = _ref_block(h, adj, p)
    out = jnp.einsum("bcnt,cto->bon", h, params["wf"])
    return out + params["bf"][0][None, :, None]


if __name__ == "__main__":
    # shapes consistent with AdapGLA defaults:
    # num_nodes=8, input_size=26, num_cheb_filter=64, num_time_filter=2,
    # kernel_size=3, num_block=2, step_num_out=12; step_num_in chosen = 4.
    B, C_IN, C_OUT, N, F_IN = 2, 4, 12, 8, 26
    CH, T, KS, NUM_BLOCK = 64, 2, 3, 2

    key = jax.random.PRNGKey(0)
    kx, ka, kp = jax.random.split(key, 3)
    x = jax.random.normal(kx, (B, C_IN, N, F_IN), jnp.float32)
    adj = jax.nn.softmax(jax.random.normal(ka, (N, N), jnp.float32), axis=-1)
    params = init_params(kp, num_block=NUM_BLOCK, c_in=C_IN, c_out=C_OUT,
                         f_in=F_IN, num_nodes=N, ch=CH, T=T, ks=KS)
    packed = pack_params(params, c=C_IN)

    fwd = jax.jit(adapgla_forward)
    out = jax.block_until_ready(fwd(x, adj, packed))
    assert out.shape == (B, C_OUT, N)

    ref = _ref_forward(x, adj, params)
    err = float(jnp.max(jnp.abs(out - ref)))
    assert err < 5e-2, f"kernel/reference mismatch: max abs err = {err}"

    print("KERNEL_OK")
</pallas_src>

<mosaic_0001>
module attributes {stable_mosaic.version = 11 : i64} {
  func.func @kernel(%arg0: i32, %arg1: memref<1x4x8x26xf32, #tpu.memory_space<vmem>>, %arg2: memref<8x8xf32, #tpu.memory_space<vmem>>, %arg3: memref<8x8xf32, #tpu.memory_space<vmem>>, %arg4: memref<1x8xf32, #tpu.memory_space<vmem>>, %arg5: memref<26x8xf32, #tpu.memory_space<vmem>>, %arg6: memref<104x4xf32, #tpu.memory_space<vmem>>, %arg7: memref<4x4xf32, #tpu.memory_space<vmem>>, %arg8: memref<4x4xf32, #tpu.memory_space<vmem>>, %arg9: memref<104x128xf32, #tpu.memory_space<vmem>>, %arg10: memref<104x128xf32, #tpu.memory_space<vmem>>, %arg11: memref<104x128xf32, #tpu.memory_space<vmem>>, %arg12: memref<104x128xf32, #tpu.memory_space<vmem>>, %arg13: memref<104x128xf32, #tpu.memory_space<vmem>>, %arg14: memref<104x128xf32, #tpu.memory_space<vmem>>, %arg15: memref<128x8xf32, #tpu.memory_space<vmem>>, %arg16: memref<128x8xf32, #tpu.memory_space<vmem>>, %arg17: memref<1x8xf32, #tpu.memory_space<vmem>>, %arg18: memref<104x8xf32, #tpu.memory_space<vmem>>, %arg19: memref<1x8xf32, #tpu.memory_space<vmem>>, %arg20: memref<1x8xf32, #tpu.memory_space<vmem>>, %arg21: memref<1x8xf32, #tpu.memory_space<vmem>>, %arg22: memref<1x8xf32, #tpu.memory_space<vmem>>, %arg23: memref<2x8xf32, #tpu.memory_space<vmem>>, %arg24: memref<8x4xf32, #tpu.memory_space<vmem>>, %arg25: memref<4x4xf32, #tpu.memory_space<vmem>>, %arg26: memref<4x4xf32, #tpu.memory_space<vmem>>, %arg27: memref<8x128xf32, #tpu.memory_space<vmem>>, %arg28: memref<8x128xf32, #tpu.memory_space<vmem>>, %arg29: memref<8x128xf32, #tpu.memory_space<vmem>>, %arg30: memref<8x128xf32, #tpu.memory_space<vmem>>, %arg31: memref<8x128xf32, #tpu.memory_space<vmem>>, %arg32: memref<8x128xf32, #tpu.memory_space<vmem>>, %arg33: memref<128x8xf32, #tpu.memory_space<vmem>>, %arg34: memref<128x8xf32, #tpu.memory_space<vmem>>, %arg35: memref<1x8xf32, #tpu.memory_space<vmem>>, %arg36: memref<8x8xf32, #tpu.memory_space<vmem>>, %arg37: memref<1x8xf32, #tpu.memory_space<vmem>>, %arg38: memref<1x8xf32, #tpu.memory_space<vmem>>, %arg39: memref<1x8xf32, #tpu.memory_space<vmem>>, %arg40: memref<8x8xf32, #tpu.memory_space<vmem>>, %arg41: memref<8x12xf32, #tpu.memory_space<vmem>>, %arg42: memref<1x12xf32, #tpu.memory_space<vmem>>, %arg43: memref<1x8x12xf32, #tpu.memory_space<vmem>>) attributes {dimension_semantics = [#tpu.dimension_semantics<parallel>], iteration_bounds = array<i64: 2>, scalar_prefetch = 0 : i64, scratch_operands = 0 : i64, tpu.core_type = #tpu.core_type<tc>, window_params = [{transform_indices = @transform_0, window_bounds = array<i64: 1, 4, 8, 26>}, {pipeline_mode = #tpu.pipeline_mode<synchronous>, transform_indices = @transform_1, window_bounds = array<i64: 8, 8>}, {pipeline_mode = #tpu.pipeline_mode<synchronous>, transform_indices = @transform_2, window_bounds = array<i64: 8, 8>}, {pipeline_mode = #tpu.pipeline_mode<synchronous>, transform_indices = @transform_3, window_bounds = array<i64: 1, 8>}, {pipeline_mode = #tpu.pipeline_mode<synchronous>, transform_indices = @transform_4, window_bounds = array<i64: 26, 8>}, {pipeline_mode = #tpu.pipeline_mode<synchronous>, transform_indices = @transform_5, window_bounds = array<i64: 104, 4>}, {pipeline_mode = #tpu.pipeline_mode<synchronous>, transform_indices = @transform_6, window_bounds = array<i64: 4, 4>}, {pipeline_mode = #tpu.pipeline_mode<synchronous>, transform_indices = @transform_7, window_bounds = array<i64: 4, 4>}, {pipeline_mode = #tpu.pipeline_mode<synchronous>, transform_indices = @transform_8, window_bounds = array<i64: 104, 128>}, {pipeline_mode = #tpu.pipeline_mode<synchronous>, transform_indices = @transform_9, window_bounds = array<i64: 104, 128>}, {pipeline_mode = #tpu.pipeline_mode<synchronous>, transform_indices = @transform_10, window_bounds = array<i64: 104, 128>}, {pipeline_mode = #tpu.pipeline_mode<synchronous>, transform_indices = @transform_11, window_bounds = array<i64: 104, 128>}, {pipeline_mode = #tpu.pipeline_mode<synchronous>, transform_indices = @transform_12, window_bounds = array<i64: 104, 128>}, {pipeline_mode = #tpu.pipeline_mode<synchronous>, transform_indices = @transform_13, window_bounds = array<i64: 104, 128>}, {pipeline_mode = #tpu.pipeline_mode<synchronous>, transform_indices = @transform_14, window_bounds = array<i64: 128, 8>}, {pipeline_mode = #tpu.pipeline_mode<synchronous>, transform_indices = @transform_15, window_bounds = array<i64: 128, 8>}, {pipeline_mode = #tpu.pipeline_mode<synchronous>, transform_indices = @transform_16, window_bounds = array<i64: 1, 8>}, {pipeline_mode = #tpu.pipeline_mode<synchronous>, transform_indices = @transform_17, window_bounds = array<i64: 104, 8>}, {pipeline_mode = #tpu.pipeline_mode<synchronous>, transform_indices = @transform_18, window_bounds = array<i64: 1, 8>}, {pipeline_mode = #tpu.pipeline_mode<synchronous>, transform_indices = @transform_19, window_bounds = array<i64: 1, 8>}, {pipeline_mode = #tpu.pipeline_mode<synchronous>, transform_indices = @transform_20, window_bounds = array<i64: 1, 8>}, {pipeline_mode = #tpu.pipeline_mode<synchronous>, transform_indices = @transform_21, window_bounds = array<i64: 1, 8>}, {pipeline_mode = #tpu.pipeline_mode<synchronous>, transform_indices = @transform_22, window_bounds = array<i64: 2, 8>}, {pipeline_mode = #tpu.pipeline_mode<synchronous>, transform_indices = @transform_23, window_bounds = array<i64: 8, 4>}, {pipeline_mode = #tpu.pipeline_mode<synchronous>, transform_indices = @transform_24, window_bounds = array<i64: 4, 4>}, {pipeline_mode = #tpu.pipeline_mode<synchronous>, transform_indices = @transform_25, window_bounds = array<i64: 4, 4>}, {pipeline_mode = #tpu.pipeline_mode<synchronous>, transform_indices = @transform_26, window_bounds = array<i64: 8, 128>}, {pipeline_mode = #tpu.pipeline_mode<synchronous>, transform_indices = @transform_27, window_bounds = array<i64: 8, 128>}, {pipeline_mode = #tpu.pipeline_mode<synchronous>, transform_indices = @transform_28, window_bounds = array<i64: 8, 128>}, {pipeline_mode = #tpu.pipeline_mode<synchronous>, transform_indices = @transform_29, window_bounds = array<i64: 8, 128>}, {pipeline_mode = #tpu.pipeline_mode<synchronous>, transform_indices = @transform_30, window_bounds = array<i64: 8, 128>}, {pipeline_mode = #tpu.pipeline_mode<synchronous>, transform_indices = @transform_31, window_bounds = array<i64: 8, 128>}, {pipeline_mode = #tpu.pipeline_mode<synchronous>, transform_indices = @transform_32, window_bounds = array<i64: 128, 8>}, {pipeline_mode = #tpu.pipeline_mode<synchronous>, transform_indices = @transform_33, window_bounds = array<i64: 128, 8>}, {pipeline_mode = #tpu.pipeline_mode<synchronous>, transform_indices = @transform_34, window_bounds = array<i64: 1, 8>}, {pipeline_mode = #tpu.pipeline_mode<synchronous>, transform_indices = @transform_35, window_bounds = array<i64: 8, 8>}, {pipeline_mode = #tpu.pipeline_mode<synchronous>, transform_indices = @transform_36, window_bounds = array<i64: 1, 8>}, {pipeline_mode = #tpu.pipeline_mode<synchronous>, transform_indices = @transform_37, window_bounds = array<i64: 1, 8>}, {pipeline_mode = #tpu.pipeline_mode<synchronous>, transform_indices = @transform_38, window_bounds = array<i64: 1, 8>}, {pipeline_mode = #tpu.pipeline_mode<synchronous>, transform_indices = @transform_39, window_bounds = array<i64: 8, 8>}, {pipeline_mode = #tpu.pipeline_mode<synchronous>, transform_indices = @transform_40, window_bounds = array<i64: 8, 12>}, {pipeline_mode = #tpu.pipeline_mode<synchronous>, transform_indices = @transform_41, window_bounds = array<i64: 1, 12>}, {transform_indices = @transform_42, window_bounds = array<i64: 1, 8, 12>}]} {
    %c0 = arith.constant 0 : index
    %c0_0 = arith.constant 0 : index
    %0 = vector.load %arg2[%c0, %c0_0] : memref<8x8xf32, #tpu.memory_space<vmem>>, vector<8x8xf32>
    %c0_1 = arith.constant 0 : index
    %c0_2 = arith.constant 0 : index
    %1 = vector.load %arg3[%c0_1, %c0_2] : memref<8x8xf32, #tpu.memory_space<vmem>>, vector<8x8xf32>
    %c0_3 = arith.constant 0 : index
    %c0_4 = arith.constant 0 : index
    %2 = vector.load %arg40[%c0_3, %c0_4] : memref<8x8xf32, #tpu.memory_space<vmem>>, vector<8x8xf32>
    %c0_5 = arith.constant 0 : index
    %c0_6 = arith.constant 0 : index
    %c0_7 = arith.constant 0 : index
    %c0_8 = arith.constant 0 : index
    %3 = vector.load %arg1[%c0_5, %c0_6, %c0_7, %c0_8] : memref<1x4x8x26xf32, #tpu.memory_space<vmem>>, vector<1x1x8x26xf32>
    %4 = vector.shape_cast %3 : vector<1x1x8x26xf32> to vector<8x26xf32>
    %c0_9 = arith.constant 0 : index
    %c1 = arith.constant 1 : index
    %c0_10 = arith.constant 0 : index
    %c0_11 = arith.constant 0 : index
    %5 = vector.load %arg1[%c0_9, %c1, %c0_10, %c0_11] : memref<1x4x8x26xf32, #tpu.memory_space<vmem>>, vector<1x1x8x26xf32>
    %6 = vector.shape_cast %5 : vector<1x1x8x26xf32> to vector<8x26xf32>
    %c0_12 = arith.constant 0 : index
    %c2 = arith.constant 2 : index
    %c0_13 = arith.constant 0 : index
    %c0_14 = arith.constant 0 : index
    %7 = vector.load %arg1[%c0_12, %c2, %c0_13, %c0_14] : memref<1x4x8x26xf32, #tpu.memory_space<vmem>>, vector<1x1x8x26xf32>
    %8 = vector.shape_cast %7 : vector<1x1x8x26xf32> to vector<8x26xf32>
    %c0_15 = arith.constant 0 : index
    %c3 = arith.constant 3 : index
    %c0_16 = arith.constant 0 : index
    %c0_17 = arith.constant 0 : index
    %9 = vector.load %arg1[%c0_15, %c3, %c0_16, %c0_17] : memref<1x4x8x26xf32, #tpu.memory_space<vmem>>, vector<1x1x8x26xf32>
    %10 = vector.shape_cast %9 : vector<1x1x8x26xf32> to vector<8x26xf32>
    %11 = tpu.concatenate %4, %6, %8, %10 in 1 : vector<8x26xf32>, vector<8x26xf32>, vector<8x26xf32>, vector<8x26xf32> -> vector<8x104xf32>
    %c0_18 = arith.constant 0 : index
    %c0_19 = arith.constant 0 : index
    %12 = vector.load %arg4[%c0_18, %c0_19] : memref<1x8xf32, #tpu.memory_space<vmem>>, vector<1x8xf32>
    %c0_20 = arith.constant 0 : index
    %c0_21 = arith.constant 0 : index
    %13 = vector.load %arg5[%c0_20, %c0_21] : memref<26x8xf32, #tpu.memory_space<vmem>>, vector<26x8xf32>
    %c0_22 = arith.constant 0 : index
    %c0_23 = arith.constant 0 : index
    %14 = vector.load %arg6[%c0_22, %c0_23] : memref<104x4xf32, #tpu.memory_space<vmem>>, vector<104x4xf32>
    %c0_24 = arith.constant 0 : index
    %c0_25 = arith.constant 0 : index
    %15 = vector.load %arg7[%c0_24, %c0_25] : memref<4x4xf32, #tpu.memory_space<vmem>>, vector<4x4xf32>
    %c0_26 = arith.constant 0 : index
    %c0_27 = arith.constant 0 : index
    %16 = vector.load %arg8[%c0_26, %c0_27] : memref<4x4xf32, #tpu.memory_space<vmem>>, vector<4x4xf32>
    %c0_28 = arith.constant 0 : index
    %c0_29 = arith.constant 0 : index
    %17 = vector.load %arg9[%c0_28, %c0_29] : memref<104x128xf32, #tpu.memory_space<vmem>>, vector<104x128xf32>
    %c0_30 = arith.constant 0 : index
    %c0_31 = arith.constant 0 : index
    %18 = vector.load %arg10[%c0_30, %c0_31] : memref<104x128xf32, #tpu.memory_space<vmem>>, vector<104x128xf32>
    %c0_32 = arith.constant 0 : index
    %c0_33 = arith.constant 0 : index
    %19 = vector.load %arg11[%c0_32, %c0_33] : memref<104x128xf32, #tpu.memory_space<vmem>>, vector<104x128xf32>
    %c0_34 = arith.constant 0 : index
    %c0_35 = arith.constant 0 : index
    %20 = vector.load %arg12[%c0_34, %c0_35] : memref<104x128xf32, #tpu.memory_space<vmem>>, vector<104x128xf32>
    %c0_36 = arith.constant 0 : index
    %c0_37 = arith.constant 0 : index
    %21 = vector.load %arg13[%c0_36, %c0_37] : memref<104x128xf32, #tpu.memory_space<vmem>>, vector<104x128xf32>
    %c0_38 = arith.constant 0 : index
    %c0_39 = arith.constant 0 : index
    %22 = vector.load %arg14[%c0_38, %c0_39] : memref<104x128xf32, #tpu.memory_space<vmem>>, vector<104x128xf32>
    %c0_40 = arith.constant 0 : index
    %c0_41 = arith.constant 0 : index
    %23 = vector.load %arg15[%c0_40, %c0_41] : memref<128x8xf32, #tpu.memory_space<vmem>>, vector<128x8xf32>
    %c0_42 = arith.constant 0 : index
    %c0_43 = arith.constant 0 : index
    %24 = vector.load %arg16[%c0_42, %c0_43] : memref<128x8xf32, #tpu.memory_space<vmem>>, vector<128x8xf32>
    %c0_44 = arith.constant 0 : index
    %c0_45 = arith.constant 0 : index
    %25 = vector.load %arg17[%c0_44, %c0_45] : memref<1x8xf32, #tpu.memory_space<vmem>>, vector<1x8xf32>
    %c0_46 = arith.constant 0 : index
    %c0_47 = arith.constant 0 : index
    %26 = vector.load %arg18[%c0_46, %c0_47] : memref<104x8xf32, #tpu.memory_space<vmem>>, vector<104x8xf32>
    %c0_48 = arith.constant 0 : index
    %c0_49 = arith.constant 0 : index
    %27 = vector.load %arg19[%c0_48, %c0_49] : memref<1x8xf32, #tpu.memory_space<vmem>>, vector<1x8xf32>
    %c0_50 = arith.constant 0 : index
    %c0_51 = arith.constant 0 : index
    %28 = vector.load %arg20[%c0_50, %c0_51] : memref<1x8xf32, #tpu.memory_space<vmem>>, vector<1x8xf32>
    %c0_52 = arith.constant 0 : index
    %c0_53 = arith.constant 0 : index
    %29 = vector.load %arg21[%c0_52, %c0_53] : memref<1x8xf32, #tpu.memory_space<vmem>>, vector<1x8xf32>
    %cst = arith.constant dense<0.000000e+00> : vector<8x4xf32>
    %30 = tpu.matmul %11, %14, %cst {dimension_numbers = #tpu.dot_dimension_numbers<[1], [0], [0], [1], [0, 0, 1, 1], [], []>} : vector<8x104xf32>, vector<104x4xf32>, vector<8x4xf32> -> vector<8x4xf32>
    %cst_54 = arith.constant dense<0.000000e+00> : vector<1x26xf32>
    %31 = tpu.matmul %12, %4, %cst_54 {dimension_numbers = #tpu.dot_dimension_numbers<[1], [0], [0], [1], [0, 0, 1, 1], [], []>} : vector<1x8xf32>, vector<8x26xf32>, vector<1x26xf32> -> vector<1x26xf32>
    %cst_55 = arith.constant dense<0.000000e+00> : vector<1x26xf32>
    %32 = tpu.matmul %12, %6, %cst_55 {dimension_numbers = #tpu.dot_dimension_numbers<[1], [0], [0], [1], [0, 0, 1, 1], [], []>} : vector<1x8xf32>, vector<8x26xf32>, vector<1x26xf32> -> vector<1x26xf32>
    %cst_56 = arith.constant dense<0.000000e+00> : vector<1x26xf32>
    %33 = tpu.matmul %12, %8, %cst_56 {dimension_numbers = #tpu.dot_dimension_numbers<[1], [0], [0], [1], [0, 0, 1, 1], [], []>} : vector<1x8xf32>, vector<8x26xf32>, vector<1x26xf32> -> vector<1x26xf32>
    %cst_57 = arith.constant dense<0.000000e+00> : vector<1x26xf32>
    %34 = tpu.matmul %12, %10, %cst_57 {dimension_numbers = #tpu.dot_dimension_numbers<[1], [0], [0], [1], [0, 0, 1, 1], [], []>} : vector<1x8xf32>, vector<8x26xf32>, vector<1x26xf32> -> vector<1x26xf32>
    %35 = tpu.concatenate %31, %32, %33, %34 in 0 : vector<1x26xf32>, vector<1x26xf32>, vector<1x26xf32>, vector<1x26xf32> -> vector<4x26xf32>
    %cst_58 = arith.constant dense<0.000000e+00> : vector<4x8xf32>
    %36 = tpu.matmul %35, %13, %cst_58 {dimension_numbers = #tpu.dot_dimension_numbers<[1], [0], [0], [1], [0, 0, 1, 1], [], []>} : vector<4x26xf32>, vector<26x8xf32>, vector<4x8xf32> -> vector<4x8xf32>
    %cst_59 = arith.constant dense<0.000000e+00> : vector<4x4xf32>
    %37 = tpu.matmul %36, %30, %cst_59 {dimension_numbers = #tpu.dot_dimension_numbers<[1], [0], [0], [1], [0, 0, 1, 1], [], []>} : vector<4x8xf32>, vector<8x4xf32>, vector<4x4xf32> -> vector<4x4xf32>
    %38 = arith.addf %37, %15 : vector<4x4xf32>
    %39 = arith.negf %38 : vector<4x4xf32>
    %40 = math.exp %39 : vector<4x4xf32>
    %cst_60 = arith.constant 1.000000e+00 : f32
    %41 = vector.broadcast %cst_60 : f32 to vector<4x4xf32>
    %42 = arith.addf %41, %40 : vector<4x4xf32>
    %43 = arith.divf %41, %42 : vector<4x4xf32>
    %cst_61 = arith.constant dense<0.000000e+00> : vector<4x4xf32>
    %44 = tpu.matmul %16, %43, %cst_61 {dimension_numbers = #tpu.dot_dimension_numbers<[1], [0], [0], [1], [0, 0, 1, 1], [], []>} : vector<4x4xf32>, vector<4x4xf32>, vector<4x4xf32> -> vector<4x4xf32>
    %cst_62 = arith.constant dense<0xFF800000> : vector<4xf32>
    %45 = vector.multi_reduction <maximumf>, %44, %cst_62 [1] : vector<4x4xf32> to vector<4xf32>
    %46 = vector.shape_cast %45 : vector<4xf32> to vector<4x1xf32>
    %47 = vector.broadcast %46 : vector<4x1xf32> to vector<4x4xf32>
    %48 = arith.subf %44, %47 : vector<4x4xf32>
    %49 = math.exp %48 : vector<4x4xf32>
    %cst_63 = arith.constant dense<0.000000e+00> : vector<4xf32>
    %50 = vector.multi_reduction <add>, %49, %cst_63 [1] : vector<4x4xf32> to vector<4xf32>
    %51 = vector.shape_cast %50 : vector<4xf32> to vector<4x1xf32>
    %52 = vector.broadcast %51 : vector<4x1xf32> to vector<4x4xf32>
    %53 = arith.divf %49, %52 : vector<4x4xf32>
    %54 = vector.extract_strided_slice %53 {offsets = [0, 0], sizes = [1, 1], strides = [1, 1]} : vector<4x4xf32> to vector<1x1xf32>
    %55 = vector.broadcast %54 : vector<1x1xf32> to vector<8x26xf32>
    %56 = arith.mulf %4, %55 : vector<8x26xf32>
    %57 = vector.extract_strided_slice %53 {offsets = [0, 1], sizes = [1, 1], strides = [1, 1]} : vector<4x4xf32> to vector<1x1xf32>
    %58 = vector.broadcast %57 : vector<1x1xf32> to vector<8x26xf32>
    %59 = arith.mulf %6, %58 : vector<8x26xf32>
    %60 = arith.addf %56, %59 : vector<8x26xf32>
    %61 = vector.extract_strided_slice %53 {offsets = [0, 2], sizes = [1, 1], strides = [1, 1]} : vector<4x4xf32> to vector<1x1xf32>
    %62 = vector.broadcast %61 : vector<1x1xf32> to vector<8x26xf32>
    %63 = arith.mulf %8, %62 : vector<8x26xf32>
    %64 = arith.addf %60, %63 : vector<8x26xf32>
    %65 = vector.extract_strided_slice %53 {offsets = [0, 3], sizes = [1, 1], strides = [1, 1]} : vector<4x4xf32> to vector<1x1xf32>
    %66 = vector.broadcast %65 : vector<1x1xf32> to vector<8x26xf32>
    %67 = arith.mulf %10, %66 : vector<8x26xf32>
    %68 = arith.addf %64, %67 : vector<8x26xf32>
    %69 = vector.extract_strided_slice %53 {offsets = [1, 0], sizes = [1, 1], strides = [1, 1]} : vector<4x4xf32> to vector<1x1xf32>
    %70 = vector.broadcast %69 : vector<1x1xf32> to vector<8x26xf32>
    %71 = arith.mulf %4, %70 : vector<8x26xf32>
    %72 = vector.extract_strided_slice %53 {offsets = [1, 1], sizes = [1, 1], strides = [1, 1]} : vector<4x4xf32> to vector<1x1xf32>
    %73 = vector.broadcast %72 : vector<1x1xf32> to vector<8x26xf32>
    %74 = arith.mulf %6, %73 : vector<8x26xf32>
    %75 = arith.addf %71, %74 : vector<8x26xf32>
    %76 = vector.extract_strided_slice %53 {offsets = [1, 2], sizes = [1, 1], strides = [1, 1]} : vector<4x4xf32> to vector<1x1xf32>
    %77 = vector.broadcast %76 : vector<1x1xf32> to vector<8x26xf32>
    %78 = arith.mulf %8, %77 : vector<8x26xf32>
    %79 = arith.addf %75, %78 : vector<8x26xf32>
    %80 = vector.extract_strided_slice %53 {offsets = [1, 3], sizes = [1, 1], strides = [1, 1]} : vector<4x4xf32> to vector<1x1xf32>
    %81 = vector.broadcast %80 : vector<1x1xf32> to vector<8x26xf32>
    %82 = arith.mulf %10, %81 : vector<8x26xf32>
    %83 = arith.addf %79, %82 : vector<8x26xf32>
    %84 = vector.extract_strided_slice %53 {offsets = [2, 0], sizes = [1, 1], strides = [1, 1]} : vector<4x4xf32> to vector<1x1xf32>
    %85 = vector.broadcast %84 : vector<1x1xf32> to vector<8x26xf32>
    %86 = arith.mulf %4, %85 : vector<8x26xf32>
    %87 = vector.extract_strided_slice %53 {offsets = [2, 1], sizes = [1, 1], strides = [1, 1]} : vector<4x4xf32> to vector<1x1xf32>
    %88 = vector.broadcast %87 : vector<1x1xf32> to vector<8x26xf32>
    %89 = arith.mulf %6, %88 : vector<8x26xf32>
    %90 = arith.addf %86, %89 : vector<8x26xf32>
    %91 = vector.extract_strided_slice %53 {offsets = [2, 2], sizes = [1, 1], strides = [1, 1]} : vector<4x4xf32> to vector<1x1xf32>
    %92 = vector.broadcast %91 : vector<1x1xf32> to vector<8x26xf32>
    %93 = arith.mulf %8, %92 : vector<8x26xf32>
    %94 = arith.addf %90, %93 : vector<8x26xf32>
    %95 = vector.extract_strided_slice %53 {offsets = [2, 3], sizes = [1, 1], strides = [1, 1]} : vector<4x4xf32> to vector<1x1xf32>
    %96 = vector.broadcast %95 : vector<1x1xf32> to vector<8x26xf32>
    %97 = arith.mulf %10, %96 : vector<8x26xf32>
    %98 = arith.addf %94, %97 : vector<8x26xf32>
    %99 = vector.extract_strided_slice %53 {offsets = [3, 0], sizes = [1, 1], strides = [1, 1]} : vector<4x4xf32> to vector<1x1xf32>
    %100 = vector.broadcast %99 : vector<1x1xf32> to vector<8x26xf32>
    %101 = arith.mulf %4, %100 : vector<8x26xf32>
    %102 = vector.extract_strided_slice %53 {offsets = [3, 1], sizes = [1, 1], strides = [1, 1]} : vector<4x4xf32> to vector<1x1xf32>
    %103 = vector.broadcast %102 : vector<1x1xf32> to vector<8x26xf32>
    %104 = arith.mulf %6, %103 : vector<8x26xf32>
    %105 = arith.addf %101, %104 : vector<8x26xf32>
    %106 = vector.extract_strided_slice %53 {offsets = [3, 2], sizes = [1, 1], strides = [1, 1]} : vector<4x4xf32> to vector<1x1xf32>
    %107 = vector.broadcast %106 : vector<1x1xf32> to vector<8x26xf32>
    %108 = arith.mulf %8, %107 : vector<8x26xf32>
    %109 = arith.addf %105, %108 : vector<8x26xf32>
    %110 = vector.extract_strided_slice %53 {offsets = [3, 3], sizes = [1, 1], strides = [1, 1]} : vector<4x4xf32> to vector<1x1xf32>
    %111 = vector.broadcast %110 : vector<1x1xf32> to vector<8x26xf32>
    %112 = arith.mulf %10, %111 : vector<8x26xf32>
    %113 = arith.addf %109, %112 : vector<8x26xf32>
    %114 = tpu.concatenate %68, %83, %98, %113 in 1 : vector<8x26xf32>, vector<8x26xf32>, vector<8x26xf32>, vector<8x26xf32> -> vector<8x104xf32>
    %cst_64 = arith.constant dense<0.000000e+00> : vector<8x104xf32>
    %115 = tpu.matmul %0, %114, %cst_64 {dimension_numbers = #tpu.dot_dimension_numbers<[1], [0], [0], [1], [0, 0, 1, 1], [], []>} : vector<8x8xf32>, vector<8x104xf32>, vector<8x104xf32> -> vector<8x104xf32>
    %cst_65 = arith.constant dense<0.000000e+00> : vector<8x104xf32>
    %116 = tpu.matmul %0, %115, %cst_65 {dimension_numbers = #tpu.dot_dimension_numbers<[1], [0], [0], [1], [0, 0, 1, 1], [], []>} : vector<8x8xf32>, vector<8x104xf32>, vector<8x104xf32> -> vector<8x104xf32>
    %cst_66 = arith.constant 2.000000e+00 : f32
    %117 = vector.broadcast %cst_66 : f32 to vector<8x104xf32>
    %118 = arith.mulf %117, %116 : vector<8x104xf32>
    %119 = arith.subf %118, %114 : vector<8x104xf32>
    %cst_67 = arith.constant dense<0.000000e+00> : vector<8x104xf32>
    %120 = tpu.matmul %1, %114, %cst_67 {dimension_numbers = #tpu.dot_dimension_numbers<[1], [0], [0], [1], [0, 0, 1, 1], [], []>} : vector<8x8xf32>, vector<8x104xf32>, vector<8x104xf32> -> vector<8x104xf32>
    %cst_68 = arith.constant dense<0.000000e+00> : vector<8x104xf32>
    %121 = tpu.matmul %1, %120, %cst_68 {dimension_numbers = #tpu.dot_dimension_numbers<[1], [0], [0], [1], [0, 0, 1, 1], [], []>} : vector<8x8xf32>, vector<8x104xf32>, vector<8x104xf32> -> vector<8x104xf32>
    %cst_69 = arith.constant 2.000000e+00 : f32
    %122 = vector.broadcast %cst_69 : f32 to vector<8x104xf32>
    %123 = arith.mulf %122, %121 : vector<8x104xf32>
    %124 = arith.subf %123, %114 : vector<8x104xf32>
    %cst_70 = arith.constant dense<0.000000e+00> : vector<8x128xf32>
    %125 = tpu.matmul %114, %17, %cst_70 {dimension_numbers = #tpu.dot_dimension_numbers<[1], [0], [0], [1], [0, 0, 1, 1], [], []>} : vector<8x104xf32>, vector<104x128xf32>, vector<8x128xf32> -> vector<8x128xf32>
    %cst_71 = arith.constant dense<0.000000e+00> : vector<8x128xf32>
    %126 = tpu.matmul %115, %18, %cst_71 {dimension_numbers = #tpu.dot_dimension_numbers<[1], [0], [0], [1], [0, 0, 1, 1], [], []>} : vector<8x104xf32>, vector<104x128xf32>, vector<8x128xf32> -> vector<8x128xf32>
    %127 = arith.addf %125, %126 : vector<8x128xf32>
    %cst_72 = arith.constant dense<0.000000e+00> : vector<8x128xf32>
    %128 = tpu.matmul %119, %19, %cst_72 {dimension_numbers = #tpu.dot_dimension_numbers<[1], [0], [0], [1], [0, 0, 1, 1], [], []>} : vector<8x104xf32>, vector<104x128xf32>, vector<8x128xf32> -> vector<8x128xf32>
    %129 = arith.addf %127, %128 : vector<8x128xf32>
    %cst_73 = arith.constant 0.000000e+00 : f32
    %130 = vector.broadcast %cst_73 : f32 to vector<8x128xf32>
    %131 = arith.maximumf %129, %130 : vector<8x128xf32>
    %cst_74 = arith.constant dense<0.000000e+00> : vector<8x128xf32>
    %132 = tpu.matmul %114, %20, %cst_74 {dimension_numbers = #tpu.dot_dimension_numbers<[1], [0], [0], [1], [0, 0, 1, 1], [], []>} : vector<8x104xf32>, vector<104x128xf32>, vector<8x128xf32> -> vector<8x128xf32>
    %cst_75 = arith.constant dense<0.000000e+00> : vector<8x128xf32>
    %133 = tpu.matmul %120, %21, %cst_75 {dimension_numbers = #tpu.dot_dimension_numbers<[1], [0], [0], [1], [0, 0, 1, 1], [], []>} : vector<8x104xf32>, vector<104x128xf32>, vector<8x128xf32> -> vector<8x128xf32>
    %134 = arith.addf %132, %133 : vector<8x128xf32>
    %cst_76 = arith.constant dense<0.000000e+00> : vector<8x128xf32>
    %135 = tpu.matmul %124, %22, %cst_76 {dimension_numbers = #tpu.dot_dimension_numbers<[1], [0], [0], [1], [0, 0, 1, 1], [], []>} : vector<8x104xf32>, vector<104x128xf32>, vector<8x128xf32> -> vector<8x128xf32>
    %136 = arith.addf %134, %135 : vector<8x128xf32>
    %cst_77 = arith.constant 0.000000e+00 : f32
    %137 = vector.broadcast %cst_77 : f32 to vector<8x128xf32>
    %138 = arith.maximumf %136, %137 : vector<8x128xf32>
    %cst_78 = arith.constant dense<0.000000e+00> : vector<8x8xf32>
    %139 = tpu.matmul %131, %23, %cst_78 {dimension_numbers = #tpu.dot_dimension_numbers<[1], [0], [0], [1], [0, 0, 1, 1], [], []>} : vector<8x128xf32>, vector<128x8xf32>, vector<8x8xf32> -> vector<8x8xf32>
    %140 = vector.broadcast %25 : vector<1x8xf32> to vector<8x8xf32>
    %141 = arith.addf %140, %139 : vector<8x8xf32>
    %cst_79 = arith.constant dense<0.000000e+00> : vector<8x8xf32>
    %142 = tpu.matmul %138, %24, %cst_79 {dimension_numbers = #tpu.dot_dimension_numbers<[1], [0], [0], [1], [0, 0, 1, 1], [], []>} : vector<8x128xf32>, vector<128x8xf32>, vector<8x8xf32> -> vector<8x8xf32>
    %143 = arith.addf %141, %142 : vector<8x8xf32>
    %cst_80 = arith.constant dense<0.000000e+00> : vector<8x8xf32>
    %144 = tpu.matmul %11, %26, %cst_80 {dimension_numbers = #tpu.dot_dimension_numbers<[1], [0], [0], [1], [0, 0, 1, 1], [], []>} : vector<8x104xf32>, vector<104x8xf32>, vector<8x8xf32> -> vector<8x8xf32>
    %145 = vector.broadcast %27 : vector<1x8xf32> to vector<8x8xf32>
    %146 = arith.addf %144, %145 : vector<8x8xf32>
    %147 = arith.addf %143, %146 : vector<8x8xf32>
    %cst_81 = arith.constant 0.000000e+00 : f32
    %148 = vector.broadcast %cst_81 : f32 to vector<8x8xf32>
    %149 = arith.maximumf %147, %148 : vector<8x8xf32>
    %cst_82 = arith.constant dense<0.000000e+00> : vector<8x8xf32>
    %150 = tpu.matmul %149, %2, %cst_82 {dimension_numbers = #tpu.dot_dimension_numbers<[1], [0], [0], [1], [0, 0, 1, 1], [], []>} : vector<8x8xf32>, vector<8x8xf32>, vector<8x8xf32> -> vector<8x8xf32>
    %151 = arith.subf %149, %150 : vector<8x8xf32>
    %152 = arith.mulf %151, %151 : vector<8x8xf32>
    %cst_83 = arith.constant dense<0.000000e+00> : vector<8x8xf32>
    %153 = tpu.matmul %152, %2, %cst_83 {dimension_numbers = #tpu.dot_dimension_numbers<[1], [0], [0], [1], [0, 0, 1, 1], [], []>} : vector<8x8xf32>, vector<8x8xf32>, vector<8x8xf32> -> vector<8x8xf32>
    %154 = arith.subf %149, %150 : vector<8x8xf32>
    %cst_84 = arith.constant 9.99999974E-6 : f32
    %155 = vector.broadcast %cst_84 : f32 to vector<8x8xf32>
    %156 = arith.addf %153, %155 : vector<8x8xf32>
    %157 = math.rsqrt %156 : vector<8x8xf32>
    %158 = arith.mulf %154, %157 : vector<8x8xf32>
    %159 = vector.broadcast %28 : vector<1x8xf32> to vector<8x8xf32>
    %160 = arith.mulf %158, %159 : vector<8x8xf32>
    %161 = vector.broadcast %29 : vector<1x8xf32> to vector<8x8xf32>
    %162 = arith.addf %160, %161 : vector<8x8xf32>
    %163 = vector.extract_strided_slice %162 {offsets = [0, 0], sizes = [8, 2], strides = [1, 1]} : vector<8x8xf32> to vector<8x2xf32>
    %164 = vector.extract_strided_slice %162 {offsets = [0, 2], sizes = [8, 2], strides = [1, 1]} : vector<8x8xf32> to vector<8x2xf32>
    %165 = vector.extract_strided_slice %162 {offsets = [0, 4], sizes = [8, 2], strides = [1, 1]} : vector<8x8xf32> to vector<8x2xf32>
    %166 = vector.extract_strided_slice %162 {offsets = [0, 6], sizes = [8, 2], strides = [1, 1]} : vector<8x8xf32> to vector<8x2xf32>
    %c0_85 = arith.constant 0 : index
    %c0_86 = arith.constant 0 : index
    %167 = vector.load %arg22[%c0_85, %c0_86] : memref<1x8xf32, #tpu.memory_space<vmem>>, vector<1x8xf32>
    %c0_87 = arith.constant 0 : index
    %c0_88 = arith.constant 0 : index
    %168 = vector.load %arg23[%c0_87, %c0_88] : memref<2x8xf32, #tpu.memory_space<vmem>>, vector<2x8xf32>
    %c0_89 = arith.constant 0 : index
    %c0_90 = arith.constant 0 : index
    %169 = vector.load %arg24[%c0_89, %c0_90] : memref<8x4xf32, #tpu.memory_space<vmem>>, vector<8x4xf32>
    %c0_91 = arith.constant 0 : index
    %c0_92 = arith.constant 0 : index
    %170 = vector.load %arg25[%c0_91, %c0_92] : memref<4x4xf32, #tpu.memory_space<vmem>>, vector<4x4xf32>
    %c0_93 = arith.constant 0 : index
    %c0_94 = arith.constant 0 : index
    %171 = vector.load %arg26[%c0_93, %c0_94] : memref<4x4xf32, #tpu.memory_space<vmem>>, vector<4x4xf32>
    %c0_95 = arith.constant 0 : index
    %c0_96 = arith.constant 0 : index
    %172 = vector.load %arg27[%c0_95, %c0_96] : memref<8x128xf32, #tpu.memory_space<vmem>>, vector<8x128xf32>
    %c0_97 = arith.constant 0 : index
    %c0_98 = arith.constant 0 : index
    %173 = vector.load %arg28[%c0_97, %c0_98] : memref<8x128xf32, #tpu.memory_space<vmem>>, vector<8x128xf32>
    %c0_99 = arith.constant 0 : index
    %c0_100 = arith.constant 0 : index
    %174 = vector.load %arg29[%c0_99, %c0_100] : memref<8x128xf32, #tpu.memory_space<vmem>>, vector<8x128xf32>
    %c0_101 = arith.constant 0 : index
    %c0_102 = arith.constant 0 : index
    %175 = vector.load %arg30[%c0_101, %c0_102] : memref<8x128xf32, #tpu.memory_space<vmem>>, vector<8x128xf32>
    %c0_103 = arith.constant 0 : index
    %c0_104 = arith.constant 0 : index
    %176 = vector.load %arg31[%c0_103, %c0_104] : memref<8x128xf32, #tpu.memory_space<vmem>>, vector<8x128xf32>
    %c0_105 = arith.constant 0 : index
    %c0_106 = arith.constant 0 : index
    %177 = vector.load %arg32[%c0_105, %c0_106] : memref<8x128xf32, #tpu.memory_space<vmem>>, vector<8x128xf32>
    %c0_107 = arith.constant 0 : index
    %c0_108 = arith.constant 0 : index
    %178 = vector.load %arg33[%c0_107, %c0_108] : memref<128x8xf32, #tpu.memory_space<vmem>>, vector<128x8xf32>
    %c0_109 = arith.constant 0 : index
    %c0_110 = arith.constant 0 : index
    %179 = vector.load %arg34[%c0_109, %c0_110] : memref<128x8xf32, #tpu.memory_space<vmem>>, vector<128x8xf32>
    %c0_111 = arith.constant 0 : index
    %c0_112 = arith.constant 0 : index
    %180 = vector.load %arg35[%c0_111, %c0_112] : memref<1x8xf32, #tpu.memory_space<vmem>>, vector<1x8xf32>
    %c0_113 = arith.constant 0 : index
    %c0_114 = arith.constant 0 : index
    %181 = vector.load %arg36[%c0_113, %c0_114] : memref<8x8xf32, #tpu.memory_space<vmem>>, vector<8x8xf32>
    %c0_115 = arith.constant 0 : index
    %c0_116 = arith.constant 0 : index
    %182 = vector.load %arg37[%c0_115, %c0_116] : memref<1x8xf32, #tpu.memory_space<vmem>>, vector<1x8xf32>
    %c0_117 = arith.constant 0 : index
    %c0_118 = arith.constant 0 : index
    %183 = vector.load %arg38[%c0_117, %c0_118] : memref<1x8xf32, #tpu.memory_space<vmem>>, vector<1x8xf32>
    %c0_119 = arith.constant 0 : index
    %c0_120 = arith.constant 0 : index
    %184 = vector.load %arg39[%c0_119, %c0_120] : memref<1x8xf32, #tpu.memory_space<vmem>>, vector<1x8xf32>
    %cst_121 = arith.constant dense<0.000000e+00> : vector<8x4xf32>
    %185 = tpu.matmul %162, %169, %cst_121 {dimension_numbers = #tpu.dot_dimension_numbers<[1], [0], [0], [1], [0, 0, 1, 1], [], []>} : vector<8x8xf32>, vector<8x4xf32>, vector<8x4xf32> -> vector<8x4xf32>
    %cst_122 = arith.constant dense<0.000000e+00> : vector<1x2xf32>
    %186 = tpu.matmul %167, %163, %cst_122 {dimension_numbers = #tpu.dot_dimension_numbers<[1], [0], [0], [1], [0, 0, 1, 1], [], []>} : vector<1x8xf32>, vector<8x2xf32>, vector<1x2xf32> -> vector<1x2xf32>
    %cst_123 = arith.constant dense<0.000000e+00> : vector<1x2xf32>
    %187 = tpu.matmul %167, %164, %cst_123 {dimension_numbers = #tpu.dot_dimension_numbers<[1], [0], [0], [1], [0, 0, 1, 1], [], []>} : vector<1x8xf32>, vector<8x2xf32>, vector<1x2xf32> -> vector<1x2xf32>
    %cst_124 = arith.constant dense<0.000000e+00> : vector<1x2xf32>
    %188 = tpu.matmul %167, %165, %cst_124 {dimension_numbers = #tpu.dot_dimension_numbers<[1], [0], [0], [1], [0, 0, 1, 1], [], []>} : vector<1x8xf32>, vector<8x2xf32>, vector<1x2xf32> -> vector<1x2xf32>
    %cst_125 = arith.constant dense<0.000000e+00> : vector<1x2xf32>
    %189 = tpu.matmul %167, %166, %cst_125 {dimension_numbers = #tpu.dot_dimension_numbers<[1], [0], [0], [1], [0, 0, 1, 1], [], []>} : vector<1x8xf32>, vector<8x2xf32>, vector<1x2xf32> -> vector<1x2xf32>
    %190 = tpu.concatenate %186, %187, %188, %189 in 0 : vector<1x2xf32>, vector<1x2xf32>, vector<1x2xf32>, vector<1x2xf32> -> vector<4x2xf32>
    %cst_126 = arith.constant dense<0.000000e+00> : vector<4x8xf32>
    %191 = tpu.matmul %190, %168, %cst_126 {dimension_numbers = #tpu.dot_dimension_numbers<[1], [0], [0], [1], [0, 0, 1, 1], [], []>} : vector<4x2xf32>, vector<2x8xf32>, vector<4x8xf32> -> vector<4x8xf32>
    %cst_127 = arith.constant dense<0.000000e+00> : vector<4x4xf32>
    %192 = tpu.matmul %191, %185, %cst_127 {dimension_numbers = #tpu.dot_dimension_numbers<[1], [0], [0], [1], [0, 0, 1, 1], [], []>} : vector<4x8xf32>, vector<8x4xf32>, vector<4x4xf32> -> vector<4x4xf32>
    %193 = arith.addf %192, %170 : vector<4x4xf32>
    %194 = arith.negf %193 : vector<4x4xf32>
    %195 = math.exp %194 : vector<4x4xf32>
    %cst_128 = arith.constant 1.000000e+00 : f32
    %196 = vector.broadcast %cst_128 : f32 to vector<4x4xf32>
    %197 = arith.addf %196, %195 : vector<4x4xf32>
    %198 = arith.divf %196, %197 : vector<4x4xf32>
    %cst_129 = arith.constant dense<0.000000e+00> : vector<4x4xf32>
    %199 = tpu.matmul %171, %198, %cst_129 {dimension_numbers = #tpu.dot_dimension_numbers<[1], [0], [0], [1], [0, 0, 1, 1], [], []>} : vector<4x4xf32>, vector<4x4xf32>, vector<4x4xf32> -> vector<4x4xf32>
    %cst_130 = arith.constant dense<0xFF800000> : vector<4xf32>
    %200 = vector.multi_reduction <maximumf>, %199, %cst_130 [1] : vector<4x4xf32> to vector<4xf32>
    %201 = vector.shape_cast %200 : vector<4xf32> to vector<4x1xf32>
    %202 = vector.broadcast %201 : vector<4x1xf32> to vector<4x4xf32>
    %203 = arith.subf %199, %202 : vector<4x4xf32>
    %204 = math.exp %203 : vector<4x4xf32>
    %cst_131 = arith.constant dense<0.000000e+00> : vector<4xf32>
    %205 = vector.multi_reduction <add>, %204, %cst_131 [1] : vector<4x4xf32> to vector<4xf32>
    %206 = vector.shape_cast %205 : vector<4xf32> to vector<4x1xf32>
    %207 = vector.broadcast %206 : vector<4x1xf32> to vector<4x4xf32>
    %208 = arith.divf %204, %207 : vector<4x4xf32>
    %209 = vector.extract_strided_slice %208 {offsets = [0, 0], sizes = [1, 1], strides = [1, 1]} : vector<4x4xf32> to vector<1x1xf32>
    %210 = vector.broadcast %209 : vector<1x1xf32> to vector<8x2xf32>
    %211 = arith.mulf %163, %210 : vector<8x2xf32>
    %212 = vector.extract_strided_slice %208 {offsets = [0, 1], sizes = [1, 1], strides = [1, 1]} : vector<4x4xf32> to vector<1x1xf32>
    %213 = vector.broadcast %212 : vector<1x1xf32> to vector<8x2xf32>
    %214 = arith.mulf %164, %213 : vector<8x2xf32>
    %215 = arith.addf %211, %214 : vector<8x2xf32>
    %216 = vector.extract_strided_slice %208 {offsets = [0, 2], sizes = [1, 1], strides = [1, 1]} : vector<4x4xf32> to vector<1x1xf32>
    %217 = vector.broadcast %216 : vector<1x1xf32> to vector<8x2xf32>
    %218 = arith.mulf %165, %217 : vector<8x2xf32>
    %219 = arith.addf %215, %218 : vector<8x2xf32>
    %220 = vector.extract_strided_slice %208 {offsets = [0, 3], sizes = [1, 1], strides = [1, 1]} : vector<4x4xf32> to vector<1x1xf32>
    %221 = vector.broadcast %220 : vector<1x1xf32> to vector<8x2xf32>
    %222 = arith.mulf %166, %221 : vector<8x2xf32>
    %223 = arith.addf %219, %222 : vector<8x2xf32>
    %224 = vector.extract_strided_slice %208 {offsets = [1, 0], sizes = [1, 1], strides = [1, 1]} : vector<4x4xf32> to vector<1x1xf32>
    %225 = vector.broadcast %224 : vector<1x1xf32> to vector<8x2xf32>
    %226 = arith.mulf %163, %225 : vector<8x2xf32>
    %227 = vector.extract_strided_slice %208 {offsets = [1, 1], sizes = [1, 1], strides = [1, 1]} : vector<4x4xf32> to vector<1x1xf32>
    %228 = vector.broadcast %227 : vector<1x1xf32> to vector<8x2xf32>
    %229 = arith.mulf %164, %228 : vector<8x2xf32>
    %230 = arith.addf %226, %229 : vector<8x2xf32>
    %231 = vector.extract_strided_slice %208 {offsets = [1, 2], sizes = [1, 1], strides = [1, 1]} : vector<4x4xf32> to vector<1x1xf32>
    %232 = vector.broadcast %231 : vector<1x1xf32> to vector<8x2xf32>
    %233 = arith.mulf %165, %232 : vector<8x2xf32>
    %234 = arith.addf %230, %233 : vector<8x2xf32>
    %235 = vector.extract_strided_slice %208 {offsets = [1, 3], sizes = [1, 1], strides = [1, 1]} : vector<4x4xf32> to vector<1x1xf32>
    %236 = vector.broadcast %235 : vector<1x1xf32> to vector<8x2xf32>
    %237 = arith.mulf %166, %236 : vector<8x2xf32>
    %238 = arith.addf %234, %237 : vector<8x2xf32>
    %239 = vector.extract_strided_slice %208 {offsets = [2, 0], sizes = [1, 1], strides = [1, 1]} : vector<4x4xf32> to vector<1x1xf32>
    %240 = vector.broadcast %239 : vector<1x1xf32> to vector<8x2xf32>
    %241 = arith.mulf %163, %240 : vector<8x2xf32>
    %242 = vector.extract_strided_slice %208 {offsets = [2, 1], sizes = [1, 1], strides = [1, 1]} : vector<4x4xf32> to vector<1x1xf32>
    %243 = vector.broadcast %242 : vector<1x1xf32> to vector<8x2xf32>
    %244 = arith.mulf %164, %243 : vector<8x2xf32>
    %245 = arith.addf %241, %244 : vector<8x2xf32>
    %246 = vector.extract_strided_slice %208 {offsets = [2, 2], sizes = [1, 1], strides = [1, 1]} : vector<4x4xf32> to vector<1x1xf32>
    %247 = vector.broadcast %246 : vector<1x1xf32> to vector<8x2xf32>
    %248 = arith.mulf %165, %247 : vector<8x2xf32>
    %249 = arith.addf %245, %248 : vector<8x2xf32>
    %250 = vector.extract_strided_slice %208 {offsets = [2, 3], sizes = [1, 1], strides = [1, 1]} : vector<4x4xf32> to vector<1x1xf32>
    %251 = vector.broadcast %250 : vector<1x1xf32> to vector<8x2xf32>
    %252 = arith.mulf %166, %251 : vector<8x2xf32>
    %253 = arith.addf %249, %252 : vector<8x2xf32>
    %254 = vector.extract_strided_slice %208 {offsets = [3, 0], sizes = [1, 1], strides = [1, 1]} : vector<4x4xf32> to vector<1x1xf32>
    %255 = vector.broadcast %254 : vector<1x1xf32> to vector<8x2xf32>
    %256 = arith.mulf %163, %255 : vector<8x2xf32>
    %257 = vector.extract_strided_slice %208 {offsets = [3, 1], sizes = [1, 1], strides = [1, 1]} : vector<4x4xf32> to vector<1x1xf32>
    %258 = vector.broadcast %257 : vector<1x1xf32> to vector<8x2xf32>
    %259 = arith.mulf %164, %258 : vector<8x2xf32>
    %260 = arith.addf %256, %259 : vector<8x2xf32>
    %261 = vector.extract_strided_slice %208 {offsets = [3, 2], sizes = [1, 1], strides = [1, 1]} : vector<4x4xf32> to vector<1x1xf32>
    %262 = vector.broadcast %261 : vector<1x1xf32> to vector<8x2xf32>
    %263 = arith.mulf %165, %262 : vector<8x2xf32>
    %264 = arith.addf %260, %263 : vector<8x2xf32>
    %265 = vector.extract_strided_slice %208 {offsets = [3, 3], sizes = [1, 1], strides = [1, 1]} : vector<4x4xf32> to vector<1x1xf32>
    %266 = vector.broadcast %265 : vector<1x1xf32> to vector<8x2xf32>
    %267 = arith.mulf %166, %266 : vector<8x2xf32>
    %268 = arith.addf %264, %267 : vector<8x2xf32>
    %269 = tpu.concatenate %223, %238, %253, %268 in 1 : vector<8x2xf32>, vector<8x2xf32>, vector<8x2xf32>, vector<8x2xf32> -> vector<8x8xf32>
    %cst_132 = arith.constant dense<0.000000e+00> : vector<8x8xf32>
    %270 = tpu.matmul %0, %269, %cst_132 {dimension_numbers = #tpu.dot_dimension_numbers<[1], [0], [0], [1], [0, 0, 1, 1], [], []>} : vector<8x8xf32>, vector<8x8xf32>, vector<8x8xf32> -> vector<8x8xf32>
    %cst_133 = arith.constant dense<0.000000e+00> : vector<8x8xf32>
    %271 = tpu.matmul %0, %270, %cst_133 {dimension_numbers = #tpu.dot_dimension_numbers<[1], [0], [0], [1], [0, 0, 1, 1], [], []>} : vector<8x8xf32>, vector<8x8xf32>, vector<8x8xf32> -> vector<8x8xf32>
    %cst_134 = arith.constant 2.000000e+00 : f32
    %272 = vector.broadcast %cst_134 : f32 to vector<8x8xf32>
    %273 = arith.mulf %272, %271 : vector<8x8xf32>
    %274 = arith.subf %273, %269 : vector<8x8xf32>
    %cst_135 = arith.constant dense<0.000000e+00> : vector<8x8xf32>
    %275 = tpu.matmul %1, %269, %cst_135 {dimension_numbers = #tpu.dot_dimension_numbers<[1], [0], [0], [1], [0, 0, 1, 1], [], []>} : vector<8x8xf32>, vector<8x8xf32>, vector<8x8xf32> -> vector<8x8xf32>
    %cst_136 = arith.constant dense<0.000000e+00> : vector<8x8xf32>
    %276 = tpu.matmul %1, %275, %cst_136 {dimension_numbers = #tpu.dot_dimension_numbers<[1], [0], [0], [1], [0, 0, 1, 1], [], []>} : vector<8x8xf32>, vector<8x8xf32>, vector<8x8xf32> -> vector<8x8xf32>
    %cst_137 = arith.constant 2.000000e+00 : f32
    %277 = vector.broadcast %cst_137 : f32 to vector<8x8xf32>
    %278 = arith.mulf %277, %276 : vector<8x8xf32>
    %279 = arith.subf %278, %269 : vector<8x8xf32>
    %cst_138 = arith.constant dense<0.000000e+00> : vector<8x128xf32>
    %280 = tpu.matmul %269, %172, %cst_138 {dimension_numbers = #tpu.dot_dimension_numbers<[1], [0], [0], [1], [0, 0, 1, 1], [], []>} : vector<8x8xf32>, vector<8x128xf32>, vector<8x128xf32> -> vector<8x128xf32>
    %cst_139 = arith.constant dense<0.000000e+00> : vector<8x128xf32>
    %281 = tpu.matmul %270, %173, %cst_139 {dimension_numbers = #tpu.dot_dimension_numbers<[1], [0], [0], [1], [0, 0, 1, 1], [], []>} : vector<8x8xf32>, vector<8x128xf32>, vector<8x128xf32> -> vector<8x128xf32>
    %282 = arith.addf %280, %281 : vector<8x128xf32>
    %cst_140 = arith.constant dense<0.000000e+00> : vector<8x128xf32>
    %283 = tpu.matmul %274, %174, %cst_140 {dimension_numbers = #tpu.dot_dimension_numbers<[1], [0], [0], [1], [0, 0, 1, 1], [], []>} : vector<8x8xf32>, vector<8x128xf32>, vector<8x128xf32> -> vector<8x128xf32>
    %284 = arith.addf %282, %283 : vector<8x128xf32>
    %cst_141 = arith.constant 0.000000e+00 : f32
    %285 = vector.broadcast %cst_141 : f32 to vector<8x128xf32>
    %286 = arith.maximumf %284, %285 : vector<8x128xf32>
    %cst_142 = arith.constant dense<0.000000e+00> : vector<8x128xf32>
    %287 = tpu.matmul %269, %175, %cst_142 {dimension_numbers = #tpu.dot_dimension_numbers<[1], [0], [0], [1], [0, 0, 1, 1], [], []>} : vector<8x8xf32>, vector<8x128xf32>, vector<8x128xf32> -> vector<8x128xf32>
    %cst_143 = arith.constant dense<0.000000e+00> : vector<8x128xf32>
    %288 = tpu.matmul %275, %176, %cst_143 {dimension_numbers = #tpu.dot_dimension_numbers<[1], [0], [0], [1], [0, 0, 1, 1], [], []>} : vector<8x8xf32>, vector<8x128xf32>, vector<8x128xf32> -> vector<8x128xf32>
    %289 = arith.addf %287, %288 : vector<8x128xf32>
    %cst_144 = arith.constant dense<0.000000e+00> : vector<8x128xf32>
    %290 = tpu.matmul %279, %177, %cst_144 {dimension_numbers = #tpu.dot_dimension_numbers<[1], [0], [0], [1], [0, 0, 1, 1], [], []>} : vector<8x8xf32>, vector<8x128xf32>, vector<8x128xf32> -> vector<8x128xf32>
    %291 = arith.addf %289, %290 : vector<8x128xf32>
    %cst_145 = arith.constant 0.000000e+00 : f32
    %292 = vector.broadcast %cst_145 : f32 to vector<8x128xf32>
    %293 = arith.maximumf %291, %292 : vector<8x128xf32>
    %cst_146 = arith.constant dense<0.000000e+00> : vector<8x8xf32>
    %294 = tpu.matmul %286, %178, %cst_146 {dimension_numbers = #tpu.dot_dimension_numbers<[1], [0], [0], [1], [0, 0, 1, 1], [], []>} : vector<8x128xf32>, vector<128x8xf32>, vector<8x8xf32> -> vector<8x8xf32>
    %295 = vector.broadcast %180 : vector<1x8xf32> to vector<8x8xf32>
    %296 = arith.addf %295, %294 : vector<8x8xf32>
    %cst_147 = arith.constant dense<0.000000e+00> : vector<8x8xf32>
    %297 = tpu.matmul %293, %179, %cst_147 {dimension_numbers = #tpu.dot_dimension_numbers<[1], [0], [0], [1], [0, 0, 1, 1], [], []>} : vector<8x128xf32>, vector<128x8xf32>, vector<8x8xf32> -> vector<8x8xf32>
    %298 = arith.addf %296, %297 : vector<8x8xf32>
    %cst_148 = arith.constant dense<0.000000e+00> : vector<8x8xf32>
    %299 = tpu.matmul %162, %181, %cst_148 {dimension_numbers = #tpu.dot_dimension_numbers<[1], [0], [0], [1], [0, 0, 1, 1], [], []>} : vector<8x8xf32>, vector<8x8xf32>, vector<8x8xf32> -> vector<8x8xf32>
    %300 = vector.broadcast %182 : vector<1x8xf32> to vector<8x8xf32>
    %301 = arith.addf %299, %300 : vector<8x8xf32>
    %302 = arith.addf %298, %301 : vector<8x8xf32>
    %cst_149 = arith.constant 0.000000e+00 : f32
    %303 = vector.broadcast %cst_149 : f32 to vector<8x8xf32>
    %304 = arith.maximumf %302, %303 : vector<8x8xf32>
    %cst_150 = arith.constant dense<0.000000e+00> : vector<8x8xf32>
    %305 = tpu.matmul %304, %2, %cst_150 {dimension_numbers = #tpu.dot_dimension_numbers<[1], [0], [0], [1], [0, 0, 1, 1], [], []>} : vector<8x8xf32>, vector<8x8xf32>, vector<8x8xf32> -> vector<8x8xf32>
    %306 = arith.subf %304, %305 : vector<8x8xf32>
    %307 = arith.mulf %306, %306 : vector<8x8xf32>
    %cst_151 = arith.constant dense<0.000000e+00> : vector<8x8xf32>
    %308 = tpu.matmul %307, %2, %cst_151 {dimension_numbers = #tpu.dot_dimension_numbers<[1], [0], [0], [1], [0, 0, 1, 1], [], []>} : vector<8x8xf32>, vector<8x8xf32>, vector<8x8xf32> -> vector<8x8xf32>
    %309 = arith.subf %304, %305 : vector<8x8xf32>
    %cst_152 = arith.constant 9.99999974E-6 : f32
    %310 = vector.broadcast %cst_152 : f32 to vector<8x8xf32>
    %311 = arith.addf %308, %310 : vector<8x8xf32>
    %312 = math.rsqrt %311 : vector<8x8xf32>
    %313 = arith.mulf %309, %312 : vector<8x8xf32>
    %314 = vector.broadcast %183 : vector<1x8xf32> to vector<8x8xf32>
    %315 = arith.mulf %313, %314 : vector<8x8xf32>
    %316 = vector.broadcast %184 : vector<1x8xf32> to vector<8x8xf32>
    %317 = arith.addf %315, %316 : vector<8x8xf32>
    %c0_153 = arith.constant 0 : index
    %c0_154 = arith.constant 0 : index
    %318 = vector.load %arg41[%c0_153, %c0_154] : memref<8x12xf32, #tpu.memory_space<vmem>>, vector<8x12xf32>
    %cst_155 = arith.constant dense<0.000000e+00> : vector<8x12xf32>
    %319 = tpu.matmul %317, %318, %cst_155 {dimension_numbers = #tpu.dot_dimension_numbers<[1], [0], [0], [1], [0, 0, 1, 1], [], []>} : vector<8x8xf32>, vector<8x12xf32>, vector<8x12xf32> -> vector<8x12xf32>
    %c0_156 = arith.constant 0 : index
    %c0_157 = arith.constant 0 : index
    %320 = vector.load %arg42[%c0_156, %c0_157] : memref<1x12xf32, #tpu.memory_space<vmem>>, vector<1x12xf32>
    %321 = vector.broadcast %320 : vector<1x12xf32> to vector<8x12xf32>
    %322 = arith.addf %319, %321 : vector<8x12xf32>
    %c0_158 = arith.constant 0 : index
    %c0_159 = arith.constant 0 : index
    %c0_160 = arith.constant 0 : index
    %323 = vector.load %arg43[%c0_158, %c0_159, %c0_160] : memref<1x8x12xf32, #tpu.memory_space<vmem>>, vector<1x8x12xf32>
    %324 = vector.shape_cast %323 : vector<1x8x12xf32> to vector<8x12xf32>
    %325 = vector.shape_cast %322 : vector<8x12xf32> to vector<1x8x12xf32>
    tpu.vector_store %arg43[%c0_158, %c0_159, %c0_160], %325 {strides = array<i32>} : memref<1x8x12xf32, #tpu.memory_space<vmem>>, vector<1x8x12xf32>,
    return
  }
  func.func @transform_0(%arg0: i32) -> (i32, i32, i32, i32) {
    %c0_i32 = arith.constant 0 : i32
    %c0_i32_0 = arith.constant 0 : i32
    %c0_i32_1 = arith.constant 0 : i32
    %c0_i32_2 = arith.constant 0 : i32
    return %arg0, %c0_i32, %c0_i32_0, %c0_i32_1 : i32, i32, i32, i32
  }
  func.func @transform_1(%arg0: i32) -> (i32, i32) {
    %c0_i32 = arith.constant 0 : i32
    %c0_i32_0 = arith.constant 0 : i32
    %c0_i32_1 = arith.constant 0 : i32
    return %c0_i32, %c0_i32_0 : i32, i32
  }
  func.func @transform_2(%arg0: i32) -> (i32, i32) {
    %c0_i32 = arith.constant 0 : i32
    %c0_i32_0 = arith.constant 0 : i32
    %c0_i32_1 = arith.constant 0 : i32
    return %c0_i32, %c0_i32_0 : i32, i32
  }
  func.func @transform_3(%arg0: i32) -> (i32, i32) {
    %c0_i32 = arith.constant 0 : i32
    %c0_i32_0 = arith.constant 0 : i32
    %c0_i32_1 = arith.constant 0 : i32
    return %c0_i32, %c0_i32_0 : i32, i32
  }
  func.func @transform_4(%arg0: i32) -> (i32, i32) {
    %c0_i32 = arith.constant 0 : i32
    %c0_i32_0 = arith.constant 0 : i32
    %c0_i32_1 = arith.constant 0 : i32
    return %c0_i32, %c0_i32_0 : i32, i32
  }
  func.func @transform_5(%arg0: i32) -> (i32, i32) {
    %c0_i32 = arith.constant 0 : i32
    %c0_i32_0 = arith.constant 0 : i32
    %c0_i32_1 = arith.constant 0 : i32
    return %c0_i32, %c0_i32_0 : i32, i32
  }
  func.func @transform_6(%arg0: i32) -> (i32, i32) {
    %c0_i32 = arith.constant 0 : i32
    %c0_i32_0 = arith.constant 0 : i32
    %c0_i32_1 = arith.constant 0 : i32
    return %c0_i32, %c0_i32_0 : i32, i32
  }
  func.func @transform_7(%arg0: i32) -> (i32, i32) {
    %c0_i32 = arith.constant 0 : i32
    %c0_i32_0 = arith.constant 0 : i32
    %c0_i32_1 = arith.constant 0 : i32
    return %c0_i32, %c0_i32_0 : i32, i32
  }
  func.func @transform_8(%arg0: i32) -> (i32, i32) {
    %c0_i32 = arith.constant 0 : i32
    %c0_i32_0 = arith.constant 0 : i32
    %c0_i32_1 = arith.constant 0 : i32
    return %c0_i32, %c0_i32_0 : i32, i32
  }
  func.func @transform_9(%arg0: i32) -> (i32, i32) {
    %c0_i32 = arith.constant 0 : i32
    %c0_i32_0 = arith.constant 0 : i32
    %c0_i32_1 = arith.constant 0 : i32
    return %c0_i32, %c0_i32_0 : i32, i32
  }
  func.func @transform_10(%arg0: i32) -> (i32, i32) {
    %c0_i32 = arith.constant 0 : i32
    %c0_i32_0 = arith.constant 0 : i32
    %c0_i32_1 = arith.constant 0 : i32
    return %c0_i32, %c0_i32_0 : i32, i32
  }
  func.func @transform_11(%arg0: i32) -> (i32, i32) {
    %c0_i32 = arith.constant 0 : i32
    %c0_i32_0 = arith.constant 0 : i32
    %c0_i32_1 = arith.constant 0 : i32
    return %c0_i32, %c0_i32_0 : i32, i32
  }
  func.func @transform_12(%arg0: i32) -> (i32, i32) {
    %c0_i32 = arith.constant 0 : i32
    %c0_i32_0 = arith.constant 0 : i32
    %c0_i32_1 = arith.constant 0 : i32
    return %c0_i32, %c0_i32_0 : i32, i32
  }
  func.func @transform_13(%arg0: i32) -> (i32, i32) {
    %c0_i32 = arith.constant 0 : i32
    %c0_i32_0 = arith.constant 0 : i32
    %c0_i32_1 = arith.constant 0 : i32
    return %c0_i32, %c0_i32_0 : i32, i32
  }
  func.func @transform_14(%arg0: i32) -> (i32, i32) {
    %c0_i32 = arith.constant 0 : i32
    %c0_i32_0 = arith.constant 0 : i32
    %c0_i32_1 = arith.constant 0 : i32
    return %c0_i32, %c0_i32_0 : i32, i32
  }
  func.func @transform_15(%arg0: i32) -> (i32, i32) {
    %c0_i32 = arith.constant 0 : i32
    %c0_i32_0 = arith.constant 0 : i32
    %c0_i32_1 = arith.constant 0 : i32
    return %c0_i32, %c0_i32_0 : i32, i32
  }
  func.func @transform_16(%arg0: i32) -> (i32, i32) {
    %c0_i32 = arith.constant 0 : i32
    %c0_i32_0 = arith.constant 0 : i32
    %c0_i32_1 = arith.constant 0 : i32
    return %c0_i32, %c0_i32_0 : i32, i32
  }
  func.func @transform_17(%arg0: i32) -> (i32, i32) {
    %c0_i32 = arith.constant 0 : i32
    %c0_i32_0 = arith.constant 0 : i32
    %c0_i32_1 = arith.constant 0 : i32
    return %c0_i32, %c0_i32_0 : i32, i32
  }
  func.func @transform_18(%arg0: i32) -> (i32, i32) {
    %c0_i32 = arith.constant 0 : i32
    %c0_i32_0 = arith.constant 0 : i32
    %c0_i32_1 = arith.constant 0 : i32
    return %c0_i32, %c0_i32_0 : i32, i32
  }
  func.func @transform_19(%arg0: i32) -> (i32, i32) {
    %c0_i32 = arith.constant 0 : i32
    %c0_i32_0 = arith.constant 0 : i32
    %c0_i32_1 = arith.constant 0 : i32
    return %c0_i32, %c0_i32_0 : i32, i32
  }
  func.func @transform_20(%arg0: i32) -> (i32, i32) {
    %c0_i32 = arith.constant 0 : i32
    %c0_i32_0 = arith.constant 0 : i32
    %c0_i32_1 = arith.constant 0 : i32
    return %c0_i32, %c0_i32_0 : i32, i32
  }
  func.func @transform_21(%arg0: i32) -> (i32, i32) {
    %c0_i32 = arith.constant 0 : i32
    %c0_i32_0 = arith.constant 0 : i32
    %c0_i32_1 = arith.constant 0 : i32
    return %c0_i32, %c0_i32_0 : i32, i32
  }
  func.func @transform_22(%arg0: i32) -> (i32, i32) {
    %c0_i32 = arith.constant 0 : i32
    %c0_i32_0 = arith.constant 0 : i32
    %c0_i32_1 = arith.constant 0 : i32
    return %c0_i32, %c0_i32_0 : i32, i32
  }
  func.func @transform_23(%arg0: i32) -> (i32, i32) {
    %c0_i32 = arith.constant 0 : i32
    %c0_i32_0 = arith.constant 0 : i32
    %c0_i32_1 = arith.constant 0 : i32
    return %c0_i32, %c0_i32_0 : i32, i32
  }
  func.func @transform_24(%arg0: i32) -> (i32, i32) {
    %c0_i32 = arith.constant 0 : i32
    %c0_i32_0 = arith.constant 0 : i32
    %c0_i32_1 = arith.constant 0 : i32
    return %c0_i32, %c0_i32_0 : i32, i32
  }
  func.func @transform_25(%arg0: i32) -> (i32, i32) {
    %c0_i32 = arith.constant 0 : i32
    %c0_i32_0 = arith.constant 0 : i32
    %c0_i32_1 = arith.constant 0 : i32
    return %c0_i32, %c0_i32_0 : i32, i32
  }
  func.func @transform_26(%arg0: i32) -> (i32, i32) {
    %c0_i32 = arith.constant 0 : i32
    %c0_i32_0 = arith.constant 0 : i32
    %c0_i32_1 = arith.constant 0 : i32
    return %c0_i32, %c0_i32_0 : i32, i32
  }
  func.func @transform_27(%arg0: i32) -> (i32, i32) {
    %c0_i32 = arith.constant 0 : i32
    %c0_i32_0 = arith.constant 0 : i32
    %c0_i32_1 = arith.constant 0 : i32
    return %c0_i32, %c0_i32_0 : i32, i32
  }
  func.func @transform_28(%arg0: i32) -> (i32, i32) {
    %c0_i32 = arith.constant 0 : i32
    %c0_i32_0 = arith.constant 0 : i32
    %c0_i32_1 = arith.constant 0 : i32
    return %c0_i32, %c0_i32_0 : i32, i32
  }
  func.func @transform_29(%arg0: i32) -> (i32, i32) {
    %c0_i32 = arith.constant 0 : i32
    %c0_i32_0 = arith.constant 0 : i32
    %c0_i32_1 = arith.constant 0 : i32
    return %c0_i32, %c0_i32_0 : i32, i32
  }
  func.func @transform_30(%arg0: i32) -> (i32, i32) {
    %c0_i32 = arith.constant 0 : i32
    %c0_i32_0 = arith.constant 0 : i32
    %c0_i32_1 = arith.constant 0 : i32
    return %c0_i32, %c0_i32_0 : i32, i32
  }
  func.func @transform_31(%arg0: i32) -> (i32, i32) {
    %c0_i32 = arith.constant 0 : i32
    %c0_i32_0 = arith.constant 0 : i32
    %c0_i32_1 = arith.constant 0 : i32
    return %c0_i32, %c0_i32_0 : i32, i32
  }
  func.func @transform_32(%arg0: i32) -> (i32, i32) {
    %c0_i32 = arith.constant 0 : i32
    %c0_i32_0 = arith.constant 0 : i32
    %c0_i32_1 = arith.constant 0 : i32
    return %c0_i32, %c0_i32_0 : i32, i32
  }
  func.func @transform_33(%arg0: i32) -> (i32, i32) {
    %c0_i32 = arith.constant 0 : i32
    %c0_i32_0 = arith.constant 0 : i32
    %c0_i32_1 = arith.constant 0 : i32
    return %c0_i32, %c0_i32_0 : i32, i32
  }
  func.func @transform_34(%arg0: i32) -> (i32, i32) {
    %c0_i32 = arith.constant 0 : i32
    %c0_i32_0 = arith.constant 0 : i32
    %c0_i32_1 = arith.constant 0 : i32
    return %c0_i32, %c0_i32_0 : i32, i32
  }
  func.func @transform_35(%arg0: i32) -> (i32, i32) {
    %c0_i32 = arith.constant 0 : i32
    %c0_i32_0 = arith.constant 0 : i32
    %c0_i32_1 = arith.constant 0 : i32
    return %c0_i32, %c0_i32_0 : i32, i32
  }
  func.func @transform_36(%arg0: i32) -> (i32, i32) {
    %c0_i32 = arith.constant 0 : i32
    %c0_i32_0 = arith.constant 0 : i32
    %c0_i32_1 = arith.constant 0 : i32
    return %c0_i32, %c0_i32_0 : i32, i32
  }
  func.func @transform_37(%arg0: i32) -> (i32, i32) {
    %c0_i32 = arith.constant 0 : i32
    %c0_i32_0 = arith.constant 0 : i32
    %c0_i32_1 = arith.constant 0 : i32
    return %c0_i32, %c0_i32_0 : i32, i32
  }
  func.func @transform_38(%arg0: i32) -> (i32, i32) {
    %c0_i32 = arith.constant 0 : i32
    %c0_i32_0 = arith.constant 0 : i32
    %c0_i32_1 = arith.constant 0 : i32
    return %c0_i32, %c0_i32_0 : i32, i32
  }
  func.func @transform_39(%arg0: i32) -> (i32, i32) {
    %c0_i32 = arith.constant 0 : i32
    %c0_i32_0 = arith.constant 0 : i32
    %c0_i32_1 = arith.constant 0 : i32
    return %c0_i32, %c0_i32_0 : i32, i32
  }
  func.func @transform_40(%arg0: i32) -> (i32, i32) {
    %c0_i32 = arith.constant 0 : i32
    %c0_i32_0 = arith.constant 0 : i32
    %c0_i32_1 = arith.constant 0 : i32
    return %c0_i32, %c0_i32_0 : i32, i32
  }
  func.func @transform_41(%arg0: i32) -> (i32, i32) {
    %c0_i32 = arith.constant 0 : i32
    %c0_i32_0 = arith.constant 0 : i32
    %c0_i32_1 = arith.constant 0 : i32
    return %c0_i32, %c0_i32_0 : i32, i32
  }
  func.func @transform_42(%arg0: i32) -> (i32, i32, i32) {
    %c0_i32 = arith.constant 0 : i32
    %c0_i32_0 = arith.constant 0 : i32
    %c0_i32_1 = arith.constant 0 : i32
    return %arg0, %c0_i32, %c0_i32_0 : i32, i32, i32
  }
}

</mosaic_0001>

<bundles_post_ra>
// kernel: adapgla_forward.1
= control target key start
LH: loop header
LB: loop body
LE: loop exit
PB: predicated region body
PF: predicated region fallthrough
CT: control target
= control target key end

     0   :  { %s3663_s6 = smov 1   ;;  %s3664_s10 = smov 2   ;;  %s4495_s0 = inlined_call_operand.smem [shape: u32[43], index: -1, kind: input, shape index: {}] }
   0x1   :  { %s3727_s5 = sld [smem:[%s4495_s0]]   ;;  %s3665_s14 = smov 3  }
   0x2   :  { %s3732_s9 = sld [smem:[%s4495_s0 + %s3663_s6]]   ;;  %s3666_s18 = smov 4  }
   0x3   :  { %s3737_s13 = sld [smem:[%s4495_s0 + %s3664_s10]]   ;;  %s3667_s22 = smov 5  }
   0x4   :  { %s3742_s17 = sld [smem:[%s4495_s0 + %s3665_s14]]   ;;  %s3668_s26 = smov 6  }
   0x5   :  { %s3747_s21 = sld [smem:[%s4495_s0 + %s3666_s18]]   ;;  %s3669_s30 = smov 7  }
   0x6   :  { %s3752_s25 = sld [smem:[%s4495_s0 + %s3667_s22]]   ;;  %s3670_s4 = smov 8  }
   0x7   :  { %4522 = sst [smem:[#allocation12_spill]] %s3727_s5  ;;  %s3671_s10 = smov 9  }
   0x8   :  { %s3757_s29 = sld [smem:[%s4495_s0 + %s3668_s26]]   ;;  %s3672_s15 = smov 10  }
   0x9   :  { %s3762_s3 = sld [smem:[%s4495_s0 + %s3669_s30]]   ;;  %s3673_s20 = smov 11  }
   0xa   :  { %s3767_s8 = sld [smem:[%s4495_s0 + %s3670_s4]]   ;;  %s3674_s26 = smov 12  }
   0xb   :  { %s3772_s14 = sld [smem:[%s4495_s0 + %s3671_s10]]   ;;  %s3675_s1 = smov 13  }
   0xc   :  { %s3777_s19 = sld [smem:[%s4495_s0 + %s3672_s15]]   ;;  %s3676_s7 = smov 14  }
   0xd   :  { %s3782_s24 = sld [smem:[%s4495_s0 + %s3673_s20]]   ;;  %s3677_s15 = smov 15  }
   0xe   :  { %s3787_s30 = sld [smem:[%s4495_s0 + %s3674_s26]]   ;;  %s3678_s22 = smov 16  }
   0xf   :  { %4523 = sst [smem:[#allocation13_spill]] %s3762_s3  ;;  %s3679_s28 = smov 17  }
  0x10   :  { %s3792_s6 = sld [smem:[%s4495_s0 + %s3675_s1]]  }
  0x11   :  { %s3797_s12 = sld [smem:[%s4495_s0 + %s3676_s7]]   ;;  %s3680_s7 = smov 18  }
  0x12   :  { %4524 = sst [smem:[#allocation14_spill]] %s3777_s19 }
  0x13   :  { %s3802_s20 = sld [smem:[%s4495_s0 + %s3677_s15]]   ;;  %s3681_s15 = smov 19  }
  0x14   :  { %s3807_s27 = sld [smem:[%s4495_s0 + %s3678_s22]]   ;;  %s3682_s22 = smov 20  }
  0x15   :  { %s3812_s4 = sld [smem:[%s4495_s0 + %s3679_s28]]   ;;  %s3683_s28 = smov 21  }
  0x16   :  { %4525 = sst [smem:[#allocation15_spill]] %s3792_s6 }
  0x17   :  { %4526 = sst [smem:[#allocation16_spill]] %s3797_s12 }
  0x18   :  { %s3817_s12 = sld [smem:[%s4495_s0 + %s3680_s7]]   ;;  %s3684_s7 = smov 22  }
  0x19   :  { %4527 = sst [smem:[#allocation17_spill]] %s3802_s20 }
  0x1a   :  { %4528 = sst [smem:[#allocation18_spill]] %s3807_s27 }
  0x1b   :  { %4529 = sst [smem:[#allocation19_spill]] %s3812_s4 }
  0x1c   :  { %s3822_s20 = sld [smem:[%s4495_s0 + %s3681_s15]]   ;;  %s3685_s15 = smov 23  }
  0x1d   :  { %s3827_s27 = sld [smem:[%s4495_s0 + %s3682_s22]]   ;;  %s3686_s22 = smov 24  }
  0x1e   :  { %s3832_s4 = sld [smem:[%s4495_s0 + %s3683_s28]]   ;;  %s3687_s28 = smov 25  }
  0x1f   :  { %s3837_s19 = sld [smem:[%s4495_s0 + %s3684_s7]]   ;;  %s3688_s7 = smov 26  }
  0x22   :  { %4530 = sst [smem:[#allocation20_spill]] %s3822_s20 }
  0x23   :  { %4531 = sst [smem:[#allocation21_spill]] %s3827_s27 }
  0x24   :  { %4532 = sst [smem:[#allocation22_spill]] %s3832_s4 }
  0x25   :  { %4533 = sst [smem:[#allocation23_spill]] %s3837_s19 }
  0x26   :  { %s3842_s20 = sld [smem:[%s4495_s0 + %s3685_s15]]   ;;  %s3689_s15 = smov 27  }
  0x27   :  { %s3847_s27 = sld [smem:[%s4495_s0 + %s3686_s22]]   ;;  %s3690_s22 = smov 28  }
  0x28   :  { %s3852_s4 = sld [smem:[%s4495_s0 + %s3687_s28]]   ;;  %s3691_s28 = smov 29  }
  0x29   :  { %s3857_s19 = sld [smem:[%s4495_s0 + %s3688_s7]]   ;;  %s3692_s7 = smov 30  }
  0x2c   :  { %4534 = sst [smem:[#allocation24_spill]] %s3842_s20 }
  0x2d   :  { %4535 = sst [smem:[#allocation25_spill]] %s3847_s27 }
  0x2e   :  { %4536 = sst [smem:[#allocation26_spill]] %s3852_s4 }
  0x2f   :  { %4537 = sst [smem:[#allocation27_spill]] %s3857_s19 }
  0x30   :  { %s3862_s20 = sld [smem:[%s4495_s0 + %s3689_s15]]   ;;  %s3693_s15 = smov 31  }
  0x31   :  { %s3867_s27 = sld [smem:[%s4495_s0 + %s3690_s22]]   ;;  %s3694_s22 = smov 32  }
  0x32   :  { %s3872_s4 = sld [smem:[%s4495_s0 + %s3691_s28]]   ;;  %s3695_s28 = smov 33  }
  0x33   :  { %s3877_s19 = sld [smem:[%s4495_s0 + %s3692_s7]]   ;;  %s3696_s7 = smov 34  }
  0x36   :  { %4538 = sst [smem:[#allocation28_spill]] %s3862_s20 }
  0x37   :  { %4539 = sst [smem:[#allocation29_spill]] %s3867_s27 }
  0x38   :  { %4540 = sst [smem:[#allocation30_spill]] %s3872_s4 }
  0x39   :  { %4541 = sst [smem:[#allocation31_spill]] %s3877_s19 }
  0x3a   :  { %s3882_s20 = sld [smem:[%s4495_s0 + %s3693_s15]]   ;;  %s3697_s15 = smov 35  }
  0x3b   :  { %s3887_s27 = sld [smem:[%s4495_s0 + %s3694_s22]]   ;;  %s3698_s22 = smov 36  }
  0x3c   :  { %s3892_s4 = sld [smem:[%s4495_s0 + %s3695_s28]]   ;;  %s3699_s28 = smov 37  }
  0x3d   :  { %s3897_s19 = sld [smem:[%s4495_s0 + %s3696_s7]]   ;;  %s3700_s7 = smov 38  }
  0x40   :  { %4542 = sst [smem:[#allocation32_spill]] %s3882_s20 }
  0x41   :  { %4543 = sst [smem:[#allocation33_spill]] %s3887_s27 }
  0x42   :  { %4544 = sst [smem:[#allocation34_spill]] %s3892_s4 }
  0x43   :  { %4545 = sst [smem:[#allocation35_spill]] %s3897_s19 }
  0x44   :  { %s3902_s20 = sld [smem:[%s4495_s0 + %s3697_s15]]   ;;  %s3701_s15 = smov 39  }
  0x45   :  { %s3907_s27 = sld [smem:[%s4495_s0 + %s3698_s22]]   ;;  %s3702_s22 = smov 40  }
  0x46   :  { %s3912_s4 = sld [smem:[%s4495_s0 + %s3699_s28]]   ;;  %s3703_s28 = smov 41  }
  0x47   :  { %s3917_s19 = sld [smem:[%s4495_s0 + %s3700_s7]]   ;;  %s3704_s7 = smov 42  }
  0x4a   :  { %4546 = sst [smem:[#allocation36_spill]] %s3902_s20 }
  0x4b   :  { %4547 = sst [smem:[#allocation37_spill]] %s3907_s27 }
  0x4c   :  { %4548 = sst [smem:[#allocation38_spill]] %s3912_s4 }
  0x4d   :  { %4549 = sst [smem:[#allocation39_spill]] %s3917_s19 }
  0x4e   :  { %s3922_s20 = sld [smem:[%s4495_s0 + %s3701_s15]]  }
  0x4f   :  { %s3927_s27 = sld [smem:[%s4495_s0 + %s3702_s22]]  }
  0x50   :  { %s3932_s4 = sld [smem:[%s4495_s0 + %s3703_s28]]  }
  0x51   :  { %s3937_s19 = sld [smem:[%s4495_s0 + %s3704_s7]]  }
  0x56   :  { %4550 = sst [smem:[#allocation40_spill]] %s3932_s4 }
  0x57   :  { %90 = vsyncpa [#allocation3], 0 }
  0x58   :  { %91 = vsyncpa [#allocation6], 0 }
  0x59   :  { %92 = vsyncpa [#allocation4], 0 }
  0x5a   :  { %94 = vsyncpa [#allocation4 + $0x1], 0  ;;  %s3939_s15 = smov 0   ;;  %s3941_s16 = smov 0  }
  0x5b   :  { %s3943_s18 = smov 0   ;;  %s3945_s22 = smov 0  }
  0x5c LB: > { %s4551_s6 = sld [smem:[#allocation15_spill]]  ;;  %s3960_s0 = sadd.s32 4294967295, %s3661_s22   ;;  %s3653_s16 = sphi %s3941_s16, %s4606_s16   ;;  %s3649_s15 = sphi %s3939_s15, %s4605_s15   ;;  %s3661_s22 = sphi %s3945_s22, %s4602_s22   ;;  %s3657_s18 = sphi %s3943_s18, %s4604_s18  }
  0x5d   : > { %s4552_s4 = sld [smem:[#allocation40_spill]]  ;;  %s3213_s23 = sadd.s32 4294967294, %s3661_s22  }
  0x5e   : > { %4553 = sst [smem:[#allocation41_spill]] %s3649_s15  ;;  %s3964_s26 = sadd.s32 1, %s3661_s22  }
  0x5f   : > { %4554 = sst [smem:[#allocation42_spill]] %s3657_s18  ;;  %s994_s28 = sadd.s32 1, %s3657_s18 }
  0x60   : > { %4555 = sst [smem:[#allocation43_spill]] %s3661_s22  ;;  %s991_s1 = ssub.s32 %s3661_s22, %s3964_s26 }
  0x61   : > { %4556 = sst [smem:[#allocation44_spill]] %s3964_s26  ;;  %p1004_p0 = scmp.ne.s32.totalorder %s3657_s18, %s3653_s16 }
  0x62   : > { %p992_p1 = scmp.eq.s32.totalorder %s991_s1, 0  ;;  %p1005_p2 = scmp.eq.s32.totalorder %s3960_s0, 1 }
  0x63   : > { %p1010_p3 = scmp.ne.s32.totalorder %s3653_s16, %s3649_s15  ;;  %p1011_p4 = scmp.eq.s32.totalorder %s3213_s23, 1 }
  0x64   : > { %s3975_s2 = scalar_select %p992_p1, %s3657_s18, %s994_s28  }
  0x65   : > { %p3977_p5 = por %p1005_p2, %p1004_p0  ;;  %p3981_p6 = por %p1011_p4, %p1010_p3 }
  0x66   : > { %4557 = sst [smem:[#allocation45_spill]] %s3975_s2  ;;  %p3214_p7 = scmp.ge.s32.totalorder %s3661_s22, 1 }
  0x67   : > { %s4558_s7 = scalar_select %p3977_p5, 1, 0 }
  0x68   : > { %s4560_s10 = scalar_select %p3981_p6, 1, 0 }
  0x69   : > { %4559 = sst [smem:[#allocation46_spill]] %s4558_s7  ;;  %p1018_p8 = scmp.lt.s32.totalorder %s3661_s22, 3 }
  0x6a   : > { %4561 = sst [smem:[#allocation47_spill]] %s4560_s10  ;;  %p3375_p9 = scmp.eq.s32.totalorder %s3960_s0, 0 }
  0x6b   : > { %p3988_p10 = pnand %p3214_p7, %p1018_p8  ;;  %s1090_s23 = sshll.u32 %s3817_s12, 4  ;;  %s1091_s23 = int_to_ptr.hbm [resolvable:$true] %s1090_s23 }
  0x6c   : > { %s3705_s28 = smov [#allocation5]   ;;  %s1036_s2 = sshll.u32 %s3742_s17, 4  ;;  %s4002_s2 = int_to_ptr.hbm [resolvable:$true] %s1036_s2 }
  0x6d   : > { %p3361_p11 = pneg %p3988_p10  ;;  %s1092_s1 = sshll.u32 %s3705_s28, 4  ;;  %s1093_s1 = int_to_ptr.vmem [resolvable:$true] %s1092_s1 }
  0x6e   : > { %s3706_s10 = smov [#allocation2]   ;;  %s3501_s22 = sshra.s32 %s1091_s23, 4  ;;  %s3502_s22 = int_to_ptr.hbm [resolvable:$true] %s3501_s22 }
  0x6f   : > { %p3998_p12 = pnand %p3375_p9, %p3361_p11  ;;  %s4005_s15 = sshll.u32 %s3706_s10, 4  ;;  %s1039_s15 = int_to_ptr.vmem [resolvable:$true] %s4005_s15 }
  0x70   : > { %s3503_s7 = scalar_lea.hbm %s3502_s22, 1  ;;  %s3508_s28 = scalar_lea.hbm %s3817_s12, 1 }
  0x71   : > { %p3504_p13 = scmp.ne.s32.totalorder %s3502_s22, %s3503_s7  ;;  %p3505_p0 = pneg %p3998_p12 }
  0x72   : > { %p3509_p3 = scmp.lt.s32.totalorder %s3502_s22, %s3817_s12  ;;  %p3510_p4 = scmp.lt.s32.totalorder %s3508_s28, %s3503_s7 }
  0x73   : > { %p3506_p1 = pnand %p3505_p0, %p3504_p13 }
  0x74   : > { %p3511_p7 = por %p3510_p4, %p3509_p3 }
  0x75   : > { %p3507_p2 = pneg %p3506_p1 }
  0x77   : > { %p3512_p8 = pnand %p3511_p7, %p3507_p2 }
  0x79   : > { %3515 = shalt.err (!%p3512_p8)
}
  0x7a   : > { %3367 = dma.hbm_to_vmem [thread:$0]  (!%p3998_p12), %s1091_s23, 16, %s1093_s1, [#allocation6]  }
  0x7b   : > { %s3531_s10 = sshra.s32 %s4002_s2, 4  ;;  %s3538_s22 = scalar_lea.hbm %s3742_s17, 1  ;;  %s3532_s10 = int_to_ptr.hbm [resolvable:$true] %s3531_s10 }
  0x7c   : > { %s3533_s26 = scalar_lea.hbm %s3532_s10, 1  ;;  %p3539_p2 = scmp.lt.s32.totalorder %s3532_s10, %s3742_s17 }
  0x7d   : > { %p3534_p11 = scmp.ne.s32.totalorder %s3532_s10, %s3533_s26  ;;  %p3540_p3 = scmp.lt.s32.totalorder %s3538_s22, %s3533_s26 }
  0x7f   : > { %p3536_p13 = pnand %p3534_p11, %p3505_p0  ;;  %p3541_p4 = por %p3540_p3, %p3539_p2 }
  0x81   : > { %p3537_p1 = pneg %p3536_p13 }
  0x83   : > { %p3542_p7 = pnand %p3541_p4, %p3537_p1 }
  0x85   : > { %3545 = shalt.err (!%p3542_p7)
}
  0x86   : > { %3364 = dma.hbm_to_vmem [thread:$0]  (!%p3998_p12), %s4002_s2, 16, %s1039_s15, [#allocation3]  }
  0x87   : > { %s4564_s7 = sshll.u32 %s4552_s4, 4  ;;  %s3707_s23 = smov [#allocation7]   ;;  %s1169_s7 = int_to_ptr.hbm [resolvable:$true] %s4564_s7 }
  0x88   : > { %s1170_s1 = sshll.u32 %s3707_s23, 4  ;;  %s3561_s28 = sshra.s32 %s1169_s7, 4  ;;  %s1171_s1 = int_to_ptr.vmem [resolvable:$true] %s1170_s1  ;;  %s3562_s28 = int_to_ptr.hbm [resolvable:$true] %s3561_s28 }
  0x89   : > { %s3563_s10 = scalar_lea.hbm %s3562_s28, 1  ;;  %s3568_s26 = scalar_lea.hbm %s4552_s4, 1 }
  0x8a   : > { %p3564_p8 = scmp.ne.s32.totalorder %s3562_s28, %s3563_s10  ;;  %p3569_p1 = scmp.lt.s32.totalorder %s3562_s28, %s4552_s4 }
  0x8b   : > { %p3570_p2 = scmp.lt.s32.totalorder %s3568_s26, %s3563_s10 }
  0x8c   : > { %p3566_p11 = pnand %p3564_p8, %p3505_p0 }
  0x8d   : > { %p3571_p3 = por %p3570_p2, %p3569_p1 }
  0x8e   : > { %p3567_p13 = pneg %p3566_p11 }
  0x90   : > { %p3572_p4 = pnand %p3571_p3, %p3567_p13 }
  0x92   : > { %3575 = shalt.err (!%p3572_p4)
}
  0x93   : > { %3370 = dma.hbm_to_vmem [thread:$0]  (!%p3998_p12), %s1169_s7, 16, %s1171_s1, [#allocation6]  }
  0x94   : > { %1191 = sbr.rel (%p3988_p10) target bundleno = 4618 (0x120a), region = 188 }
  0x99   : > { %3636 = dma.done.wait (%p3375_p9), [#allocation3], 16  }
  0x9a   : > { %3638 = vsyncadd (%p3375_p9), [#allocation3], 4294967280 }
  0x9b   : > { %3640 = dma.done.wait (%p3375_p9), [#allocation6], 32  }
  0x9c   : > { %3642 = vsyncadd (%p3375_p9), [#allocation6], 4294967264  ;;  %s4565_s5 = sld [smem:[#allocation12_spill]]  ;;  %p1304_p12 = scmp.lt.s32.totalorder %s3960_s0, 1  ;;  %v1354_v2 = vld [vmem:[%s3752_s25 + $0x60] sm:$0xff]  ;;  %v1353_v3 = vld [vmem:[%s3752_s25 + $0x58] sm:$0xff] }
  0x9d   : > { %s3708_s11 = smov 26   ;;  %s3709_s22 = smov 78   ;;  %1491 = vmatpush.msra.mxu0 %v1354_v2  ;;  %v1352_v5 = vld [vmem:[%s3752_s25 + $0x50] sm:$0xff]  ;;  %v1351_v6 = vld [vmem:[%s3752_s25 + $0x48] sm:$0xff]  ;;  %v1350_v7 = vld [vmem:[%s3752_s25 + $0x40] sm:$0xff]  ;;  %vm1508_vm0 = vcmask 64512  }
  0x9e   : > { %s1305_s15 = scalar_select %p1304_p12, %s3960_s0, 1  ;;  %v1349_v8 = vld [vmem:[%s3752_s25 + $0x38] sm:$0xff]  ;;  %v1348_v9 = vld [vmem:[%s3752_s25 + $0x30] sm:$0xff]  ;;  %v1347_v10 = vld [vmem:[%s3752_s25 + $0x28] sm:$0xff]  ;;  %vm1603_vm1 = vcmask 1041408   ;;  %vm1331_vm2 = vcmask 211968  }
  0x9f   : > { %1492 = vmatpush.msra.mxu0 %v1353_v3  ;;  %s3710_s7 = smov 52   ;;  %v1346_v11 = vld [vmem:[%s3752_s25 + $0x20] sm:$0xff]  ;;  %v1345_v12 = vld [vmem:[%s3752_s25 + $0x18] sm:$0xff]  ;;  %v1344_v13 = vld [vmem:[%s3752_s25 + $0x10] sm:$0xff]  ;;  %vm1333_vm3 = vcmask 424960   ;;  %vm1335_vm4 = vcmask 637952  }
  0xa0   : > { %s3282_s18 = sshll.u32 %s1305_s15, 5  ;;  %v1343_v14 = vld [vmem:[%s3752_s25 + $0x8] sm:$0xff]  ;;  %v1342_v15 = vld [vmem:[%s3752_s25] sm:$0xff]  ;;  %v1341_v18 = vld [vmem:[%s3747_s21 + $0x18] sm:$0x3]  ;;  %vm1484_vm5 = vcmask 850944  }
  0xa1   : > { %1493 = vmatpush.msra.mxu0 %v1352_v5  ;;  %v1337_v16 = vld [vmem:[#allocation2] sm:$0x1]  ;;  %v1340_v19 = vld [vmem:[%s3747_s21 + $0x10] sm:$0xff]  ;;  %v1339_v20 = vld [vmem:[%s3747_s21 + $0x8] sm:$0xff]  ;;  %vm1601_vm6 = vcmask 1040384   ;;  %vm1605_vm7 = vcmask 1042432  }
  0xa2   : > { %s4048_s2 = scalar_lea.vmem %s4565_s5, %s3282_s18  ;;  %v1338_v27 = vld [vmem:[%s3747_s21] sm:$0xff]  ;;  %s4566_s3 = sld [smem:[#allocation13_spill]]  ;;  %vm1679_vm11 = vcmask 1043456   ;;  %vm1675_vm13 = vcmask 31744   ;;  %vm1703_vm14 = vcmask 27648  }
  0xa3   : > { %v4051_v0 = vld [vmem:[%s4048_s2 + $0x8] sm:$0xff]  ;;  %v4054_v1 = vld [vmem:[%s4048_s2 + $0x18] sm:$0xff]  ;;  %v4063_v4 = vld [vmem:[%s4048_s2 + $0x10] sm:$0xff]  ;;  %1494 = vmatpush.msra.mxu0 %v1351_v6  ;;  %s4520_s23 = smov 126   ;;  %s3712_s1 = smov 127  }
  0xa4   : > { %1320 = vrot.lane.b32.xlu0 %v4051_v0, %s3708_s11  ;;  %1328 = vrot.lane.b32.xlu1 %v4054_v1, %s3709_s22  ;;  %v4082_v17 = vld [vmem:[%s4048_s2] sm:$0xff]  ;;  %s4510_s28 = smov 125  }
  0xa5   : > { %1547 = vmatpush.msra.mxu2 %v4051_v0  ;;  %1567 = vmatpush.msra.mxu3 %v4063_v4  ;;  %v1355_v40 = vld [vmem:[%s3757_s29] sm:$0xf] }
  0xa6   : > { %1587 = vmatpush.msra.mxu1 %v4054_v1  ;;  %1495 = vmatpush.msra.mxu0 %v1350_v7 }
  0xa7   : > { %3231 = vmatmul.msk.f32.vlgmr.msra.gmra.mxu2 %vm1508_vm0, %v1337_v16  ;;  %3232 = vmatmul.msk.f32.vlgmr.msra.gmra.mxu3 %vm1508_vm0, %v1337_v16 }
  0xa8   : > { %1496 = vmatpush.msra.mxu0 %v1349_v8  ;;  %3233 = vmatmul.msk.f32.vlgmr.msra.gmra.mxu1 %vm1508_vm0, %v1337_v16  ;;  %v1356_v55 = vld [vmem:[%s4566_s3] sm:$0xf] }
  0xa9   : > { %3234 = vmatpush.msk.msrb.mxu3 %vm1603_vm1, %v1341_v18 }
  0xaa   : > { %1497 = vmatpush.msra.mxu0 %v1348_v9 }
  0xab   : > { %1626 = vmatpush.msrb.mxu3 %v1340_v19 }
  0xac   : > { %1324 = vrot.lane.b32.xlu0 %v4063_v4, %s3710_s7  ;;  %1498 = vmatpush.msra.mxu0 %v1347_v10 }
  0xad   : > { %1627 = vmatpush.msrb.mxu3 %v1339_v20 }
  0xae   : > { %1499 = vmatpush.msra.mxu0 %v1346_v11 }
  0xaf   : > { %1628 = vmatpush.msrb.mxu3 %v1338_v27 }
  0xb0   : > { %1500 = vmatpush.msra.mxu0 %v1345_v12 }
  0xb2   : > { %1501 = vmatpush.msra.mxu0 %v1344_v13 }
  0xb4   : > { %1502 = vmatpush.msra.mxu0 %v1343_v14 }
  0xb6   : > { %1503 = vmatpush.msra.mxu0 %v1342_v15 }
  0xb8   : > { %1527 = vmatpush.msrb.mxu0 %v4082_v17 }
 0x116   : > { %v1321_v21 = vpop.permute.xlu0 %1320  ;;  %v1329_v22 = vpop.permute.xlu1 %1328 }
 0x117   : > { %v1332_v23 = vsel %vm1331_vm2, %v4082_v17, %v1321_v21 }
 0x11e   : > { %v1325_v24 = vpop.permute.xlu0 %1324 }
 0x11f   : > { %v1334_v25 = vsel %vm1333_vm3, %v1332_v23, %v1325_v24 }
 0x120   : > { %v4096_v26 = vsel %vm1335_vm4, %v1334_v25, %v1329_v22 }
 0x121   : > { %3229 = vmatmul.msk.f32.vlgmr.msra.gmra.mxu0 %vm1484_vm5, %v4096_v26 }
 0x125   : > { %v1589_v31 = vpop.f32.mrf.mxu1 }
 0x126   : > { %v1599_v34 = vrot.slane %v1589_v31, 5 }
 0x129   : > { %3230 = vmatmul.msk.f32.vlgmr.msrb.gmra.mxu0 %vm1508_vm0, %v1337_v16 }
 0x12a   : > { %v1549_v29 = vpop.f32.mrf.mxu2  ;;  %v1569_v30 = vpop.f32.mrf.mxu3 }
 0x12b   : > { %v1593_v32 = vrot.slane %v1549_v29, 7  ;;  %v1596_v33 = vrot.slane %v1569_v30, 6 }
 0x19e   : > { %v1505_v28 = vpop.f32.mrf.mxu0 }
 0x19f   : > { %1651 = vmatpush.msra.mxu3 %v1505_v28 }
 0x1a6   : > { %v1529_v35 = vpop.f32.mrf.mxu0 }
 0x1a7   : > { %v1602_v36 = vsel %vm1601_vm6, %v1529_v35, %v1593_v32 }
 0x1a8   : > { %v1604_v37 = vsel %vm1603_vm1, %v1602_v36, %v1596_v33 }
 0x1a9   : > { %v1606_v38 = vsel %vm1605_vm7, %v1604_v37, %v1599_v34 }
 0x1aa   : > { %3235 = vmatmul.msk.f32.vlgmr.msrb.gmra.mxu3 %vm1331_vm2, %v1606_v38 }
 0x22d   : > { %v1630_v39 = vpop.f32.mrf.mxu3 }
 0x22e   : > { %3236 = vmatmul.msk.f32.vlgmr.msra.gmra.mxu3 %vm1508_vm0, %v1630_v39 }
 0x2b1   : > { %v1653_v41 = vpop.f32.mrf.mxu3 }
 0x2b2   : > { %v1654_v42 = vadd.f32 %v1653_v41, %v1355_v40 }
 0x2b4   : > { %v3237_v43 = vmul.f32 -1.442695, %v1654_v42 }
 0x2b6   : > { %3479 = vpow2.f32 %v3237_v43 }
 0x2bc   : > { %v3480_v44 = vpop.eup %3479 }
 0x2bd   : > { %v1659_v45 = vadd.f32 1.0, %v3480_v44 }
 0x2bf   : > { %3481 = vrcp.f32 %v1659_v45  ;;  %v1671_v49 = vand.u32 2147483648, %v1659_v45  ;;  %v1669_v51 = vand.u32 2147483647, %v1659_v45  ;;  %vm1665_vm9 = vweird.f32 %v1659_v45 }
 0x2c1   : > { %v1672_v53 = vor.u32 1.1754944e-38, %v1671_v49  ;;  %vm1670_vm12 = vcmp.eq.f32.partialorder %v1669_v51, 8.507059e+37 }
 0x2c5   : > { %v3482_v46 = vpop.eup %3481 }
 0x2c6   : > { %v1661_v47 = vmul.f32 %v3482_v46, %v1659_v45  ;;  %vm1666_vm8 = vweird.f32 %v3482_v46 }
 0x2c7   : > { %vm1667_vm10 = vmor %vm1665_vm9, %vm1666_vm8 }
 0x2c8   : > { %v1662_v48 = vsub.f32 1.0, %v1661_v47 }
 0x2ca   : > { %v1663_v50 = vmul.f32 %v3482_v46, %v1662_v48 }
 0x2cc   : > { %v1664_v52 = vadd.f32 %v3482_v46, %v1663_v50 }
 0x2ce   : > { %v1668_v54 = vsel %vm1667_vm10, %v3482_v46, %v1664_v52 }
 0x2cf   : > { %v1673_v56 = vsel %vm1670_vm12, %v1672_v53, %v1668_v54 }
 0x2d0   : > { %3238 = vmatpush.msk.msrb.mxu1 %vm1679_vm11, %v1673_v56 }
 0x2d1   : > { %3239 = vmatmul.msk.f32.vlgmr.msrb.gmra.mxu1 %vm1675_vm13, %v1356_v55 }
 0x34e   : > { %v1700_v57 = vpop.f32.mrf.mxu1 }
 0x34f   : > { %v1704_v58 = vsel %vm1703_vm14, %v1700_v57, -inf }
 0x350   : > { %1705 = vmax.xlane.f32.xlu1 %v1704_v58 }
 0x3c3   : > { %v1706_v59 = vpop.xlane.xlu1 %1705 }
 0x3c4   : > { %v1707_v60 = vsub.f32 %v1700_v57, %v1706_v59 }
 0x3c6   : > { %v1708_v61 = vmul.f32 1.442695, %v1707_v60 }
 0x3c8   : > { %3483 = vpow2.f32 %v1708_v61 }
 0x3ce   : > { %v3484_v62 = vpop.eup %3483 }
 0x3cf   : > { %v1710_v63 = vsel %vm1703_vm14, %v3484_v62, 0.0 }
 0x3d0   : > { %1711 = vadd.xlane.f32.xlu2 %v1710_v63 }
 0x443   : > { %v1712_v2 = vpop.xlane.xlu2 %1711 }
 0x444   : > { %3485 = vrcp.f32 %v1712_v2  ;;  %v1724_v7 = vand.u32 2147483648, %v1712_v2  ;;  %v1722_v9 = vand.u32 2147483647, %v1712_v2  ;;  %vm1718_vm8 = vweird.f32 %v1712_v2 }
 0x446   : > { %v1725_v11 = vor.u32 1.1754944e-38, %v1724_v7  ;;  %vm1723_vm10 = vcmp.eq.f32.partialorder %v1722_v9, 8.507059e+37 }
 0x44a   : > { %v3486_v3 = vpop.eup %3485 }
 0x44b   : > { %v1714_v5 = vmul.f32 %v3486_v3, %v1712_v2  ;;  %vm1719_vm15 = vweird.f32 %v3486_v3 }
 0x44c   : > { %vm1720_vm9 = vmor %vm1718_vm8, %vm1719_vm15 }
 0x44d   : > { %v1715_v6 = vsub.f32 1.0, %v1714_v5 }
 0x44f   : > { %v1716_v8 = vmul.f32 %v3486_v3, %v1715_v6 }
 0x451   : > { %v1717_v10 = vadd.f32 %v3486_v3, %v1716_v8 }
 0x453   : > { %v1721_v12 = vsel %vm1720_vm9, %v3486_v3, %v1717_v10 }
 0x454   : > { %v1726_v13 = vsel %vm1723_vm10, %v1725_v11, %v1721_v12 }
 0x455   : > { %v1727_v14 = vmul.f32 %v3484_v62, %v1726_v13 }
 0x457   : > { %1740 = vrot.lane.b32.xlu0 %v1727_v14, %s4520_s23  ;;  %1733 = vrot.lane.b32.xlu2 %v1727_v14, %s3712_s1  ;;  %3283 = vpush %v1727_v14  ;;  %v1806_v15 = vrot.slane %v1727_v14, 3  ;;  %v1754_v16 = vrot.slane %v1727_v14, 1  ;;  %v1780_v18 = vrot.slane %v1727_v14, 2 }
 0x459   : > { %1811 = vrot.lane.b32.xlu1 %v1806_v15, %s3712_s1 }
 0x45f   : > { %1747 = vrot.lane.b32.xlu0 %v1727_v14, %s4510_s28  ;;  %1766 = vrot.lane.b32.xlu2 %v1754_v16, %s4520_s23  ;;  %v1368_v14 = vld [vmem:[%s3767_s8 + $0x58] sm:$0xff] }
 0x467   : > { %1785 = vrot.lane.b32.xlu2 %v1780_v18, %s3712_s1  ;;  %1759 = vrot.lane.b32.xlu0 %v1754_v16, %s3712_s1 }
 0x46f   : > { %1799 = vrot.lane.b32.xlu2 %v1780_v18, %s4510_s28  ;;  %1773 = vrot.lane.b32.xlu0 %v1754_v16, %s4510_s28 }
 0x477   : > { %1825 = vrot.lane.b32.xlu2 %v1806_v15, %s4510_s28  ;;  %1792 = vrot.lane.b32.xlu0 %v1780_v18, %s4520_s23 }
 0x47f   : > { %1818 = vrot.lane.b32.xlu0 %v1806_v15, %s4520_s23 }
 0x488   : > { %s3284_s10 = spop %3283 }
 0x489   : > { %v1730_v33 = vstv %s3284_s10 }
 0x48a   : > { %v1732_v35 = vmul.f32 %v1730_v33, %v4082_v17  ;;  %v1310_v33 = vld [vmem:[%s3737_s13] sm:$0xff] }
 0x4b1   : > { %v1734_v19 = vpop.permute.xlu2 %1733 }
 0x4b2   : > { %3285 = vpush %v1734_v19  ;;  %v1362_v19 = vld [vmem:[%s3767_s8 + $0x28] sm:$0xff] }
 0x4b9   : > { %v1767_v22 = vpop.permute.xlu2 %1766 }
 0x4c1   : > { %v1786_v24 = vpop.permute.xlu2 %1785 }
 0x4c9   : > { %v1741_v20 = vpop.permute.xlu0 %1740  ;;  %v1800_v27 = vpop.permute.xlu2 %1799 }
 0x4ca   : > { %3287 = vpush %v1741_v20  ;;  %v1361_v20 = vld [vmem:[%s3767_s8 + $0x20] sm:$0xff] }
 0x4cb   : > { %v1812_v29 = vpop.permute.xlu1 %1811 }
 0x4d1   : > { %v1748_v21 = vpop.permute.xlu0 %1747  ;;  %v1826_v31 = vpop.permute.xlu2 %1825 }
 0x4d2   : > { %3289 = vpush %v1748_v21  ;;  %v1360_v21 = vld [vmem:[%s3767_s8 + $0x18] sm:$0xff] }
 0x4d3   : > { %3291 = vpush %v1754_v16  ;;  %v1365_v16 = vld [vmem:[%s3767_s8 + $0x40] sm:$0xff] }
 0x4d9   : > { %v1760_v23 = vpop.permute.xlu0 %1759 }
 0x4da   : > { %3293 = vpush %v1760_v23  ;;  %v1358_v23 = vld [vmem:[%s3767_s8 + $0x8] sm:$0xff] }
 0x4db   : > { %3295 = vpush %v1767_v22  ;;  %v1359_v22 = vld [vmem:[%s3767_s8 + $0x10] sm:$0xff] }
 0x4e1   : > { %v1774_v25 = vpop.permute.xlu0 %1773 }
 0x4e2   : > { %3297 = vpush %v1774_v25 }
 0x4e3   : > { %3299 = vpush %v1780_v18  ;;  %s3286_s26 = spop %3285  ;;  %v1364_v18 = vld [vmem:[%s3767_s8 + $0x38] sm:$0xff] }
 0x4e4   : > { %3301 = vpush %v1786_v24  ;;  %v1736_v32 = vstv %s3286_s26  ;;  %v1357_v24 = vld [vmem:[%s3767_s8] sm:$0xff] }
 0x4e5   : > { %v1738_v34 = vmul.f32 %v4051_v0, %v1736_v32 }
 0x4e7   : > { %v1739_v37 = vadd.f32 %v1738_v34, %v1732_v35  ;;  %v1421_v35 = vld [vmem:[%s3787_s30 + $0x60] sm:$0xff] }
 0x4e9   : > { %v1793_v28 = vpop.permute.xlu0 %1792 }
 0x4ea   : > { %3303 = vpush %v1793_v28 }
 0x4eb   : > { %3305 = vpush %v1800_v27 }
 0x4ec   : > { %3307 = vpush %v1806_v15  ;;  %v1367_v15 = vld [vmem:[%s3767_s8 + $0x50] sm:$0xff] }
 0x4ed   : > { %3309 = vpush %v1812_v29 }
 0x4f1   : > { %v1819_v30 = vpop.permute.xlu0 %1818 }
 0x4f2   : > { %3311 = vpush %v1819_v30 }
 0x4f3   : > { %3313 = vpush %v1826_v31  ;;  %v1309_v31 = vld [vmem:[%s3732_s9] sm:$0xff] }
 0x4fb   : > { %s3288_s15 = spop %3287 }
 0x4fc   : > { %v1743_v36 = vstv %s3288_s15 }
 0x4fd   : > { %v1745_v38 = vmul.f32 %v4063_v4, %v1743_v36  ;;  %v1420_v36 = vld [vmem:[%s3787_s30 + $0x58] sm:$0xff] }
 0x4ff   : > { %v1746_v39 = vadd.f32 %v1745_v38, %v1739_v37  ;;  %v1419_v37 = vld [vmem:[%s3787_s30 + $0x50] sm:$0xff] }
 0x503   : > { %s3290_s18 = spop %3289 }
 0x504   : > { %v1750_v40 = vstv %s3290_s18  ;;  %s3292_s2 = spop %3291 }
 0x505   : > { %v1752_v41 = vmul.f32 %v4054_v1, %v1750_v40  ;;  %v1756_v43 = vstv %s3292_s2  ;;  %v1418_v40 = vld [vmem:[%s3787_s30 + $0x48] sm:$0xff] }
 0x506   : > { %v1758_v46 = vmul.f32 %v1756_v43, %v4082_v17  ;;  %v1380_v43 = vld [vmem:[%s3772_s14 + $0x50] sm:$0xff] }
 0x507   : > { %v4129_v42 = vadd.f32 %v1752_v41, %v1746_v39  ;;  %v1382_v39 = vld [vmem:[%s3772_s14 + $0x60] sm:$0xff]  ;;  %v1381_v41 = vld [vmem:[%s3772_s14 + $0x58] sm:$0xff] }
 0x50b   : > { %s3294_s28 = spop %3293 }
 0x50c   : > { %v1762_v44 = vstv %s3294_s28  ;;  %s3296_s10 = spop %3295 }
 0x50d   : > { %v1764_v45 = vmul.f32 %v4051_v0, %v1762_v44  ;;  %v1769_v47 = vstv %s3296_s10  ;;  %v1416_v44 = vld [vmem:[%s3787_s30 + $0x38] sm:$0xff] }
 0x50e   : > { %v1771_v49 = vmul.f32 %v4063_v4, %v1769_v47  ;;  %v1378_v47 = vld [vmem:[%s3772_s14 + $0x40] sm:$0xff] }
 0x50f   : > { %v1765_v48 = vadd.f32 %v1764_v45, %v1758_v46  ;;  %v1379_v45 = vld [vmem:[%s3772_s14 + $0x48] sm:$0xff]  ;;  %v1415_v46 = vld [vmem:[%s3787_s30 + $0x30] sm:$0xff] }
 0x511   : > { %v1772_v51 = vadd.f32 %v1771_v49, %v1765_v48  ;;  %v1414_v48 = vld [vmem:[%s3787_s30 + $0x28] sm:$0xff]  ;;  %v1377_v49 = vld [vmem:[%s3772_s14 + $0x38] sm:$0xff] }
 0x513   : > { %s3298_s26 = spop %3297 }
 0x514   : > { %v1776_v50 = vstv %s3298_s26  ;;  %s3300_s15 = spop %3299 }
 0x515   : > { %v1778_v52 = vmul.f32 %v4054_v1, %v1776_v50  ;;  %s3302_s18 = spop %3301  ;;  %v1782_v53 = vstv %s3300_s15  ;;  %v1413_v50 = vld [vmem:[%s3787_s30 + $0x20] sm:$0xff] }
 0x516   : > { %v1788_v54 = vstv %s3302_s18  ;;  %v1784_v56 = vmul.f32 %v1782_v53, %v4082_v17  ;;  %v1375_v53 = vld [vmem:[%s3772_s14 + $0x28] sm:$0xff]  ;;  %s4569_s18 = sld [smem:[#allocation19_spill]] }
 0x517   : > { %v1779_v55 = vadd.f32 %v1778_v52, %v1772_v51  ;;  %v1790_v57 = vmul.f32 %v4051_v0, %v1788_v54  ;;  %v1376_v51 = vld [vmem:[%s3772_s14 + $0x30] sm:$0xff]  ;;  %v1412_v52 = vld [vmem:[%s3787_s30 + $0x18] sm:$0xff] }
 0x518   : > { %v1411_v54 = vld [vmem:[%s3787_s30 + $0x10] sm:$0xff] }
 0x519   : > { %1833 = vrot.lane.b32.xlu0 %v1779_v55, %s3708_s11  ;;  %v1791_v59 = vadd.f32 %v1790_v57, %v1784_v56  ;;  %v1374_v55 = vld [vmem:[%s3772_s14 + $0x20] sm:$0xff]  ;;  %v1410_v56 = vld [vmem:[%s3787_s30 + $0x8] sm:$0xff]  ;;  %v1373_v57 = vld [vmem:[%s3772_s14 + $0x18] sm:$0xff] }
 0x51b   : > { %s3304_s28 = spop %3303 }
 0x51c   : > { %v1795_v58 = vstv %s3304_s28  ;;  %s3306_s2 = spop %3305  ;;  %s4570_s28 = smov %s4569_s18 }
 0x51d   : > { %v1797_v60 = vmul.f32 %v4063_v4, %v1795_v58  ;;  %v1802_v61 = vstv %s3306_s2  ;;  %s3308_s10 = spop %3307  ;;  %v1409_v58 = vld [vmem:[%s3787_s30] sm:$0xff]  ;;  %s4571_s2 = sld [smem:[#allocation17_spill]] }
 0x51e   : > { %v1808_v62 = vstv %s3308_s10  ;;  %s3310_s26 = spop %3309  ;;  %v1804_v2 = vmul.f32 %v4054_v1, %v1802_v61  ;;  %v1370_v61 = vld [vmem:[%s3772_s14] sm:$0xff]  ;;  %s4572_s10 = sld [smem:[#allocation16_spill]] }
 0x51f   : > { %v1798_v63 = vadd.f32 %v1797_v60, %v1791_v59  ;;  %v1814_v3 = vstv %s3310_s26  ;;  %v1810_v6 = vmul.f32 %v1808_v62, %v4082_v17  ;;  %v1372_v59 = vld [vmem:[%s3772_s14 + $0x10] sm:$0xff]  ;;  %v1371_v60 = vld [vmem:[%s3772_s14 + $0x8] sm:$0xff]  ;;  %v1408_v62 = vld [vmem:[%s3782_s24 + $0x60] sm:$0xff]  ;;  %s4573_s26 = sld [smem:[#allocation18_spill]] }
 0x520   : > { %v1816_v7 = vmul.f32 %v4051_v0, %v1814_v3  ;;  %v1369_v0 = vld [vmem:[%s3767_s8 + $0x60] sm:$0xff]  ;;  %v1405_v3 = vld [vmem:[%s3782_s24 + $0x48] sm:$0xff] }
 0x521   : > { %v1805_v5 = vadd.f32 %v1804_v2, %v1798_v63  ;;  %1966 = vmatpush.msra.mxu0 %v1369_v0  ;;  %v1407_v63 = vld [vmem:[%s3782_s24 + $0x58] sm:$0xff]  ;;  %v1406_v2 = vld [vmem:[%s3782_s24 + $0x50] sm:$0xff] }
 0x522   : > { %v1817_v9 = vadd.f32 %v1816_v7, %v1810_v6  ;;  %v1403_v6 = vld [vmem:[%s3782_s24 + $0x38] sm:$0xff]  ;;  %v1402_v7 = vld [vmem:[%s3782_s24 + $0x30] sm:$0xff] }
 0x523   : > { %s3312_s11 = spop %3311  ;;  %1837 = vrot.lane.b32.xlu2 %v1805_v5, %s3710_s7  ;;  %1967 = vmatpush.msra.mxu0 %v1368_v14  ;;  %v1404_v5 = vld [vmem:[%s3782_s24 + $0x40] sm:$0xff] }
 0x524   : > { %v1821_v8 = vstv %s3312_s11  ;;  %s3314_s15 = spop %3313  ;;  %s4574_s11 = sld [smem:[#allocation24_spill]] }
 0x525   : > { %v1823_v10 = vmul.f32 %v4063_v4, %v1821_v8  ;;  %v1828_v11 = vstv %s3314_s15  ;;  %1968 = vmatpush.msra.mxu0 %v1367_v15  ;;  %v1366_v4 = vld [vmem:[%s3767_s8 + $0x48] sm:$0xff]  ;;  %v1396_v15 = vld [vmem:[%s3782_s24] sm:$0xff]  ;;  %s4575_s15 = sld [smem:[#allocation20_spill]] }
 0x526   : > { %v1830_v13 = vmul.f32 %v4054_v1, %v1828_v11  ;;  %v1363_v1 = vld [vmem:[%s3767_s8 + $0x30] sm:$0xff]  ;;  %v1401_v8 = vld [vmem:[%s3782_s24 + $0x28] sm:$0xff] }
 0x527   : > { %v1824_v12 = vadd.f32 %v1823_v10, %v1817_v9  ;;  %1969 = vmatpush.msra.mxu0 %v1366_v4  ;;  %v1400_v9 = vld [vmem:[%s3782_s24 + $0x20] sm:$0xff]  ;;  %v1399_v10 = vld [vmem:[%s3782_s24 + $0x18] sm:$0xff]  ;;  %v1398_v11 = vld [vmem:[%s3782_s24 + $0x10] sm:$0xff] }
 0x528   : > { %v1432_v4 = vld [vmem:[%s4551_s6 + $0x50] sm:$0xff] }
 0x529   : > { %v1831_v17 = vadd.f32 %v1830_v13, %v1824_v12  ;;  %1970 = vmatpush.msra.mxu0 %v1365_v16  ;;  %v1397_v12 = vld [vmem:[%s3782_s24 + $0x8] sm:$0xff]  ;;  %v1434_v13 = vld [vmem:[%s4551_s6 + $0x60] sm:$0xff] }
 0x52b   : > { %1841 = vrot.lane.b32.xlu0 %v1831_v17, %s3709_s22  ;;  %1971 = vmatpush.msra.mxu0 %v1364_v18  ;;  %s4567_s22 = sld [smem:[#allocation14_spill]]  ;;  %v1433_v17 = vld [vmem:[%s4551_s6 + $0x58] sm:$0xff]  ;;  %v1480_v18 = vld [vmem:[%s4569_s18 + $0x60] sm:$0xff] }
 0x52c   : > { %s4577_s18 = sld [smem:[#allocation22_spill]] }
 0x52d   : > { %1972 = vmatpush.msra.mxu0 %v1363_v1  ;;  %v1431_v1 = vld [vmem:[%s4551_s6 + $0x48] sm:$0xff] }
 0x52f   : > { %1973 = vmatpush.msra.mxu0 %v1362_v19 }
 0x531   : > { %1974 = vmatpush.msra.mxu0 %v1361_v20  ;;  %s4568_s7 = smov %s4567_s22  ;;  %v1395_v0 = vld [vmem:[%s4567_s22 + $0x60] sm:$0xff]  ;;  %v1479_v20 = vld [vmem:[%s4570_s28 + $0x58] sm:$0xff]  ;;  %s4576_s22 = sld [smem:[#allocation21_spill]] }
 0x532   : > { %v1394_v14 = vld [vmem:[%s4568_s7 + $0x58] sm:$0xff]  ;;  %v1393_v16 = vld [vmem:[%s4568_s7 + $0x50] sm:$0xff]  ;;  %v1392_v19 = vld [vmem:[%s4568_s7 + $0x48] sm:$0xff] }
 0x533   : > { %1975 = vmatpush.msra.mxu0 %v1360_v21  ;;  %v1430_v21 = vld [vmem:[%s4551_s6 + $0x40] sm:$0xff] }
 0x535   : > { %1976 = vmatpush.msra.mxu0 %v1359_v22  ;;  %v1391_v22 = vld [vmem:[%s4568_s7 + $0x40] sm:$0xff] }
 0x537   : > { %1977 = vmatpush.msra.mxu0 %v1358_v23  ;;  %v1478_v23 = vld [vmem:[%s4570_s28 + $0x50] sm:$0xff] }
 0x539   : > { %1978 = vmatpush.msra.mxu0 %v1357_v24  ;;  %v1429_v24 = vld [vmem:[%s4551_s6 + $0x38] sm:$0xff] }
 0x53b   : > { %2057 = vmatpush.msrb.mxu0 %v1434_v13  ;;  %v1457_v13 = vld [vmem:[%s4571_s2 + $0x30] sm:$0xff] }
 0x53d   : > { %2058 = vmatpush.msrb.mxu0 %v1433_v17  ;;  %v1441_v17 = vld [vmem:[%s4572_s10 + $0x30] sm:$0xff] }
 0x53f   : > { %2059 = vmatpush.msrb.mxu0 %v1432_v4  ;;  %v1440_v4 = vld [vmem:[%s4572_s10 + $0x28] sm:$0xff] }
 0x541   : > { %2060 = vmatpush.msrb.mxu0 %v1431_v1  ;;  %v1452_v1 = vld [vmem:[%s4571_s2 + $0x8] sm:$0xff] }
 0x543   : > { %2061 = vmatpush.msrb.mxu0 %v1430_v21  ;;  %v1437_v21 = vld [vmem:[%s4572_s10 + $0x10] sm:$0xff] }
 0x545   : > { %2062 = vmatpush.msrb.mxu0 %v1429_v24 }
 0x57d   : > { %v1838_v28 = vpop.permute.xlu2 %1837 }
 0x58b   : > { %v1834_v25 = vpop.permute.xlu0 %1833 }
 0x58c   : > { %v1844_v27 = vsel %vm1331_vm2, %v4129_v42, %v1834_v25  ;;  %v1417_v42 = vld [vmem:[%s3787_s30 + $0x40] sm:$0xff]  ;;  %v1390_v25 = vld [vmem:[%s4568_s7 + $0x38] sm:$0xff] }
 0x58d   : > { %v1845_v30 = vsel %vm1333_vm3, %v1844_v27, %v1838_v28  ;;  %v1477_v27 = vld [vmem:[%s4570_s28 + $0x48] sm:$0xff]  ;;  %v1428_v28 = vld [vmem:[%s4551_s6 + $0x30] sm:$0xff] }
 0x58e   : > { %2063 = vmatpush.msrb.mxu0 %v1428_v28 }
 0x59d   : > { %v1842_v29 = vpop.permute.xlu0 %1841 }
 0x59e   : > { %v4164_v32 = vsel %vm1335_vm4, %v1845_v30, %v1842_v29  ;;  %v1389_v29 = vld [vmem:[%s4568_s7 + $0x30] sm:$0xff]  ;;  %v1476_v30 = vld [vmem:[%s4570_s28 + $0x40] sm:$0xff] }
 0x59f   : > { %1865 = vmatpush.msrb.mxu2 %v4164_v32  ;;  %1910 = vmatpush.msra.mxu1 %v4164_v32 }
 0x5a0   : > { %3245 = vmatmul.msk.f32.vlgmr.msra.gmra.mxu0 %vm1484_vm5, %v4164_v32  ;;  %3240 = vmatmul.msk.f32.vlgmr.msrb.gmra.mxu2 %vm1508_vm0, %v1309_v31 }
 0x5a1   : > { %3242 = vmatmul.msk.f32.vlgmr.msra.gmra.mxu1 %vm1508_vm0, %v1310_v33 }
 0x5a2   : > { %1989 = vmatpush.msrb.mxu1 %v1395_v0  ;;  %v1456_v0 = vld [vmem:[%s4571_s2 + $0x28] sm:$0xff] }
 0x5a4   : > { %1990 = vmatpush.msrb.mxu1 %v1394_v14  ;;  %v1455_v14 = vld [vmem:[%s4571_s2 + $0x20] sm:$0xff] }
 0x5a6   : > { %1991 = vmatpush.msrb.mxu1 %v1393_v16  ;;  %v1453_v16 = vld [vmem:[%s4571_s2 + $0x10] sm:$0xff] }
 0x5a8   : > { %1992 = vmatpush.msrb.mxu1 %v1392_v19  ;;  %v1438_v19 = vld [vmem:[%s4572_s10 + $0x18] sm:$0xff] }
 0x5aa   : > { %1993 = vmatpush.msrb.mxu1 %v1391_v22  ;;  %v1436_v22 = vld [vmem:[%s4572_s10 + $0x8] sm:$0xff] }
 0x5ac   : > { %1994 = vmatpush.msrb.mxu1 %v1390_v25 }
 0x5ae   : > { %1995 = vmatpush.msrb.mxu1 %v1389_v29 }
 0x61d   : > { %v1980_v25 = vpop.f32.mrf.mxu0 }
 0x61e   : > { %v1912_v34 = vpop.f32.mrf.mxu1 }
 0x61f   : > { %1930 = vmatpush.msra.mxu2 %v1912_v34 }
 0x620   : > { %3243 = vmatmul.msk.f32.vlgmr.msra.gmra.mxu2 %vm1508_vm0, %v1310_v33  ;;  %v1475_v33 = vld [vmem:[%s4570_s28 + $0x38] sm:$0xff] }
 0x621   : > { %2014 = vmatpush.msrb.mxu2 %v1421_v35  ;;  %v1474_v35 = vld [vmem:[%s4570_s28 + $0x30] sm:$0xff] }
 0x623   : > { %2015 = vmatpush.msrb.mxu2 %v1420_v36  ;;  %v1867_v38 = vpop.f32.mrf.mxu2  ;;  %v1425_v36 = vld [vmem:[%s4551_s6 + $0x18] sm:$0xff] }
 0x624   : > { %1885 = vmatpush.msrb.mxu3 %v1867_v38 }
 0x625   : > { %2016 = vmatpush.msrb.mxu2 %v1419_v37  ;;  %3241 = vmatmul.msk.f32.vlgmr.msrb.gmra.mxu3 %vm1508_vm0, %v1309_v31  ;;  %v1427_v31 = vld [vmem:[%s4551_s6 + $0x28] sm:$0xff] }
 0x626   : > { %1943 = vmatpush.msra.mxu3 %v1382_v39  ;;  %2064 = vmatpush.msrb.mxu0 %v1427_v31  ;;  %v1473_v37 = vld [vmem:[%s4570_s28 + $0x28] sm:$0xff]  ;;  %v1471_v39 = vld [vmem:[%s4570_s28 + $0x18] sm:$0xff] }
 0x627   : > { %2017 = vmatpush.msrb.mxu2 %v1418_v40  ;;  %v1470_v40 = vld [vmem:[%s4570_s28 + $0x10] sm:$0xff] }
 0x628   : > { %1944 = vmatpush.msra.mxu3 %v1381_v41  ;;  %v1469_v41 = vld [vmem:[%s4570_s28 + $0x8] sm:$0xff] }
 0x629   : > { %2018 = vmatpush.msrb.mxu2 %v1417_v42  ;;  %v1468_v42 = vld [vmem:[%s4570_s28] sm:$0xff] }
 0x62a   : > { %1945 = vmatpush.msra.mxu3 %v1380_v43  ;;  %v1388_v43 = vld [vmem:[%s4568_s7 + $0x28] sm:$0xff] }
 0x62b   : > { %2019 = vmatpush.msrb.mxu2 %v1416_v44  ;;  %v1424_v44 = vld [vmem:[%s4551_s6 + $0x10] sm:$0xff]  ;;  %1996 = vmatpush.msrb.mxu1 %v1388_v43 }
 0x62c   : > { %1946 = vmatpush.msra.mxu3 %v1379_v45  ;;  %v1387_v45 = vld [vmem:[%s4568_s7 + $0x20] sm:$0xff] }
 0x62d   : > { %2020 = vmatpush.msrb.mxu2 %v1415_v46  ;;  %v1423_v46 = vld [vmem:[%s4551_s6 + $0x8] sm:$0xff]  ;;  %1997 = vmatpush.msrb.mxu1 %v1387_v45 }
 0x62e   : > { %1947 = vmatpush.msra.mxu3 %v1378_v47  ;;  %v1386_v47 = vld [vmem:[%s4568_s7 + $0x18] sm:$0xff] }
 0x62f   : > { %2021 = vmatpush.msrb.mxu2 %v1414_v48  ;;  %v1422_v48 = vld [vmem:[%s4551_s6] sm:$0xff]  ;;  %1998 = vmatpush.msrb.mxu1 %v1386_v47 }
 0x630   : > { %1948 = vmatpush.msra.mxu3 %v1377_v49  ;;  %v1385_v49 = vld [vmem:[%s4568_s7 + $0x10] sm:$0xff] }
 0x631   : > { %2022 = vmatpush.msrb.mxu2 %v1413_v50  ;;  %1999 = vmatpush.msrb.mxu1 %v1385_v49  ;;  %v1384_v50 = vld [vmem:[%s4568_s7 + $0x8] sm:$0xff] }
 0x632   : > { %1949 = vmatpush.msra.mxu3 %v1376_v51 }
 0x633   : > { %2023 = vmatpush.msrb.mxu2 %v1412_v52  ;;  %2000 = vmatpush.msrb.mxu1 %v1384_v50 }
 0x634   : > { %1950 = vmatpush.msra.mxu3 %v1375_v53 }
 0x635   : > { %2024 = vmatpush.msrb.mxu2 %v1411_v54 }
 0x636   : > { %1951 = vmatpush.msra.mxu3 %v1374_v55 }
 0x637   : > { %2025 = vmatpush.msrb.mxu2 %v1410_v56 }
 0x638   : > { %1952 = vmatpush.msra.mxu3 %v1373_v57  ;;  %v1466_v57 = vld [vmem:[%s4571_s2 + $0x78] sm:$0xff] }
 0x639   : > { %2026 = vmatpush.msrb.mxu2 %v1409_v58  ;;  %v1465_v58 = vld [vmem:[%s4571_s2 + $0x70] sm:$0xff] }
 0x63a   : > { %3247 = vmatmul.msk.f32.vlgmr.msrb.gmra.mxu2 %vm1484_vm5, %v1912_v34  ;;  %1953 = vmatpush.msra.mxu3 %v1372_v59  ;;  %v1426_v34 = vld [vmem:[%s4551_s6 + $0x20] sm:$0xff]  ;;  %v1450_v59 = vld [vmem:[%s4572_s10 + $0x78] sm:$0xff]  ;;  %s4582_s6 = smov 124  }
 0x63b   : > { %2065 = vmatpush.msrb.mxu0 %v1426_v34  ;;  %2100 = vmatpush.msra.mxu2 %v1466_v57 }
 0x63c   : > { %1954 = vmatpush.msra.mxu3 %v1371_v60  ;;  %v1449_v60 = vld [vmem:[%s4572_s10 + $0x70] sm:$0xff] }
 0x63d   : > { %2066 = vmatpush.msrb.mxu0 %v1425_v36  ;;  %2101 = vmatpush.msra.mxu2 %v1465_v58 }
 0x63e   : > { %1955 = vmatpush.msra.mxu3 %v1370_v61  ;;  %v1464_v61 = vld [vmem:[%s4571_s2 + $0x68] sm:$0xff] }
 0x63f   : > { %3244 = vmatmul.msk.f32.vlgmr.msra.gmra.mxu3 %vm1484_vm5, %v1867_v38  ;;  %v1472_v38 = vld [vmem:[%s4570_s28 + $0x20] sm:$0xff]  ;;  %2067 = vmatpush.msrb.mxu0 %v1424_v44 }
 0x640   : > { %2034 = vmatpush.msrb.mxu3 %v1408_v62  ;;  %v1448_v62 = vld [vmem:[%s4572_s10 + $0x68] sm:$0xff]  ;;  %2102 = vmatpush.msra.mxu2 %v1464_v61 }
 0x641   : > { %2068 = vmatpush.msrb.mxu0 %v1423_v46 }
 0x642   : > { %2035 = vmatpush.msrb.mxu3 %v1407_v63  ;;  %v1463_v63 = vld [vmem:[%s4571_s2 + $0x60] sm:$0xff] }
 0x643   : > { %2069 = vmatpush.msrb.mxu0 %v1422_v48  ;;  %2103 = vmatpush.msra.mxu2 %v1463_v63  ;;  %v3473_v63 = vld [vmem:[%s4576_s22] ss:$0 sm:$0xff]  ;;  %s4579_s22 = sld [smem:[#allocation25_spill]] }
 0x644   : > { %2036 = vmatpush.msrb.mxu3 %v1406_v2  ;;  %v1462_v2 = vld [vmem:[%s4571_s2 + $0x58] sm:$0xff] }
 0x645   : > { %2104 = vmatpush.msra.mxu2 %v1462_v2 }
 0x646   : > { %2037 = vmatpush.msrb.mxu3 %v1405_v3  ;;  %v1446_v3 = vld [vmem:[%s4572_s10 + $0x58] sm:$0xff] }
 0x648   : > { %2038 = vmatpush.msrb.mxu3 %v1404_v5  ;;  %v1461_v5 = vld [vmem:[%s4571_s2 + $0x50] sm:$0xff] }
 0x649   : > { %2105 = vmatpush.msra.mxu2 %v1461_v5 }
 0x64a   : > { %2039 = vmatpush.msrb.mxu3 %v1403_v6  ;;  %v1445_v6 = vld [vmem:[%s4572_s10 + $0x50] sm:$0xff] }
 0x64c   : > { %2040 = vmatpush.msrb.mxu3 %v1402_v7  ;;  %v1460_v7 = vld [vmem:[%s4571_s2 + $0x48] sm:$0xff] }
 0x64d   : > { %2106 = vmatpush.msra.mxu2 %v1460_v7 }
 0x64e   : > { %2041 = vmatpush.msrb.mxu3 %v1401_v8  ;;  %v1444_v8 = vld [vmem:[%s4572_s10 + $0x48] sm:$0xff] }
 0x650   : > { %2042 = vmatpush.msrb.mxu3 %v1400_v9  ;;  %v1459_v9 = vld [vmem:[%s4571_s2 + $0x40] sm:$0xff] }
 0x651   : > { %2107 = vmatpush.msra.mxu2 %v1459_v9 }
 0x652   : > { %2043 = vmatpush.msrb.mxu3 %v1399_v10  ;;  %v1443_v10 = vld [vmem:[%s4572_s10 + $0x40] sm:$0xff] }
 0x654   : > { %2044 = vmatpush.msrb.mxu3 %v1398_v11  ;;  %v1458_v11 = vld [vmem:[%s4571_s2 + $0x38] sm:$0xff] }
 0x655   : > { %2108 = vmatpush.msra.mxu2 %v1458_v11 }
 0x656   : > { %2045 = vmatpush.msrb.mxu3 %v1397_v12  ;;  %v1442_v12 = vld [vmem:[%s4572_s10 + $0x38] sm:$0xff] }
 0x657   : > { %2109 = vmatpush.msra.mxu2 %v1457_v13 }
 0x658   : > { %2046 = vmatpush.msrb.mxu3 %v1396_v15  ;;  %v1454_v15 = vld [vmem:[%s4571_s2 + $0x18] sm:$0xff] }
 0x659   : > { %3248 = vmatmul.msk.f32.vlgmr.msrb.gmra.mxu3 %vm1484_vm5, %v4164_v32  ;;  %2110 = vmatpush.msra.mxu2 %v1456_v0 }
 0x65a   : > { %2127 = vmatpush.msra.mxu3 %v1480_v18  ;;  %v1439_v18 = vld [vmem:[%s4572_s10 + $0x20] sm:$0xff] }
 0x65b   : > { %2111 = vmatpush.msra.mxu2 %v1455_v14 }
 0x65c   : > { %2128 = vmatpush.msra.mxu3 %v1479_v20  ;;  %v1451_v20 = vld [vmem:[%s4571_s2] sm:$0xff] }
 0x65d   : > { %2112 = vmatpush.msra.mxu2 %v1454_v15 }
 0x65e   : > { %2129 = vmatpush.msra.mxu3 %v1478_v23  ;;  %v1435_v23 = vld [vmem:[%s4572_s10] sm:$0xff] }
 0x65f   : > { %2113 = vmatpush.msra.mxu2 %v1453_v16 }
 0x660   : > { %2130 = vmatpush.msra.mxu3 %v1477_v27 }
 0x661   : > { %2114 = vmatpush.msra.mxu2 %v1452_v1  ;;  %v2216_v1 = vld [vmem:[%s4579_s22] sm:$0xf] }
 0x662   : > { %2131 = vmatpush.msra.mxu3 %v1476_v30 }
 0x663   : > { %2115 = vmatpush.msra.mxu2 %v1451_v20 }
 0x664   : > { %2132 = vmatpush.msra.mxu3 %v1475_v33 }
 0x666   : > { %2133 = vmatpush.msra.mxu3 %v1474_v35 }
 0x668   : > { %2134 = vmatpush.msra.mxu3 %v1473_v37 }
 0x66a   : > { %2135 = vmatpush.msra.mxu3 %v1472_v38  ;;  %v4296_v38 = vld [vmem:[%s3922_s20] sm:$0xff] }
 0x66b   : > { %2164 = vmatpush.msra.mxu0 %v4296_v38 }
 0x66c   : > { %2136 = vmatpush.msra.mxu3 %v1471_v39  ;;  %v3471_v39 = vld [vmem:[%s4573_s26] ss:$0 sm:$0xff]  ;;  %s4512_s26 = smov 122  }
 0x66e   : > { %2137 = vmatpush.msra.mxu3 %v1470_v40  ;;  %v3470_v40 = vld [vmem:[#allocation5] ss:$0 sm:$0xff] }
 0x670   : > { %2138 = vmatpush.msra.mxu3 %v1469_v41 }
 0x672   : > { %2139 = vmatpush.msra.mxu3 %v1468_v42 }
 0x673   : > { %3250 = vmatmul.msk.f32.vlgmr.msra.gmra.mxu3 %vm1484_vm5, %v4096_v26  ;;  %v1383_v26 = vld [vmem:[%s4568_s7] sm:$0xff] }
 0x674   : > { %2001 = vmatpush.msrb.mxu1 %v1383_v26 }
 0x676   : > { %2076 = vmatpush.msra.mxu1 %v1450_v59 }
 0x678   : > { %2077 = vmatpush.msra.mxu1 %v1449_v60  ;;  %v3472_v60 = vld [vmem:[%s4575_s15] ss:$0 sm:$0xff]  ;;  %s4578_s15 = sld [smem:[#allocation23_spill]] }
 0x67a   : > { %2078 = vmatpush.msra.mxu1 %v1448_v62 }
 0x67e   : > { %v2214_v9 = vld [vmem:[%s4578_s15] sm:$0x3]  ;;  %s4581_s15 = smov 125  }
 0x67f   : > { %3258 = vmatpush.msk.msrb.mxu3 %vm1603_vm1, %v2214_v9 }
 0x6a3   : > { %v1932_v51 = vpop.f32.mrf.mxu2 }
 0x6a4   : > { %v1935_v52 = vmul.f32 2.0, %v1932_v51  ;;  %v2215_v51 = vld [vmem:[%s4574_s11] sm:$0xff]  ;;  %s4514_s11 = smov 124  }
 0x6a5   : > { %2279 = vmatpush.msrb.mxu2 %v2215_v51 }
 0x6a6   : > { %v1936_v53 = vsub.f32 %v1935_v52, %v4164_v32 }
 0x6a8   : > { %3249 = vmatmul.msk.f32.vlgmr.msrb.gmra.mxu0 %vm1484_vm5, %v1936_v53  ;;  %v1887_v54 = vpop.f32.mrf.mxu3 }
 0x6a9   : > { %v1890_v55 = vmul.f32 2.0, %v1887_v54 }
 0x6ab   : > { %v1891_v56 = vsub.f32 %v1890_v55, %v4164_v32  ;;  %v1447_v32 = vld [vmem:[%s4572_s10 + $0x60] sm:$0xff] }
 0x6ac   : > { %2079 = vmatpush.msra.mxu1 %v1447_v32 }
 0x6ad   : > { %3246 = vmatmul.msk.f32.vlgmr.msrb.gmra.mxu1 %vm1484_vm5, %v1891_v56  ;;  %vm2388_vm5 = vcmask 15360  }
 0x6ae   : > { %2080 = vmatpush.msra.mxu1 %v1446_v3  ;;  %v2213_v3 = vld [vmem:[%s4577_s18] sm:$0x1]  ;;  %s4580_s18 = sld [smem:[#allocation26_spill]] }
 0x6b0   : > { %2081 = vmatpush.msra.mxu1 %v1445_v6 }
 0x6b2   : > { %2082 = vmatpush.msra.mxu1 %v1444_v8 }
 0x6b4   : > { %2083 = vmatpush.msra.mxu1 %v1443_v10 }
 0x6b6   : > { %2084 = vmatpush.msra.mxu1 %v1442_v12 }
 0x6b8   : > { %2085 = vmatpush.msra.mxu1 %v1441_v17 }
 0x6ba   : > { %2086 = vmatpush.msra.mxu1 %v1440_v4 }
 0x6bc   : > { %2087 = vmatpush.msra.mxu1 %v1439_v18 }
 0x6bd   : > { %v2028_v28 = vpop.f32.mrf.mxu2 }
 0x6be   : > { %2088 = vmatpush.msra.mxu1 %v1438_v19 }
 0x6c0   : > { %2089 = vmatpush.msra.mxu1 %v1437_v21 }
 0x6c2   : > { %2090 = vmatpush.msra.mxu1 %v1436_v22  ;;  %v1957_v24 = vpop.f32.mrf.mxu3 }
 0x6c3   : > { %v1981_v34 = vadd.f32 %v1980_v25, %v1957_v24 }
 0x6c4   : > { %2091 = vmatpush.msra.mxu1 %v1435_v23 }
 0x6c6   : > { %2189 = vmatpush.msrb.mxu1 %v4296_v38 }
 0x6dc   : > { %v2048_v27 = vpop.f32.mrf.mxu3 }
 0x6dd   : > { %v2049_v29 = vadd.f32 %v2048_v27, %v2028_v28 }
 0x6f6   : > { %v2141_v41 = vpop.f32.mrf.mxu3 }
 0x6f7   : > { %v2142_v45 = vadd.f32 %v3470_v40, %v2141_v41 }
 0x725   : > { %v2071_v30 = vpop.f32.mrf.mxu0 }
 0x726   : > { %v2074_v31 = vadd.f32 %v2071_v30, %v2049_v29 }
 0x728   : > { %v2075_v33 = vmax.f32 %v2074_v31, 0.0 }
 0x72a   : > { %2116 = vmatmul.f32.vlgmr.msra.gmra.mxu2 %v2075_v33  ;;  %v2003_v35 = vpop.f32.mrf.mxu1 }
 0x72b   : > { %v2006_v36 = vadd.f32 %v2003_v35, %v1981_v34  ;;  %v2217_v35 = vld [vmem:[%s4580_s18] sm:$0xf] }
 0x72d   : > { %v2007_v37 = vmax.f32 %v2006_v36, 0.0 }
 0x72f   : > { %2092 = vmatmul.f32.vlgmr.msra.gmra.mxu1 %v2007_v37 }
 0x7ac   : > { %v2093_v42 = vpop.f32.mrf.mxu1 }
 0x7ad   : > { %v2099_v43 = vadd.f32 %v3471_v39, %v2093_v42  ;;  %v2117_v44 = vpop.f32.mrf.mxu2 }
 0x7af   : > { %v2120_v46 = vadd.f32 %v2117_v44, %v2099_v43 }
 0x7b1   : > { %v2144_v47 = vadd.f32 %v2142_v45, %v2120_v46 }
 0x7b3   : > { %v2145_v48 = vmax.f32 %v2144_v47, 0.0 }
 0x7b5   : > { %3251 = vmatmul.msk.f32.vlgmr.msra.gmra.mxu0 %vm1508_vm0, %v2145_v48 }
 0x832   : > { %v2166_v49 = vpop.f32.mrf.mxu0 }
 0x833   : > { %v2169_v50 = vsub.f32 %v2145_v48, %v2166_v49 }
 0x835   : > { %v2170_v26 = vmul.f32 %v2169_v50, %v2169_v50 }
 0x837   : > { %3252 = vmatmul.msk.f32.vlgmr.msrb.gmra.mxu1 %vm1508_vm0, %v2170_v26 }
 0x8b4   : > { %v2191_v52 = vpop.f32.mrf.mxu1 }
 0x8b5   : > { %v2192_v53 = vadd.f32 1e-05, %v2191_v52 }
 0x8b7   : > { %3487 = vrsqrt.f32 %v2192_v53  ;;  %vm2200_vm3 = vweird.f32 %v2192_v53 }
 0x8bd   : > { %v3488_v54 = vpop.eup %3487 }
 0x8be   : > { %v2195_v55 = vmul.f32 %v3488_v54, %v2192_v53  ;;  %vm2201_vm2 = vweird.f32 %v3488_v54 }
 0x8bf   : > { %vm2202_vm4 = vmor %vm2200_vm3, %vm2201_vm2  ;;  %vm3063_vm3 = vcmask 97280  }
 0x8c0   : > { %v2196_v56 = vmul.f32 %v3488_v54, %v2195_v55 }
 0x8c2   : > { %v2197_v57 = vmul.f32 0.5, %v2196_v56 }
 0x8c4   : > { %v2198_v58 = vsub.f32 1.5, %v2197_v57 }
 0x8c6   : > { %v2199_v59 = vmul.f32 %v3488_v54, %v2198_v58 }
 0x8c8   : > { %v2203_v61 = vsel %vm2202_vm4, %v3488_v54, %v2199_v59 }
 0x8c9   : > { %v2204_v62 = vmul.f32 %v2203_v61, %v2169_v50 }
 0x8cb   : > { %v2208_v32 = vmul.f32 %v3472_v60, %v2204_v62 }
 0x8cd   : > { %v4306_v2 = vadd.f32 %v3473_v63, %v2208_v32 }
 0x8cf   : > { %2353 = vrot.lane.b32.xlu0 %v4306_v2, %s4512_s26  ;;  %2307 = vrot.lane.b32.xlu1 %v4306_v2, %s4520_s23 }
 0x8d0   : > { %2330 = vrot.lane.b32.xlu2 %v4306_v2, %s4514_s11  ;;  %3253 = vmatmul.msk.f32.vlgmr.msrb.gmra.mxu2 %vm1508_vm0, %v4306_v2 }
 0x8d1   : > { %2302 = vmatpush.msrb.mxu0 %v4306_v2 }
 0x8d2   : > { %3254 = vmatmul.msk.f32.vlgmr.msrb.gmra.mxu0 %vm1508_vm0, %v2213_v3 }
 0x92a   : > { %v2331_v5 = vpop.permute.xlu2 %2330 }
 0x92b   : > { %2348 = vmatpush.msra.mxu2 %v2331_v5 }
 0x92c   : > { %3256 = vmatmul.msk.f32.vlgmr.msra.gmra.mxu2 %vm1508_vm0, %v2213_v3 }
 0x941   : > { %v2354_v6 = vpop.permute.xlu0 %2353  ;;  %v2308_v7 = vpop.permute.xlu1 %2307 }
 0x942   : > { %2325 = vmatpush.msra.mxu1 %v2308_v7  ;;  %2371 = vmatpush.msra.mxu0 %v2354_v6 }
 0x943   : > { %3255 = vmatmul.msk.f32.vlgmr.msra.gmra.mxu1 %vm1508_vm0, %v2213_v3  ;;  %3257 = vmatmul.msk.f32.vlgmr.msra.gmra.mxu0 %vm1508_vm0, %v2213_v3 }
 0x94f   : > { %v2304_v10 = vpop.f32.mrf.mxu0 }
 0x953   : > { %v2281_v8 = vpop.f32.mrf.mxu2 }
 0x954   : > { %2433 = vmatpush.msrb.mxu1 %v2281_v8 }
 0x9af   : > { %v2350_v11 = vpop.f32.mrf.mxu2 }
 0x9b0   : > { %v2380_v13 = vrot.slane %v2350_v11, 6 }
 0x9c0   : > { %v2327_v12 = vpop.f32.mrf.mxu1  ;;  %v2373_v17 = vpop.f32.mrf.mxu0 }
 0x9c1   : > { %v2377_v0 = vrot.slane %v2327_v12, 7  ;;  %v2383_v14 = vrot.slane %v2373_v17, 5 }
 0x9c3   : > { %v2385_v15 = vsel %vm1601_vm6, %v2304_v10, %v2377_v0 }
 0x9c4   : > { %v2386_v4 = vsel %vm1603_vm1, %v2385_v15, %v2380_v13 }
 0x9c5   : > { %v2387_v16 = vsel %vm1605_vm7, %v2386_v4, %v2383_v14 }
 0x9c6   : > { %3259 = vmatmul.msk.f32.vlgmr.msrb.gmra.mxu3 %vm2388_vm5, %v2387_v16 }
 0xa49   : > { %v2412_v18 = vpop.f32.mrf.mxu3 }
 0xa4a   : > { %3260 = vmatmul.msk.f32.vlgmr.msrb.gmra.mxu1 %vm1508_vm0, %v2412_v18 }
 0xac7   : > { %v2435_v19 = vpop.f32.mrf.mxu1 }
 0xac8   : > { %v2436_v20 = vadd.f32 %v2435_v19, %v2216_v1 }
 0xaca   : > { %v3261_v21 = vmul.f32 -1.442695, %v2436_v20 }
 0xacc   : > { %3489 = vpow2.f32 %v3261_v21 }
 0xad2   : > { %v3490_v22 = vpop.eup %3489 }
 0xad3   : > { %v2441_v23 = vadd.f32 1.0, %v3490_v22 }
 0xad5   : > { %3491 = vrcp.f32 %v2441_v23  ;;  %v2453_v28 = vand.u32 2147483648, %v2441_v23  ;;  %v2451_v30 = vand.u32 2147483647, %v2441_v23  ;;  %vm2447_vm6 = vweird.f32 %v2441_v23 }
 0xad7   : > { %v2454_v33 = vor.u32 1.1754944e-38, %v2453_v28  ;;  %vm2452_vm12 = vcmp.eq.f32.partialorder %v2451_v30, 8.507059e+37 }
 0xadb   : > { %v3492_v24 = vpop.eup %3491 }
 0xadc   : > { %v2443_v25 = vmul.f32 %v3492_v24, %v2441_v23  ;;  %vm2448_vm1 = vweird.f32 %v3492_v24 }
 0xadd   : > { %vm2449_vm7 = vmor %vm2447_vm6, %vm2448_vm1 }
 0xade   : > { %v2444_v27 = vsub.f32 1.0, %v2443_v25 }
 0xae0   : > { %v2445_v29 = vmul.f32 %v3492_v24, %v2444_v27 }
 0xae2   : > { %v2446_v31 = vadd.f32 %v3492_v24, %v2445_v29 }
 0xae4   : > { %v2450_v34 = vsel %vm2449_vm7, %v3492_v24, %v2446_v31 }
 0xae5   : > { %v2455_v36 = vsel %vm2452_vm12, %v2454_v33, %v2450_v34 }
 0xae6   : > { %3262 = vmatpush.msk.msrb.mxu2 %vm1679_vm11, %v2455_v36 }
 0xae7   : > { %3263 = vmatmul.msk.f32.vlgmr.msrb.gmra.mxu2 %vm1675_vm13, %v2217_v35 }
 0xb6a   : > { %v2480_v37 = vpop.f32.mrf.mxu2 }
 0xb6b   : > { %v2483_v39 = vsel %vm1703_vm14, %v2480_v37, -inf }
 0xb6c   : > { %2484 = vmax.xlane.f32.xlu2 %v2483_v39 }
 0xbdf   : > { %v2485_v40 = vpop.xlane.xlu2 %2484 }
 0xbe0   : > { %v2486_v41 = vsub.f32 %v2480_v37, %v2485_v40 }
 0xbe2   : > { %v2487_v42 = vmul.f32 1.442695, %v2486_v41 }
 0xbe4   : > { %3493 = vpow2.f32 %v2487_v42 }
 0xbea   : > { %v3494_v43 = vpop.eup %3493 }
 0xbeb   : > { %v2489_v44 = vsel %vm1703_vm14, %v3494_v43, 0.0  ;;  %vm2673_vm14 = vcmask 48128  }
 0xbec   : > { %2490 = vadd.xlane.f32.xlu1 %v2489_v44 }
 0xc5f   : > { %v2491_v45 = vpop.xlane.xlu1 %2490 }
 0xc60   : > { %3495 = vrcp.f32 %v2491_v45  ;;  %v2503_v49 = vand.u32 2147483648, %v2491_v45  ;;  %v2501_v26 = vand.u32 2147483647, %v2491_v45  ;;  %vm2497_vm15 = vweird.f32 %v2491_v45 }
 0xc62   : > { %v2504_v52 = vor.u32 1.1754944e-38, %v2503_v49  ;;  %vm2502_vm9 = vcmp.eq.f32.partialorder %v2501_v26, 8.507059e+37 }
 0xc66   : > { %v3496_v46 = vpop.eup %3495 }
 0xc67   : > { %v2493_v47 = vmul.f32 %v3496_v46, %v2491_v45  ;;  %vm2498_vm11 = vweird.f32 %v3496_v46 }
 0xc68   : > { %vm2499_vm8 = vmor %vm2497_vm15, %vm2498_vm11 }
 0xc69   : > { %v2494_v48 = vsub.f32 1.0, %v2493_v47 }
 0xc6b   : > { %v2495_v50 = vmul.f32 %v3496_v46, %v2494_v48 }
 0xc6d   : > { %v2496_v51 = vadd.f32 %v3496_v46, %v2495_v50 }
 0xc6f   : > { %v2500_v53 = vsel %vm2499_vm8, %v3496_v46, %v2496_v51 }
 0xc70   : > { %v2505_v54 = vsel %vm2502_vm9, %v2504_v52, %v2500_v53 }
 0xc71   : > { %v2506_v55 = vmul.f32 %v3494_v43, %v2505_v54 }
 0xc73   : > { %2512 = vrot.lane.b32.xlu0 %v2506_v55, %s3712_s1  ;;  %3315 = vpush %v2506_v55  ;;  %v2583_v56 = vrot.slane %v2506_v55, 2  ;;  %v2545_v57 = vrot.slane %v2506_v55, 1  ;;  %v2621_v58 = vrot.slane %v2506_v55, 3 }
 0xc75   : > { %2588 = vrot.lane.b32.xlu1 %v2583_v56, %s3712_s1  ;;  %2572 = vrot.lane.b32.xlu2 %v2545_v57, %s4581_s15 }
 0xc7b   : > { %2523 = vrot.lane.b32.xlu0 %v2506_v55, %s4520_s23 }
 0xc7d   : > { %2648 = vrot.lane.b32.xlu1 %v2621_v58, %s4581_s15  ;;  %2637 = vrot.lane.b32.xlu2 %v2621_v58, %s4520_s23 }
 0xc83   : > { %2534 = vrot.lane.b32.xlu0 %v2506_v55, %s4581_s15 }
 0xc8b   : > { %2550 = vrot.lane.b32.xlu0 %v2545_v57, %s3712_s1 }
 0xc93   : > { %2561 = vrot.lane.b32.xlu0 %v2545_v57, %s4520_s23 }
 0xc9b   : > { %2599 = vrot.lane.b32.xlu0 %v2583_v56, %s4520_s23 }
 0xca3   : > { %2610 = vrot.lane.b32.xlu0 %v2583_v56, %s4581_s15 }
 0xcab   : > { %2626 = vrot.lane.b32.xlu0 %v2621_v58, %s3712_s1  ;;  %s4347_s1 = spop %3315 }
 0xccf   : > { %v2573_v32 = vpop.permute.xlu2 %2572 }
 0xcd7   : > { %v2638_v8 = vpop.permute.xlu2 %2637 }
 0xce5   : > { %v2513_v59 = vpop.permute.xlu0 %2512 }
 0xce6   : > { %3317 = vpush %v2513_v59 }
 0xce7   : > { %v2589_v3 = vpop.permute.xlu1 %2588 }
 0xced   : > { %v2524_v60 = vpop.permute.xlu0 %2523 }
 0xcee   : > { %3319 = vpush %v2524_v60 }
 0xcef   : > { %v2649_v9 = vpop.permute.xlu1 %2648 }
 0xcf5   : > { %v2535_v61 = vpop.permute.xlu0 %2534 }
 0xcf6   : > { %3321 = vpush %v2535_v61 }
 0xcf7   : > { %3323 = vpush %v2545_v57  ;;  %v2509_v57 = vstv %s4347_s1  ;;  %s4588_s1 = sld [smem:[#allocation31_spill]] }
 0xcf8   : > { %v2511_v59 = vmul.f32 %v2509_v57, %v4306_v2 }
 0xcfd   : > { %v2551_v62 = vpop.permute.xlu0 %2550 }
 0xcfe   : > { %3325 = vpush %v2551_v62 }
 0xd05   : > { %v2562_v63 = vpop.permute.xlu0 %2561 }
 0xd06   : > { %3327 = vpush %v2562_v63 }
 0xd07   : > { %3329 = vpush %v2573_v32 }
 0xd08   : > { %3331 = vpush %v2583_v56 }
 0xd09   : > { %3333 = vpush %v2589_v3 }
 0xd0d   : > { %v2600_v5 = vpop.permute.xlu0 %2599 }
 0xd0e   : > { %3335 = vpush %v2600_v5 }
 0xd15   : > { %v2611_v6 = vpop.permute.xlu0 %2610 }
 0xd16   : > { %3337 = vpush %v2611_v6 }
 0xd17   : > { %3339 = vpush %v2621_v58  ;;  %s4349_s22 = spop %3317 }
 0xd18   : > { %v2515_v30 = vstv %s4349_s22  ;;  %s4586_s22 = sld [smem:[#allocation30_spill]] }
 0xd19   : > { %v2517_v31 = vmul.f32 %v2515_v30, %v4306_v2 }
 0xd1d   : > { %v2627_v7 = vpop.permute.xlu0 %2626 }
 0xd1e   : > { %3341 = vpush %v2627_v7 }
 0xd1f   : > { %3343 = vpush %v2638_v8  ;;  %s4351_s18 = spop %3319 }
 0xd20   : > { %3345 = vpush %v2649_v9  ;;  %v2526_v20 = vstv %s4351_s18  ;;  %s4587_s18 = sld [smem:[#allocation27_spill]] }
 0xd21   : > { %v2528_v24 = vmul.f32 %v2526_v20, %v4306_v2 }
 0xd27   : > { %s4353_s15 = spop %3321 }
 0xd28   : > { %s4355_s26 = spop %3323  ;;  %v2537_v27 = vstv %s4353_s15  ;;  %s4589_s15 = sld [smem:[#allocation36_spill]] }
 0xd29   : > { %v2539_v29 = vmul.f32 %v2537_v27, %v4306_v2  ;;  %v2547_v42 = vstv %s4355_s26  ;;  %s4585_s26 = sld [smem:[#allocation28_spill]] }
 0xd2a   : > { %v2549_v45 = vmul.f32 %v2547_v42, %v4306_v2 }
 0xd2f   : > { %s3326_s11 = spop %3325 }
 0xd30   : > { %v2553_v10 = vstv %s3326_s11 }
 0xd31   : > { %v2555_v11 = vmul.f32 %v2553_v10, %v4306_v2  ;;  %v3499_v10 = vld [vmem:[%s3732_s9] sm:$0xff] }
 0xd33   : > { %2557 = vrot.lane.b32.xlu0 %v2555_v11, %s4520_s23  ;;  %v3500_v11 = vld [vmem:[%s3737_s13] sm:$0xff] }
 0xd37   : > { %s3328_s2 = spop %3327 }
 0xd38   : > { %v2564_v12 = vstv %s3328_s2  ;;  %s3330_s3 = spop %3329  ;;  %s4583_s2 = smov 122  }
 0xd39   : > { %v2566_v13 = vmul.f32 %v2564_v12, %v4306_v2  ;;  %s4360_s4 = spop %3331  ;;  %v2575_v14 = vstv %s3330_s3  ;;  %v2219_v12 = vld [vmem:[%s4585_s26] sm:$0xff]  ;;  %s1301_s26 = sand.u32 1, %s3653_s16  }
 0xd3a   : > { %s3334_s5 = spop %3333  ;;  %v2577_v4 = vmul.f32 %v2575_v14, %v4306_v2  ;;  %v2585_v34 = vstv %s4360_s4  ;;  %s3718_s4 = smov 6   ;;  %v2218_v14 = vld [vmem:[%s4587_s18] sm:$0xff] }
 0xd3b   : > { %v2591_v17 = vstv %s3334_s5  ;;  %2568 = vrot.lane.b32.xlu1 %v2566_v13, %s4582_s6  ;;  %v2587_v36 = vmul.f32 %v2585_v34, %v4306_v2  ;;  %v2221_v13 = vld [vmem:[%s4586_s22] sm:$0xff]  ;;  %s3223_s22 = sshll.u32 %s1301_s26, 3  ;;  %s3279_s18 = sshll.u32 %s3960_s0, 3 }
 0xd3c   : > { %v2593_v0 = vmul.f32 %v2591_v17, %v4306_v2  ;;  %s3611_s0 = scalar_lea.hbm %s3937_s19, 16 }
 0xd3e   : > { %2595 = vrot.lane.b32.xlu2 %v2593_v0, %s4520_s23 }
 0xd3f   : > { %s3336_s11 = spop %3335 }
 0xd40   : > { %v2602_v15 = vstv %s3336_s11 }
 0xd41   : > { %v2604_v16 = vmul.f32 %v2602_v15, %v4306_v2  ;;  %v2222_v15 = vld [vmem:[%s4588_s1] sm:$0xff]  ;;  %s3076_s1 = scalar_lea.hbm %s3937_s19, %s3279_s18 }
 0xd43   : > { %2579 = vrot.lane.b32.xlu1 %v2577_v4, %s4583_s2  ;;  %v2257_v4 = vld [vmem:[%s4589_s15] sm:$0xff] }
 0xd46   : > { %2606 = vrot.lane.b32.xlu2 %v2604_v16, %s4582_s6 }
 0xd47   : > { %s3338_s7 = spop %3337 }
 0xd48   : > { %v2613_v18 = vstv %s3338_s7  ;;  %s4370_s5 = spop %3339  ;;  %s4584_s7 = smov 126  }
 0xd49   : > { %v2615_v1 = vmul.f32 %v2613_v18, %v4306_v2  ;;  %v2623_v26 = vstv %s4370_s5  ;;  %s4591_s5 = sld [smem:[#allocation32_spill]] }
 0xd4a   : > { %v2625_v51 = vmul.f32 %v2623_v26, %v4306_v2 }
 0xd4e   : > { %2617 = vrot.lane.b32.xlu2 %v2615_v1, %s4583_s2 }
 0xd4f   : > { %s3342_s3 = spop %3341  ;;  %v2223_v18 = vld [vmem:[%s4591_s5] sm:$0xff] }
 0xd50   : > { %v2629_v19 = vstv %s3342_s3  ;;  %s3344_s11 = spop %3343  ;;  %s4592_s3 = sld [smem:[#allocation33_spill]] }
 0xd51   : > { %v2631_v21 = vmul.f32 %v2629_v19, %v4306_v2  ;;  %s3346_s23 = spop %3345  ;;  %v2640_v25 = vstv %s3344_s11  ;;  %s4593_s11 = sld [smem:[#allocation34_spill]] }
 0xd52   : > { %v2651_v22 = vstv %s3346_s23  ;;  %v2642_v28 = vmul.f32 %v2640_v25, %v4306_v2  ;;  %s3716_s23 = smov 4  }
 0xd53   : > { %v2653_v23 = vmul.f32 %v2651_v22, %v4306_v2  ;;  %2633 = vrot.lane.b32.xlu0 %v2631_v21, %s4584_s7 }
 0xd55   : > { %2655 = vrot.lane.b32.xlu1 %v2653_v23, %s4583_s2 }
 0xd56   : > { %2530 = vrot.lane.b32.xlu2 %v2528_v24, %s4582_s6  ;;  %v2239_v1 = vld [vmem:[%s4592_s3 + $0x78] sm:$0xff]  ;;  %v2238_v19 = vld [vmem:[%s4592_s3 + $0x70] sm:$0xff]  ;;  %v2237_v21 = vld [vmem:[%s4592_s3 + $0x68] sm:$0xff] }
 0xd57   : > { %v2255_v20 = vld [vmem:[%s4593_s11 + $0x78] sm:$0xff]  ;;  %v2254_v22 = vld [vmem:[%s4593_s11 + $0x70] sm:$0xff]  ;;  %v2236_v23 = vld [vmem:[%s4592_s3 + $0x60] sm:$0xff] }
 0xd58   : > { %v2252_v24 = vld [vmem:[%s4593_s11 + $0x60] sm:$0xff]  ;;  %v2251_v25 = vld [vmem:[%s4593_s11 + $0x58] sm:$0xff]  ;;  %v2234_v27 = vld [vmem:[%s4592_s3 + $0x50] sm:$0xff] }
 0xd59   : > { %v2249_v30 = vld [vmem:[%s4593_s11 + $0x48] sm:$0xff]  ;;  %v2231_v34 = vld [vmem:[%s4592_s3 + $0x38] sm:$0xff]  ;;  %v2244_v26 = vld [vmem:[%s4593_s11 + $0x20] sm:$0xff] }
 0xd5b   : > { %2644 = vrot.lane.b32.xlu0 %v2642_v28, %s4582_s6  ;;  %s3717_s6 = smov 2   ;;  %v2250_v28 = vld [vmem:[%s4593_s11 + $0x50] sm:$0xff] }
 0xd5d   : > { %2541 = vrot.lane.b32.xlu1 %v2539_v29, %s4583_s2  ;;  %s4590_s2 = sld [smem:[#allocation29_spill]]  ;;  %v2233_v29 = vld [vmem:[%s4592_s3 + $0x48] sm:$0xff] }
 0xd63   : > { %2519 = vrot.lane.b32.xlu0 %v2517_v31, %s4584_s7  ;;  %v2220_v16 = vld [vmem:[%s4590_s2] sm:$0xff]  ;;  %s4594_s7 = sld [smem:[#allocation35_spill]]  ;;  %s1303_s2 = scalar_lea.vmem [#allocation8], %s3223_s22 }
 0xd64   : > { %v2232_v31 = vld [vmem:[%s4592_s3 + $0x40] sm:$0xff]  ;;  %s3078_s5 = sshll.u32 %s1303_s2, 4  ;;  %s3079_s5 = int_to_ptr.vmem [resolvable:$true] %s3078_s5 }
 0xd98   : > { %v2596_v33 = vpop.permute.xlu2 %2595 }
 0xd99   : > { %v2598_v37 = vadd.f32 %v2596_v33, %v2587_v36  ;;  %v2248_v33 = vld [vmem:[%s4593_s11 + $0x40] sm:$0xff]  ;;  %v2230_v36 = vld [vmem:[%s4592_s3 + $0x30] sm:$0xff] }
 0xda0   : > { %v2607_v35 = vpop.permute.xlu2 %2606 }
 0xda1   : > { %v2609_v39 = vadd.f32 %v2607_v35, %v2598_v37  ;;  %v2247_v35 = vld [vmem:[%s4593_s11 + $0x38] sm:$0xff]  ;;  %v2246_v37 = vld [vmem:[%s4593_s11 + $0x30] sm:$0xff] }
 0xda5   : > { %v2558_v44 = vpop.permute.xlu0 %2557 }
 0xda6   : > { %v2560_v46 = vadd.f32 %v2558_v44, %v2549_v45  ;;  %v2227_v44 = vld [vmem:[%s4592_s3 + $0x18] sm:$0xff] }
 0xda8   : > { %v2618_v40 = vpop.permute.xlu2 %2617 }
 0xda9   : > { %v2620_v41 = vadd.f32 %v2618_v40, %v2609_v39  ;;  %v2229_v39 = vld [vmem:[%s4592_s3 + $0x28] sm:$0xff]  ;;  %v2228_v40 = vld [vmem:[%s4592_s3 + $0x20] sm:$0xff] }
 0xdab   : > { %2664 = vrot.lane.b32.xlu2 %v2620_v41, %s3716_s23  ;;  %s4595_s23 = sld [smem:[#allocation37_spill]] }
 0xdad   : > { %v2569_v43 = vpop.permute.xlu1 %2568 }
 0xdae   : > { %v2571_v47 = vadd.f32 %v2569_v43, %v2560_v46 }
 0xdb0   : > { %v2531_v61 = vpop.permute.xlu2 %2530 }
 0xdb5   : > { %v2580_v48 = vpop.permute.xlu1 %2579 }
 0xdb6   : > { %v2582_v49 = vadd.f32 %v2580_v48, %v2571_v47  ;;  %v2226_v48 = vld [vmem:[%s4592_s3 + $0x10] sm:$0xff] }
 0xdb8   : > { %2660 = vrot.lane.b32.xlu0 %v2582_v49, %s3717_s6  ;;  %v2245_v49 = vld [vmem:[%s4593_s11 + $0x28] sm:$0xff]  ;;  %s4596_s6 = sld [smem:[#allocation38_spill]] }
 0xdc5   : > { %v2634_v50 = vpop.permute.xlu0 %2633 }
 0xdc6   : > { %v2636_v52 = vadd.f32 %v2634_v50, %v2625_v51  ;;  %v2225_v50 = vld [vmem:[%s4592_s3 + $0x8] sm:$0xff]  ;;  %v2224_v51 = vld [vmem:[%s4592_s3] sm:$0xff] }
 0xdc7   : > { %v2656_v55 = vpop.permute.xlu1 %2655 }
 0xdcd   : > { %v2645_v53 = vpop.permute.xlu0 %2644 }
 0xdce   : > { %v2647_v54 = vadd.f32 %v2645_v53, %v2636_v52  ;;  %v2243_v52 = vld [vmem:[%s4593_s11 + $0x18] sm:$0xff]  ;;  %v2242_v53 = vld [vmem:[%s4593_s11 + $0x10] sm:$0xff] }
 0xdcf   : > { %v2542_v63 = vpop.permute.xlu1 %2541 }
 0xdd0   : > { %v2658_v56 = vadd.f32 %v2656_v55, %v2647_v54  ;;  %v2241_v54 = vld [vmem:[%s4593_s11 + $0x8] sm:$0xff]  ;;  %v2240_v55 = vld [vmem:[%s4593_s11] sm:$0xff] }
 0xdd2   : > { %2668 = vrot.lane.b32.xlu1 %v2658_v56, %s3718_s4  ;;  %s4597_s4 = sld [smem:[#allocation39_spill]] }
 0xdd5   : > { %v2520_v58 = vpop.permute.xlu0 %2519 }
 0xdd6   : > { %v2522_v60 = vadd.f32 %v2520_v58, %v2511_v59 }
 0xdd8   : > { %v2533_v62 = vadd.f32 %v2531_v61, %v2522_v60 }
 0xdda   : > { %v2544_v3 = vadd.f32 %v2542_v63, %v2533_v62 }
 0xe05   : > { %v2665_v6 = vpop.permute.xlu2 %2664 }
 0xe2a   : > { %v2661_v32 = vpop.permute.xlu0 %2660 }
 0xe2b   : > { %v2671_v5 = vsel %vm2388_vm5, %v2544_v3, %v2661_v32 }
 0xe2c   : > { %v2672_v8 = vsel %vm1675_vm13, %v2671_v5, %v2665_v6 }
 0xe44   : > { %v2669_v7 = vpop.permute.xlu1 %2668 }
 0xe45   : > { %v4398_v9 = vsel %vm2673_vm14, %v2672_v8, %v2669_v7  ;;  %v3475_v7 = vld [vmem:[%s4594_s7] ss:$0 sm:$0xff]  ;;  %s3080_s7 = sshll.u32 %s3076_s1, 4  ;;  %s3081_s7 = int_to_ptr.hbm [resolvable:$true] %s3080_s7 }
 0xe46   : > { %2690 = vmatpush.msrb.mxu0 %v4398_v9  ;;  %2732 = vmatpush.msra.mxu1 %v4398_v9 }
 0xe47   : > { %3264 = vmatmul.msk.f32.vlgmr.msrb.gmra.mxu0 %vm1508_vm0, %v3499_v10  ;;  %3266 = vmatmul.msk.f32.vlgmr.msra.gmra.mxu1 %vm1508_vm0, %v3500_v11 }
 0xe48   : > { %2777 = vmatpush.msra.mxu0 %v2219_v12  ;;  %2823 = vmatpush.msrb.mxu1 %v2220_v16 }
 0xe4a   : > { %2868 = vmatpush.msrb.mxu0 %v2221_v13  ;;  %2898 = vmatpush.msra.mxu1 %v2239_v1 }
 0xe4c   : > { %2899 = vmatpush.msra.mxu1 %v2238_v19 }
 0xe4e   : > { %2900 = vmatpush.msra.mxu1 %v2237_v21 }
 0xe50   : > { %2901 = vmatpush.msra.mxu1 %v2236_v23 }
 0xec4   : > { %v2692_v17 = vpop.f32.mrf.mxu0  ;;  %v2734_v0 = vpop.f32.mrf.mxu1 }
 0xec5   : > { %2710 = vmatpush.msra.mxu3 %v2692_v17  ;;  %2752 = vmatpush.msra.mxu2 %v2734_v0 }
 0xec6   : > { %3268 = vmatmul.msk.f32.vlgmr.msra.gmra.mxu0 %vm1508_vm0, %v2692_v17  ;;  %3265 = vmatmul.msk.f32.vlgmr.msra.gmra.mxu3 %vm1508_vm0, %v3499_v10 }
 0xec7   : > { %3267 = vmatmul.msk.f32.vlgmr.msra.gmra.mxu2 %vm1508_vm0, %v3500_v11  ;;  %2800 = vmatpush.msrb.mxu3 %v2218_v14 }
 0xec8   : > { %2848 = vmatpush.msrb.mxu2 %v2222_v15  ;;  %2961 = vmatpush.msra.mxu0 %v2257_v4 }
 0xec9   : > { %2891 = vmatpush.msra.mxu3 %v2223_v18  ;;  %v3035_v18 = vld [vmem:[%s3927_s27] sm:$0xff] }
 0xeca   : > { %2922 = vmatpush.msra.mxu2 %v2255_v20 }
 0xecc   : > { %2923 = vmatpush.msra.mxu2 %v2254_v22 }
 0xece   : > { %3272 = vmatmul.msk.f32.vlgmr.msrb.gmra.mxu0 %vm1508_vm0, %v4398_v9  ;;  %3269 = vmatmul.msk.f32.vlgmr.msrb.gmra.mxu3 %vm1508_vm0, %v4398_v9 }
 0xecf   : > { %3271 = vmatmul.msk.f32.vlgmr.msrb.gmra.mxu2 %vm1508_vm0, %v2734_v0  ;;  %3011 = vmatpush.msrb.mxu0 %v4296_v38 }
 0xed0   : > { %2986 = vmatpush.msrb.mxu3 %v4296_v38  ;;  %v2235_v38 = vld [vmem:[%s4592_s3 + $0x58] sm:$0xff] }
 0xed1   : > { %2902 = vmatpush.msra.mxu1 %v2235_v38  ;;  %v3476_v38 = vld [vmem:[%s4596_s6] ss:$0 sm:$0xff]  ;;  %s3605_s6 = sshra.s32 %s3081_s7, 4  ;;  %s3606_s6 = int_to_ptr.hbm [resolvable:$true] %s3605_s6 }
 0xed2   : > { %p3612_p7 = scmp.lt.s32.totalorder %s3606_s6, %s3937_s19 }
 0xed3   : > { %2903 = vmatpush.msra.mxu1 %v2234_v27 }
 0xed5   : > { %2904 = vmatpush.msra.mxu1 %v2233_v29 }
 0xed6   : > { %3274 = vmatmul.msk.f32.vlgmr.msra.gmra.mxu0 %vm1508_vm0, %v4306_v2  ;;  %v2253_v2 = vld [vmem:[%s4593_s11 + $0x68] sm:$0xff] }
 0xed7   : > { %2924 = vmatpush.msra.mxu2 %v2253_v2  ;;  %2905 = vmatpush.msra.mxu1 %v2232_v31  ;;  %v3478_v31 = vld [vmem:[#allocation7] ss:$0 sm:$0xff] }
 0xed9   : > { %2925 = vmatpush.msra.mxu2 %v2252_v24  ;;  %2906 = vmatpush.msra.mxu1 %v2231_v34 }
 0xedb   : > { %2926 = vmatpush.msra.mxu2 %v2251_v25  ;;  %2907 = vmatpush.msra.mxu1 %v2230_v36 }
 0xedd   : > { %2927 = vmatpush.msra.mxu2 %v2250_v28  ;;  %2908 = vmatpush.msra.mxu1 %v2229_v39  ;;  %v3477_v28 = vld [vmem:[%s4597_s4] ss:$0 sm:$0xff]  ;;  %s3607_s4 = scalar_lea.hbm %s3606_s6, 8 }
 0xede   : > { %p3608_p9 = scmp.ne.s32.totalorder %s3606_s6, %s3607_s4  ;;  %p3613_p8 = scmp.lt.s32.totalorder %s3611_s0, %s3607_s4 }
 0xedf   : > { %2928 = vmatpush.msra.mxu2 %v2249_v30  ;;  %2909 = vmatpush.msra.mxu1 %v2228_v40 }
 0xee0   : > { %p3609_p10 = pnand %p3608_p9, %p3977_p5  ;;  %p3614_p11 = por %p3613_p8, %p3612_p7 }
 0xee1   : > { %2929 = vmatpush.msra.mxu2 %v2248_v33  ;;  %2910 = vmatpush.msra.mxu1 %v2227_v44 }
 0xee2   : > { %p3610_p0 = pneg %p3609_p10 }
 0xee3   : > { %2930 = vmatpush.msra.mxu2 %v2247_v35  ;;  %2911 = vmatpush.msra.mxu1 %v2226_v48 }
 0xee4   : > { %p3615_p13 = pnand %p3614_p11, %p3610_p0 }
 0xee5   : > { %2931 = vmatpush.msra.mxu2 %v2246_v37  ;;  %2912 = vmatpush.msra.mxu1 %v2225_v50 }
 0xee7   : > { %2932 = vmatpush.msra.mxu2 %v2245_v49  ;;  %2913 = vmatpush.msra.mxu1 %v2224_v51 }
 0xee9   : > { %2933 = vmatpush.msra.mxu2 %v2244_v26 }
 0xeeb   : > { %2934 = vmatpush.msra.mxu2 %v2243_v52 }
 0xeed   : > { %2935 = vmatpush.msra.mxu2 %v2242_v53 }
 0xeef   : > { %2936 = vmatpush.msra.mxu2 %v2241_v54 }
 0xef1   : > { %2937 = vmatpush.msra.mxu2 %v2240_v55 }
 0xf43   : > { %v2779_v56 = vpop.f32.mrf.mxu0 }
 0xf49   : > { %v2712_v41 = vpop.f32.mrf.mxu3 }
 0xf4a   : > { %v2715_v42 = vmul.f32 2.0, %v2712_v41  ;;  %v2754_v43 = vpop.f32.mrf.mxu2 }
 0xf4b   : > { %v2757_v45 = vmul.f32 2.0, %v2754_v43  ;;  %v2870_v63 = vpop.f32.mrf.mxu0 }
 0xf4c   : > { %v2716_v46 = vsub.f32 %v2715_v42, %v4398_v9 }
 0xf4d   : > { %v2758_v47 = vsub.f32 %v2757_v45, %v4398_v9  ;;  %v3474_v9 = vld [vmem:[%s4595_s23] ss:$0 sm:$0xff]  ;;  %s3066_s23 = scalar_lea.sflag [#allocation4], %s1301_s26 }
 0xf4e   : > { %3270 = vmatmul.msk.f32.vlgmr.msrb.gmra.mxu1 %vm1508_vm0, %v2716_v46 }
 0xf4f   : > { %3273 = vmatmul.msk.f32.vlgmr.msra.gmra.mxu3 %vm1508_vm0, %v2758_v47 }
 0xf50   : > { %3058 = vmatpush.msra.mxu3 %v3035_v18 }
 0xf51   : > { %v2802_v57 = vpop.f32.mrf.mxu3 }
 0xf52   : > { %v2803_v58 = vadd.f32 %v2802_v57, %v2779_v56  ;;  %v2850_v61 = vpop.f32.mrf.mxu2 }
 0xf53   : > { %v2871_v32 = vadd.f32 %v2870_v63, %v2850_v61  ;;  %v2963_v10 = vpop.f32.mrf.mxu0 }
 0xf54   : > { %v2964_v13 = vadd.f32 %v3474_v9, %v2963_v10 }
 0xfcb   : > { %v2825_v59 = vpop.f32.mrf.mxu1 }
 0xfcc   : > { %v2828_v60 = vadd.f32 %v2825_v59, %v2803_v58 }
 0xfce   : > { %v2829_v62 = vmax.f32 %v2828_v60, 0.0 }
 0xfd0   : > { %2914 = vmatmul.f32.vlgmr.msra.gmra.mxu1 %v2829_v62 }
 0xfd2   : > { %v2893_v3 = vpop.f32.mrf.mxu3 }
 0xfd3   : > { %v2896_v5 = vadd.f32 %v2893_v3, %v2871_v32 }
 0xfd5   : > { %v2897_v6 = vmax.f32 %v2896_v5, 0.0 }
 0xfd7   : > { %2938 = vmatmul.f32.vlgmr.msra.gmra.mxu2 %v2897_v6 }
0x104d   : > { %v2915_v8 = vpop.f32.mrf.mxu1 }
0x104e   : > { %v2921_v11 = vadd.f32 %v3475_v7, %v2915_v8 }
0x105a   : > { %v2939_v12 = vpop.f32.mrf.mxu2 }
0x105b   : > { %v2942_v17 = vadd.f32 %v2939_v12, %v2921_v11 }
0x105d   : > { %v2966_v0 = vadd.f32 %v2964_v13, %v2942_v17 }
0x105f   : > { %v2967_v14 = vmax.f32 %v2966_v0, 0.0 }
0x1061   : > { %3275 = vmatmul.msk.f32.vlgmr.msrb.gmra.mxu3 %vm1508_vm0, %v2967_v14 }
0x10e4   : > { %v2988_v15 = vpop.f32.mrf.mxu3 }
0x10e5   : > { %v2991_v4 = vsub.f32 %v2967_v14, %v2988_v15 }
0x10e7   : > { %v2992_v16 = vmul.f32 %v2991_v4, %v2991_v4 }
0x10e9   : > { %3276 = vmatmul.msk.f32.vlgmr.msrb.gmra.mxu0 %vm1508_vm0, %v2992_v16 }
0x1166   : > { %v3013_v1 = vpop.f32.mrf.mxu0 }
0x1167   : > { %v3014_v19 = vadd.f32 1e-05, %v3013_v1 }
0x1169   : > { %3497 = vrsqrt.f32 %v3014_v19  ;;  %vm3022_vm10 = vweird.f32 %v3014_v19 }
0x116f   : > { %v3498_v20 = vpop.eup %3497 }
0x1170   : > { %v3017_v21 = vmul.f32 %v3498_v20, %v3014_v19  ;;  %vm3023_vm13 = vweird.f32 %v3498_v20 }
0x1171   : > { %vm3024_vm2 = vmor %vm3022_vm10, %vm3023_vm13 }
0x1172   : > { %v3018_v22 = vmul.f32 %v3498_v20, %v3017_v21 }
0x1174   : > { %v3019_v2 = vmul.f32 0.5, %v3018_v22 }
0x1176   : > { %v3020_v23 = vsub.f32 1.5, %v3019_v2 }
0x1178   : > { %v3021_v24 = vmul.f32 %v3498_v20, %v3020_v23 }
0x117a   : > { %v3025_v25 = vsel %vm3024_vm2, %v3498_v20, %v3021_v24 }
0x117b   : > { %v3026_v27 = vmul.f32 %v3025_v25, %v2991_v4 }
0x117d   : > { %v3030_v29 = vmul.f32 %v3476_v38, %v3026_v27 }
0x117f   : > { %v3034_v30 = vadd.f32 %v3477_v28, %v3030_v29 }
0x1181   : > { %3277 = vmatmul.msk.f32.vlgmr.msra.gmra.mxu3 %vm1508_vm0, %v3034_v30 }
0x1204   : > { %v3060_v33 = vpop.f32.mrf.mxu3 }
0x1205   : > { %v3061_v34 = vadd.f32 %v3478_v31, %v3060_v33 }
0x1207   : > { %3064 = vst.msk [vmem:[%s1303_s2] sm:$0xff] %vm3063_vm3, %v3061_v34 }
0x1208   : > { %3618 = shalt.err (!%p3615_p13)
}
0x1209   : > { %3359 = dma.vmem_to_hbm [thread:$0]  (%p3977_p5), %s3079_s5, 128, %s3081_s7, %s3066_s23  }
0x120a PF: > { %s4599_s22 = sld [smem:[#allocation43_spill]] }
0x120b   : > { %s4600_s18 = sld [smem:[#allocation41_spill]] }
0x1210   : > { %p3381_p1 = scmp.ge.s32.totalorder %s4599_s22, 2 }
0x1211   : > { %s3092_s1 = sand.u32 1, %s4600_s18  }
0x1212   : > { %p3372_p2 = pnand %p3381_p1, %p3981_p6  ;;  %s3093_s2 = scalar_lea.sflag [#allocation4], %s3092_s1 }
0x1214   : > { %p3373_p3 = pneg %p3372_p2 }
0x1216   : > { %3644 = dma.done.wait (%p3373_p3), %s3093_s2, 128  }
0x1217   : > { %3646 = vsyncadd (%p3373_p3), %s3093_s2, 4294967168  ;;  %s4602_s22 = sld [smem:[#allocation44_spill]]  ;;  %s4605_s15 = smov %s3653_s16 }
0x1218   : > { %s4603_s6 = sld [smem:[#allocation42_spill]] }
0x1219   : > { %s4604_s18 = sld [smem:[#allocation45_spill]] }
0x121d   : > { %p97_p4 = scmp.ge.s32.totalorder %s4602_s22, 4  }
0x121e   : > { %s4606_s16 = smov %s4603_s6 }
0x121f   :  { %99 = sbr.rel (!%p97_p4) target bundleno = 92 (0x5c), region = 281 }
0x1224   :  { %3099 = vsyncpa [#allocation3], 1 }
0x1225   :  { %3101 = vsyncpa [#allocation3 + $0x1], 1 }
0x1226   :  { %3102 = vsyncpa [#allocation6], 1 }
0x1227   :  { %3103 = vsyncpa [#allocation4], 1 }
0x1228   :  { %3105 = vsyncpa [#allocation4 + $0x1], 1 }

</bundles_post_ra>
